<compile_context>
chip_gen: v5e
topology: v5e:2x2
jax: 0.10.0
libtpu: 0.0.40
codegen_flags: <defaults>
</compile_context>

<pallas_src>
import jax
import jax.numpy as jnp
import numpy as np
from jax import lax
from jax.experimental import pallas as pl
from jax.experimental.pallas import tpu as pltpu


def seq2seq_kernel(x_emb_ref, h0_ref, enc_ref,
                   w1_ref, b1_ref, w2_ref, b2_ref, vrow_ref, bv_ref,
                   wihc_ref, wihe_ref, bih_ref, bhh_ref,
                   wout_ref, bout_ref,
                   preds_ref, hfin_ref):
    enc = enc_ref[...]                                   # (B, S, He)
    B, S, He = enc.shape
    A = w2_ref.shape[1]
    D = h0_ref.shape[1]
    T = preds_ref.shape[0]
    Vp = preds_ref.shape[2]                              # lane-dense logit width

    # ---- time-invariant encoder projection, computed ONCE -------------------
    pe = (jnp.dot(enc.reshape(B * S, He), w1_ref[...],
                  preferred_element_type=jnp.float32).reshape(B, S, A)
          + b1_ref[...])                                 # (B, S, A)

    # hoist all loop-invariant loads out of the decode loop
    v_row = vrow_ref[...]                                # (1, A)   attention V as a row
    bv = bv_ref[...]                                     # (1, 1)
    gh = bhh_ref[...]                                    # (1, 3D) == W_hh @ 0 + b_hh
    wihc = wihc_ref[...]                                 # (He, 3D)
    wihe = wihe_ref[...]                                 # (E, 3D)
    bih = bih_ref[...]                                   # (1, 3D)
    wout = wout_ref[...]                                 # (D, Vp + A)  fused [Wfc_pad | W2]
    bout = bout_ref[...]                                 # (1, Vp + A)  fused [b_fc_pad | b2]

    # attention query projection of the *initial* decoder hidden state
    ph0 = (jnp.dot(h0_ref[...], w2_ref[...],
                   preferred_element_type=jnp.float32) + b2_ref[...])    # (B, A)

    def step(t, carry):
        _, ph = carry                                    # ph == h_prev @ W2 + b2

        # ---- Bahdanau attention (VPU score reduce + softmax over S) --------
        act = jnp.tanh(pe + ph[:, None, :])              # (B, S, A)
        score = jnp.sum(act * v_row, axis=-1) + bv       # (B, S)   no 1-lane matmul
        m = jnp.max(score, axis=-1, keepdims=True)
        e = jnp.exp(score - m)
        attw = e / jnp.sum(e, axis=-1, keepdims=True)    # softmax over S
        ctx = jnp.sum(attw[:, :, None] * enc, axis=1)    # (B, He)

        # ---- one GRU step over [context ; embedding], zero initial state ---
        x_t = x_emb_ref[t]                               # (B, E) teacher-forced embed
        gi = (jnp.dot(ctx, wihc, preferred_element_type=jnp.float32)
              + jnp.dot(x_t, wihe, preferred_element_type=jnp.float32)
              + bih)                                     # (B, 3D)
        r = jax.nn.sigmoid(gi[:, 0:D] + gh[:, 0:D])
        z = jax.nn.sigmoid(gi[:, D:2 * D] + gh[:, D:2 * D])
        n = jnp.tanh(gi[:, 2 * D:3 * D] + r * gh[:, 2 * D:3 * D])
        h_new = (1.0 - z) * n                            # + z * 0

        # ---- fused [vocab logits | next-step attention query] --------------
        out = jnp.dot(h_new, wout, preferred_element_type=jnp.float32) + bout
        preds_ref[t] = out[:, :Vp]                       # lane-dense (B, Vp) store
        ph_next = out[:, Vp:Vp + A]                      # reused next iteration
        return h_new, ph_next

    h_last, _ = lax.fori_loop(0, T, step, (h0_ref[...], ph0), unroll=True)
    hfin_ref[...] = h_last                               # written once, after the loop


def seq2seq_forward(dec_input, dec_hidden, enc_output, dec_target, p):
    B, S, He = enc_output.shape
    T = dec_target.shape[1]
    D = dec_hidden.shape[1]
    Vv, E = p['embedding'].shape
    A = p['W1'].shape[1]
    Vp = ((Vv + 127) // 128) * 128        # pad logits to a 128-lane multiple

    # Glue: teacher-forced decoder-input embeddings for all T steps (gather),
    # passed as ONE time-major block so the kernel issues no per-step DMAs.
    emb = p['embedding']
    x0 = emb[dec_input[:, 0]]                                  # (B, E)
    xs = emb[dec_target[:, :-1]]                               # (B, T-1, E)
    x_emb_all = jnp.transpose(
        jnp.concatenate([x0[:, None, :], xs], axis=1), (1, 0, 2))  # (T, B, E)

    # Weight prep (layout plumbing, done once outside the kernel):
    # fuse vocab projection + next-step attention query along N, padding the
    # vocab block to Vp lanes (padded columns are zeros and sliced off below).
    wfc_pad = jnp.pad(p['Wfc'], ((0, 0), (0, Vp - Vv)))
    bfc_pad = jnp.pad(p['b_fc'], ((0, 0), (0, Vp - Vv)))
    wout = jnp.concatenate([wfc_pad, p['W2']], axis=1)         # (D, Vp + A)
    bout = jnp.concatenate([bfc_pad, p['b2']], axis=1)         # (1, Vp + A)
    v_row = p['V'].reshape(1, A)                               # attention V as a row

    def const(*shape):
        n = len(shape)
        return pl.BlockSpec(shape, lambda i, _n=n: (0,) * _n)

    grid_spec = pltpu.PrefetchScalarGridSpec(
        num_scalar_prefetch=0,
        grid=(1,),                        # single invocation; decode loop is in-kernel
        in_specs=[
            const(T, B, E),               # all teacher-forced embeddings (one block)
            const(B, D),                  # initial dec_hidden
            const(B, S, He),              # enc_output
            const(He, A), const(1, A),    # attention W1, b1
            const(D, A), const(1, A),     # attention W2, b2
            const(1, A), const(1, 1),     # attention V (row), bv
            const(He, 3 * D),             # GRU W_ih (context slice)
            const(E, 3 * D),              # GRU W_ih (embedding slice)
            const(1, 3 * D), const(1, 3 * D),    # GRU b_ih, b_hh
            const(D, Vp + A), const(1, Vp + A),  # fused [Wfc|W2], [b_fc|b2]
        ],
        out_specs=[
            const(T, B, Vp),              # predictions: time-major, lane-dense, resident
            const(B, D),                  # final dec_hidden
        ],
    )

    preds_tbv, h_final = pl.pallas_call(
        seq2seq_kernel,
        out_shape=(jax.ShapeDtypeStruct((T, B, Vp), jnp.float32),
                   jax.ShapeDtypeStruct((B, D), jnp.float32)),
        grid_spec=grid_spec,
        compiler_params=pltpu.CompilerParams(
            dimension_semantics=("arbitrary",)),
    )(x_emb_all, dec_hidden, enc_output,
      p['W1'], p['b1'], p['W2'], p['b2'], v_row, p['bv'],
      p['Wih_ctx'], p['Wih_emb'], p['b_ih'], p['b_hh'],
      wout, bout)

    return jnp.transpose(preds_tbv[:, :, :Vv], (1, 0, 2)), h_final


def reference_forward(dec_input, dec_hidden, enc_output, dec_target, p):
    """Pure-JAX mirror of the PyTorch forward (for numeric verification)."""
    with jax.default_matmul_precision("highest"):
        emb = p['embedding']
        D = dec_hidden.shape[1]

        def attention(h):
            pe = jnp.einsum('bse,ea->bsa', enc_output, p['W1']) + p['b1']
            ph = h @ p['W2'] + p['b2']
            sc = jnp.tanh(pe + ph[:, None, :])
            score = jnp.einsum('bsa,ak->bsk', sc, p['V']) + p['bv']
            w = jax.nn.softmax(score, axis=1)
            return jnp.sum(w * enc_output, axis=1)

        def decoder(tok, ctx):
            x = emb[tok[:, 0]]
            gi = ctx @ p['Wih_ctx'] + x @ p['Wih_emb'] + p['b_ih']
            gh = p['b_hh']
            r = jax.nn.sigmoid(gi[:, :D] + gh[:, :D])
            z = jax.nn.sigmoid(gi[:, D:2 * D] + gh[:, D:2 * D])
            n = jnp.tanh(gi[:, 2 * D:] + r * gh[:, 2 * D:])
            h = (1.0 - z) * n
            return h @ p['Wfc'] + p['b_fc'], h

        preds, h, tok = [], dec_hidden, dec_input
        ctx = attention(h)
        for t in range(dec_target.shape[1]):
            pred, h = decoder(tok, ctx)
            ctx = attention(h)
            tok = dec_target[:, t][:, None]
            preds.append(pred)
        return jnp.stack(preds, 1), h


if __name__ == "__main__":
    # Small shapes consistent with the module's forward.
    B, S, T = 4, 8, 6
    VOCAB, EMBED = 64, 16
    ENC = DEC = ATTN = 32

    key = jax.random.PRNGKey(0)
    ks = jax.random.split(key, 20)
    sc = 0.1
    params = {
        'embedding': jax.random.normal(ks[0], (VOCAB, EMBED), jnp.float32) * sc,
        'W1': jax.random.normal(ks[1], (ENC, ATTN), jnp.float32) * sc,
        'b1': jax.random.normal(ks[2], (1, ATTN), jnp.float32) * sc,
        'W2': jax.random.normal(ks[3], (DEC, ATTN), jnp.float32) * sc,
        'b2': jax.random.normal(ks[4], (1, ATTN), jnp.float32) * sc,
        'V': jax.random.normal(ks[5], (ATTN, 1), jnp.float32) * sc,
        'bv': jax.random.normal(ks[6], (1, 1), jnp.float32) * sc,
        # GRU input weights split by input sections: [context ; embedding]
        'Wih_ctx': jax.random.normal(ks[7], (ENC, 3 * DEC), jnp.float32) * sc,
        'Wih_emb': jax.random.normal(ks[8], (EMBED, 3 * DEC), jnp.float32) * sc,
        'b_ih': jax.random.normal(ks[9], (1, 3 * DEC), jnp.float32) * sc,
        'b_hh': jax.random.normal(ks[10], (1, 3 * DEC), jnp.float32) * sc,
        'Wfc': jax.random.normal(ks[11], (DEC, VOCAB), jnp.float32) * sc,
        'b_fc': jax.random.normal(ks[12], (1, VOCAB), jnp.float32) * sc,
    }

    dec_input = jax.random.randint(ks[13], (B, 1), 0, VOCAB, jnp.int32)
    dec_target = jax.random.randint(ks[14], (B, T), 0, VOCAB, jnp.int32)
    dec_hidden = jax.random.normal(ks[15], (B, DEC), jnp.float32)
    enc_output = jax.random.normal(ks[16], (B, S, ENC), jnp.float32)

    preds, h_final = seq2seq_forward(dec_input, dec_hidden, enc_output,
                                     dec_target, params)
    jax.block_until_ready((preds, h_final))

    ref_preds, ref_h = reference_forward(dec_input, dec_hidden, enc_output,
                                         dec_target, params)
    assert preds.shape == (B, T, VOCAB) and h_final.shape == (B, DEC)
    np.testing.assert_allclose(np.asarray(preds), np.asarray(ref_preds),
                               rtol=2e-3, atol=2e-3)
    np.testing.assert_allclose(np.asarray(h_final), np.asarray(ref_h),
                               rtol=2e-3, atol=2e-3)
    print("KERNEL_OK")
</pallas_src>

<mosaic_0001>
module attributes {stable_mosaic.version = 11 : i64} {
  func.func @seq2seq_kernel(%arg0: i32, %arg1: memref<6x4x16xf32, #tpu.memory_space<vmem>>, %arg2: memref<4x32xf32, #tpu.memory_space<vmem>>, %arg3: memref<4x8x32xf32, #tpu.memory_space<vmem>>, %arg4: memref<32x32xf32, #tpu.memory_space<vmem>>, %arg5: memref<1x32xf32, #tpu.memory_space<vmem>>, %arg6: memref<32x32xf32, #tpu.memory_space<vmem>>, %arg7: memref<1x32xf32, #tpu.memory_space<vmem>>, %arg8: memref<1x32xf32, #tpu.memory_space<vmem>>, %arg9: memref<1x1xf32, #tpu.memory_space<vmem>>, %arg10: memref<32x96xf32, #tpu.memory_space<vmem>>, %arg11: memref<16x96xf32, #tpu.memory_space<vmem>>, %arg12: memref<1x96xf32, #tpu.memory_space<vmem>>, %arg13: memref<1x96xf32, #tpu.memory_space<vmem>>, %arg14: memref<32x160xf32, #tpu.memory_space<vmem>>, %arg15: memref<1x160xf32, #tpu.memory_space<vmem>>, %arg16: memref<6x4x128xf32, #tpu.memory_space<vmem>>, %arg17: memref<4x32xf32, #tpu.memory_space<vmem>>) attributes {dimension_semantics = [#tpu.dimension_semantics<arbitrary>], iteration_bounds = array<i64: 1>, scalar_prefetch = 0 : i64, scratch_operands = 0 : i64, tpu.core_type = #tpu.core_type<tc>, window_params = [{pipeline_mode = #tpu.pipeline_mode<synchronous>, transform_indices = @transform_0, window_bounds = array<i64: 6, 4, 16>}, {pipeline_mode = #tpu.pipeline_mode<synchronous>, transform_indices = @transform_1, window_bounds = array<i64: 4, 32>}, {pipeline_mode = #tpu.pipeline_mode<synchronous>, transform_indices = @transform_2, window_bounds = array<i64: 4, 8, 32>}, {pipeline_mode = #tpu.pipeline_mode<synchronous>, transform_indices = @transform_3, window_bounds = array<i64: 32, 32>}, {pipeline_mode = #tpu.pipeline_mode<synchronous>, transform_indices = @transform_4, window_bounds = array<i64: 1, 32>}, {pipeline_mode = #tpu.pipeline_mode<synchronous>, transform_indices = @transform_5, window_bounds = array<i64: 32, 32>}, {pipeline_mode = #tpu.pipeline_mode<synchronous>, transform_indices = @transform_6, window_bounds = array<i64: 1, 32>}, {pipeline_mode = #tpu.pipeline_mode<synchronous>, transform_indices = @transform_7, window_bounds = array<i64: 1, 32>}, {pipeline_mode = #tpu.pipeline_mode<synchronous>, transform_indices = @transform_8, window_bounds = array<i64: 1, 1>}, {pipeline_mode = #tpu.pipeline_mode<synchronous>, transform_indices = @transform_9, window_bounds = array<i64: 32, 96>}, {pipeline_mode = #tpu.pipeline_mode<synchronous>, transform_indices = @transform_10, window_bounds = array<i64: 16, 96>}, {pipeline_mode = #tpu.pipeline_mode<synchronous>, transform_indices = @transform_11, window_bounds = array<i64: 1, 96>}, {pipeline_mode = #tpu.pipeline_mode<synchronous>, transform_indices = @transform_12, window_bounds = array<i64: 1, 96>}, {pipeline_mode = #tpu.pipeline_mode<synchronous>, transform_indices = @transform_13, window_bounds = array<i64: 32, 160>}, {pipeline_mode = #tpu.pipeline_mode<synchronous>, transform_indices = @transform_14, window_bounds = array<i64: 1, 160>}, {pipeline_mode = #tpu.pipeline_mode<synchronous>, transform_indices = @transform_15, window_bounds = array<i64: 6, 4, 128>}, {pipeline_mode = #tpu.pipeline_mode<synchronous>, transform_indices = @transform_16, window_bounds = array<i64: 4, 32>}]} {
    %c0 = arith.constant 0 : index
    %c0_0 = arith.constant 0 : index
    %c0_1 = arith.constant 0 : index
    %0 = vector.load %arg3[%c0, %c0_0, %c0_1] : memref<4x8x32xf32, #tpu.memory_space<vmem>>, vector<4x8x32xf32>
    %1 = vector.shape_cast %0 : vector<4x8x32xf32> to vector<32x32xf32>
    %c0_2 = arith.constant 0 : index
    %c0_3 = arith.constant 0 : index
    %2 = vector.load %arg4[%c0_2, %c0_3] : memref<32x32xf32, #tpu.memory_space<vmem>>, vector<32x32xf32>
    %cst = arith.constant dense<0.000000e+00> : vector<32x32xf32>
    %3 = tpu.matmul %1, %2, %cst {dimension_numbers = #tpu.dot_dimension_numbers<[1], [0], [0], [1], [0, 0, 1, 1], [], []>} : vector<32x32xf32>, vector<32x32xf32>, vector<32x32xf32> -> vector<32x32xf32>
    %4 = vector.shape_cast %3 : vector<32x32xf32> to vector<4x8x32xf32>
    %c0_4 = arith.constant 0 : index
    %c0_5 = arith.constant 0 : index
    %5 = vector.load %arg5[%c0_4, %c0_5] : memref<1x32xf32, #tpu.memory_space<vmem>>, vector<1x32xf32>
    %6 = vector.shape_cast %5 : vector<1x32xf32> to vector<1x1x32xf32>
    %7 = vector.broadcast %6 : vector<1x1x32xf32> to vector<4x8x32xf32>
    %8 = arith.addf %4, %7 : vector<4x8x32xf32>
    %c0_6 = arith.constant 0 : index
    %c0_7 = arith.constant 0 : index
    %9 = vector.load %arg8[%c0_6, %c0_7] : memref<1x32xf32, #tpu.memory_space<vmem>>, vector<1x32xf32>
    %c0_8 = arith.constant 0 : index
    %c0_9 = arith.constant 0 : index
    %10 = vector.load %arg9[%c0_8, %c0_9] : memref<1x1xf32, #tpu.memory_space<vmem>>, vector<1x1xf32>
    %c0_10 = arith.constant 0 : index
    %c0_11 = arith.constant 0 : index
    %11 = vector.load %arg13[%c0_10, %c0_11] : memref<1x96xf32, #tpu.memory_space<vmem>>, vector<1x96xf32>
    %c0_12 = arith.constant 0 : index
    %c0_13 = arith.constant 0 : index
    %12 = vector.load %arg10[%c0_12, %c0_13] : memref<32x96xf32, #tpu.memory_space<vmem>>, vector<32x96xf32>
    %c0_14 = arith.constant 0 : index
    %c0_15 = arith.constant 0 : index
    %13 = vector.load %arg11[%c0_14, %c0_15] : memref<16x96xf32, #tpu.memory_space<vmem>>, vector<16x96xf32>
    %c0_16 = arith.constant 0 : index
    %c0_17 = arith.constant 0 : index
    %14 = vector.load %arg12[%c0_16, %c0_17] : memref<1x96xf32, #tpu.memory_space<vmem>>, vector<1x96xf32>
    %c0_18 = arith.constant 0 : index
    %c0_19 = arith.constant 0 : index
    %15 = vector.load %arg14[%c0_18, %c0_19] : memref<32x160xf32, #tpu.memory_space<vmem>>, vector<32x160xf32>
    %c0_20 = arith.constant 0 : index
    %c0_21 = arith.constant 0 : index
    %16 = vector.load %arg15[%c0_20, %c0_21] : memref<1x160xf32, #tpu.memory_space<vmem>>, vector<1x160xf32>
    %c0_22 = arith.constant 0 : index
    %c0_23 = arith.constant 0 : index
    %17 = vector.load %arg2[%c0_22, %c0_23] : memref<4x32xf32, #tpu.memory_space<vmem>>, vector<4x32xf32>
    %c0_24 = arith.constant 0 : index
    %c0_25 = arith.constant 0 : index
    %18 = vector.load %arg6[%c0_24, %c0_25] : memref<32x32xf32, #tpu.memory_space<vmem>>, vector<32x32xf32>
    %cst_26 = arith.constant dense<0.000000e+00> : vector<4x32xf32>
    %19 = tpu.matmul %17, %18, %cst_26 {dimension_numbers = #tpu.dot_dimension_numbers<[1], [0], [0], [1], [0, 0, 1, 1], [], []>} : vector<4x32xf32>, vector<32x32xf32>, vector<4x32xf32> -> vector<4x32xf32>
    %c0_27 = arith.constant 0 : index
    %c0_28 = arith.constant 0 : index
    %20 = vector.load %arg7[%c0_27, %c0_28] : memref<1x32xf32, #tpu.memory_space<vmem>>, vector<1x32xf32>
    %21 = vector.broadcast %20 : vector<1x32xf32> to vector<4x32xf32>
    %22 = arith.addf %19, %21 : vector<4x32xf32>
    %c0_29 = arith.constant 0 : index
    %c0_30 = arith.constant 0 : index
    %23 = vector.load %arg2[%c0_29, %c0_30] : memref<4x32xf32, #tpu.memory_space<vmem>>, vector<4x32xf32>
    %c0_i32 = arith.constant 0 : i32
    %24 = vector.shape_cast %22 : vector<4x32xf32> to vector<4x1x32xf32>
    %25 = vector.broadcast %24 : vector<4x1x32xf32> to vector<4x8x32xf32>
    %26 = arith.addf %8, %25 : vector<4x8x32xf32>
    %27 = math.tanh %26 : vector<4x8x32xf32>
    %28 = vector.shape_cast %9 : vector<1x32xf32> to vector<1x1x32xf32>
    %29 = vector.broadcast %28 : vector<1x1x32xf32> to vector<4x8x32xf32>
    %30 = arith.mulf %27, %29 : vector<4x8x32xf32>
    %cst_31 = arith.constant dense<0.000000e+00> : vector<4x8xf32>
    %31 = vector.multi_reduction <add>, %30, %cst_31 [2] : vector<4x8x32xf32> to vector<4x8xf32>
    %32 = vector.broadcast %10 : vector<1x1xf32> to vector<4x8xf32>
    %33 = arith.addf %31, %32 : vector<4x8xf32>
    %cst_32 = arith.constant dense<0xFF800000> : vector<4xf32>
    %34 = vector.multi_reduction <maximumf>, %33, %cst_32 [1] : vector<4x8xf32> to vector<4xf32>
    %35 = vector.shape_cast %34 : vector<4xf32> to vector<4x1xf32>
    %36 = vector.broadcast %35 : vector<4x1xf32> to vector<4x8xf32>
    %37 = arith.subf %33, %36 : vector<4x8xf32>
    %38 = math.exp %37 : vector<4x8xf32>
    %cst_33 = arith.constant dense<0.000000e+00> : vector<4xf32>
    %39 = vector.multi_reduction <add>, %38, %cst_33 [1] : vector<4x8xf32> to vector<4xf32>
    %40 = vector.shape_cast %39 : vector<4xf32> to vector<4x1xf32>
    %41 = vector.broadcast %40 : vector<4x1xf32> to vector<4x8xf32>
    %42 = arith.divf %38, %41 : vector<4x8xf32>
    %43 = vector.shape_cast %42 : vector<4x8xf32> to vector<4x8x1xf32>
    %44 = vector.broadcast %43 : vector<4x8x1xf32> to vector<4x8x32xf32>
    %45 = arith.mulf %44, %0 : vector<4x8x32xf32>
    %cst_34 = arith.constant dense<0.000000e+00> : vector<4x32xf32>
    %46 = vector.multi_reduction <add>, %45, %cst_34 [1] : vector<4x8x32xf32> to vector<4x32xf32>
    %47 = arith.index_cast %c0_i32 : i32 to index
    %c0_35 = arith.constant 0 : index
    %c0_36 = arith.constant 0 : index
    %48 = vector.load %arg1[%47, %c0_35, %c0_36] : memref<6x4x16xf32, #tpu.memory_space<vmem>>, vector<1x4x16xf32>
    %49 = vector.shape_cast %48 : vector<1x4x16xf32> to vector<4x16xf32>
    %cst_37 = arith.constant dense<0.000000e+00> : vector<4x96xf32>
    %50 = tpu.matmul %46, %12, %cst_37 {dimension_numbers = #tpu.dot_dimension_numbers<[1], [0], [0], [1], [0, 0, 1, 1], [], []>} : vector<4x32xf32>, vector<32x96xf32>, vector<4x96xf32> -> vector<4x96xf32>
    %cst_38 = arith.constant dense<0.000000e+00> : vector<4x96xf32>
    %51 = tpu.matmul %49, %13, %cst_38 {dimension_numbers = #tpu.dot_dimension_numbers<[1], [0], [0], [1], [0, 0, 1, 1], [], []>} : vector<4x16xf32>, vector<16x96xf32>, vector<4x96xf32> -> vector<4x96xf32>
    %52 = arith.addf %50, %51 : vector<4x96xf32>
    %53 = vector.broadcast %14 : vector<1x96xf32> to vector<4x96xf32>
    %54 = arith.addf %52, %53 : vector<4x96xf32>
    %55 = vector.extract_strided_slice %54 {offsets = [0, 0], sizes = [4, 32], strides = [1, 1]} : vector<4x96xf32> to vector<4x32xf32>
    %56 = vector.extract_strided_slice %11 {offsets = [0, 0], sizes = [1, 32], strides = [1, 1]} : vector<1x96xf32> to vector<1x32xf32>
    %57 = vector.broadcast %56 : vector<1x32xf32> to vector<4x32xf32>
    %58 = arith.addf %55, %57 : vector<4x32xf32>
    %59 = arith.negf %58 : vector<4x32xf32>
    %60 = math.exp %59 : vector<4x32xf32>
    %cst_39 = arith.constant 1.000000e+00 : f32
    %61 = vector.broadcast %cst_39 : f32 to vector<4x32xf32>
    %62 = arith.addf %61, %60 : vector<4x32xf32>
    %63 = arith.divf %61, %62 : vector<4x32xf32>
    %64 = vector.extract_strided_slice %54 {offsets = [0, 32], sizes = [4, 32], strides = [1, 1]} : vector<4x96xf32> to vector<4x32xf32>
    %65 = vector.extract_strided_slice %11 {offsets = [0, 32], sizes = [1, 32], strides = [1, 1]} : vector<1x96xf32> to vector<1x32xf32>
    %66 = vector.broadcast %65 : vector<1x32xf32> to vector<4x32xf32>
    %67 = arith.addf %64, %66 : vector<4x32xf32>
    %68 = arith.negf %67 : vector<4x32xf32>
    %69 = math.exp %68 : vector<4x32xf32>
    %cst_40 = arith.constant 1.000000e+00 : f32
    %70 = vector.broadcast %cst_40 : f32 to vector<4x32xf32>
    %71 = arith.addf %70, %69 : vector<4x32xf32>
    %72 = arith.divf %70, %71 : vector<4x32xf32>
    %73 = vector.extract_strided_slice %54 {offsets = [0, 64], sizes = [4, 32], strides = [1, 1]} : vector<4x96xf32> to vector<4x32xf32>
    %74 = vector.extract_strided_slice %11 {offsets = [0, 64], sizes = [1, 32], strides = [1, 1]} : vector<1x96xf32> to vector<1x32xf32>
    %75 = vector.broadcast %74 : vector<1x32xf32> to vector<4x32xf32>
    %76 = arith.mulf %63, %75 : vector<4x32xf32>
    %77 = arith.addf %73, %76 : vector<4x32xf32>
    %78 = math.tanh %77 : vector<4x32xf32>
    %cst_41 = arith.constant 1.000000e+00 : f32
    %79 = vector.broadcast %cst_41 : f32 to vector<4x32xf32>
    %80 = arith.subf %79, %72 : vector<4x32xf32>
    %81 = arith.mulf %80, %78 : vector<4x32xf32>
    %cst_42 = arith.constant dense<0.000000e+00> : vector<4x160xf32>
    %82 = tpu.matmul %81, %15, %cst_42 {dimension_numbers = #tpu.dot_dimension_numbers<[1], [0], [0], [1], [0, 0, 1, 1], [], []>} : vector<4x32xf32>, vector<32x160xf32>, vector<4x160xf32> -> vector<4x160xf32>
    %83 = vector.broadcast %16 : vector<1x160xf32> to vector<4x160xf32>
    %84 = arith.addf %82, %83 : vector<4x160xf32>
    %85 = vector.extract_strided_slice %84 {offsets = [0, 0], sizes = [4, 128], strides = [1, 1]} : vector<4x160xf32> to vector<4x128xf32>
    %86 = arith.index_cast %c0_i32 : i32 to index
    %c0_43 = arith.constant 0 : index
    %c0_44 = arith.constant 0 : index
    %87 = vector.load %arg16[%86, %c0_43, %c0_44] : memref<6x4x128xf32, #tpu.memory_space<vmem>>, vector<1x4x128xf32>
    %88 = vector.shape_cast %87 : vector<1x4x128xf32> to vector<4x128xf32>
    %89 = vector.shape_cast %85 : vector<4x128xf32> to vector<1x4x128xf32>
    tpu.vector_store %arg16[%86, %c0_43, %c0_44], %89 {strides = array<i32>} : memref<6x4x128xf32, #tpu.memory_space<vmem>>, vector<1x4x128xf32>,
    %90 = vector.extract_strided_slice %84 {offsets = [0, 128], sizes = [4, 32], strides = [1, 1]} : vector<4x160xf32> to vector<4x32xf32>
    %c1_i32 = arith.constant 1 : i32
    %91 = vector.shape_cast %90 : vector<4x32xf32> to vector<4x1x32xf32>
    %92 = vector.broadcast %91 : vector<4x1x32xf32> to vector<4x8x32xf32>
    %93 = arith.addf %8, %92 : vector<4x8x32xf32>
    %94 = math.tanh %93 : vector<4x8x32xf32>
    %95 = vector.shape_cast %9 : vector<1x32xf32> to vector<1x1x32xf32>
    %96 = vector.broadcast %95 : vector<1x1x32xf32> to vector<4x8x32xf32>
    %97 = arith.mulf %94, %96 : vector<4x8x32xf32>
    %cst_45 = arith.constant dense<0.000000e+00> : vector<4x8xf32>
    %98 = vector.multi_reduction <add>, %97, %cst_45 [2] : vector<4x8x32xf32> to vector<4x8xf32>
    %99 = vector.broadcast %10 : vector<1x1xf32> to vector<4x8xf32>
    %100 = arith.addf %98, %99 : vector<4x8xf32>
    %cst_46 = arith.constant dense<0xFF800000> : vector<4xf32>
    %101 = vector.multi_reduction <maximumf>, %100, %cst_46 [1] : vector<4x8xf32> to vector<4xf32>
    %102 = vector.shape_cast %101 : vector<4xf32> to vector<4x1xf32>
    %103 = vector.broadcast %102 : vector<4x1xf32> to vector<4x8xf32>
    %104 = arith.subf %100, %103 : vector<4x8xf32>
    %105 = math.exp %104 : vector<4x8xf32>
    %cst_47 = arith.constant dense<0.000000e+00> : vector<4xf32>
    %106 = vector.multi_reduction <add>, %105, %cst_47 [1] : vector<4x8xf32> to vector<4xf32>
    %107 = vector.shape_cast %106 : vector<4xf32> to vector<4x1xf32>
    %108 = vector.broadcast %107 : vector<4x1xf32> to vector<4x8xf32>
    %109 = arith.divf %105, %108 : vector<4x8xf32>
    %110 = vector.shape_cast %109 : vector<4x8xf32> to vector<4x8x1xf32>
    %111 = vector.broadcast %110 : vector<4x8x1xf32> to vector<4x8x32xf32>
    %112 = arith.mulf %111, %0 : vector<4x8x32xf32>
    %cst_48 = arith.constant dense<0.000000e+00> : vector<4x32xf32>
    %113 = vector.multi_reduction <add>, %112, %cst_48 [1] : vector<4x8x32xf32> to vector<4x32xf32>
    %114 = arith.index_cast %c1_i32 : i32 to index
    %c0_49 = arith.constant 0 : index
    %c0_50 = arith.constant 0 : index
    %115 = vector.load %arg1[%114, %c0_49, %c0_50] : memref<6x4x16xf32, #tpu.memory_space<vmem>>, vector<1x4x16xf32>
    %116 = vector.shape_cast %115 : vector<1x4x16xf32> to vector<4x16xf32>
    %cst_51 = arith.constant dense<0.000000e+00> : vector<4x96xf32>
    %117 = tpu.matmul %113, %12, %cst_51 {dimension_numbers = #tpu.dot_dimension_numbers<[1], [0], [0], [1], [0, 0, 1, 1], [], []>} : vector<4x32xf32>, vector<32x96xf32>, vector<4x96xf32> -> vector<4x96xf32>
    %cst_52 = arith.constant dense<0.000000e+00> : vector<4x96xf32>
    %118 = tpu.matmul %116, %13, %cst_52 {dimension_numbers = #tpu.dot_dimension_numbers<[1], [0], [0], [1], [0, 0, 1, 1], [], []>} : vector<4x16xf32>, vector<16x96xf32>, vector<4x96xf32> -> vector<4x96xf32>
    %119 = arith.addf %117, %118 : vector<4x96xf32>
    %120 = vector.broadcast %14 : vector<1x96xf32> to vector<4x96xf32>
    %121 = arith.addf %119, %120 : vector<4x96xf32>
    %122 = vector.extract_strided_slice %121 {offsets = [0, 0], sizes = [4, 32], strides = [1, 1]} : vector<4x96xf32> to vector<4x32xf32>
    %123 = vector.extract_strided_slice %11 {offsets = [0, 0], sizes = [1, 32], strides = [1, 1]} : vector<1x96xf32> to vector<1x32xf32>
    %124 = vector.broadcast %123 : vector<1x32xf32> to vector<4x32xf32>
    %125 = arith.addf %122, %124 : vector<4x32xf32>
    %126 = arith.negf %125 : vector<4x32xf32>
    %127 = math.exp %126 : vector<4x32xf32>
    %cst_53 = arith.constant 1.000000e+00 : f32
    %128 = vector.broadcast %cst_53 : f32 to vector<4x32xf32>
    %129 = arith.addf %128, %127 : vector<4x32xf32>
    %130 = arith.divf %128, %129 : vector<4x32xf32>
    %131 = vector.extract_strided_slice %121 {offsets = [0, 32], sizes = [4, 32], strides = [1, 1]} : vector<4x96xf32> to vector<4x32xf32>
    %132 = vector.extract_strided_slice %11 {offsets = [0, 32], sizes = [1, 32], strides = [1, 1]} : vector<1x96xf32> to vector<1x32xf32>
    %133 = vector.broadcast %132 : vector<1x32xf32> to vector<4x32xf32>
    %134 = arith.addf %131, %133 : vector<4x32xf32>
    %135 = arith.negf %134 : vector<4x32xf32>
    %136 = math.exp %135 : vector<4x32xf32>
    %cst_54 = arith.constant 1.000000e+00 : f32
    %137 = vector.broadcast %cst_54 : f32 to vector<4x32xf32>
    %138 = arith.addf %137, %136 : vector<4x32xf32>
    %139 = arith.divf %137, %138 : vector<4x32xf32>
    %140 = vector.extract_strided_slice %121 {offsets = [0, 64], sizes = [4, 32], strides = [1, 1]} : vector<4x96xf32> to vector<4x32xf32>
    %141 = vector.extract_strided_slice %11 {offsets = [0, 64], sizes = [1, 32], strides = [1, 1]} : vector<1x96xf32> to vector<1x32xf32>
    %142 = vector.broadcast %141 : vector<1x32xf32> to vector<4x32xf32>
    %143 = arith.mulf %130, %142 : vector<4x32xf32>
    %144 = arith.addf %140, %143 : vector<4x32xf32>
    %145 = math.tanh %144 : vector<4x32xf32>
    %cst_55 = arith.constant 1.000000e+00 : f32
    %146 = vector.broadcast %cst_55 : f32 to vector<4x32xf32>
    %147 = arith.subf %146, %139 : vector<4x32xf32>
    %148 = arith.mulf %147, %145 : vector<4x32xf32>
    %cst_56 = arith.constant dense<0.000000e+00> : vector<4x160xf32>
    %149 = tpu.matmul %148, %15, %cst_56 {dimension_numbers = #tpu.dot_dimension_numbers<[1], [0], [0], [1], [0, 0, 1, 1], [], []>} : vector<4x32xf32>, vector<32x160xf32>, vector<4x160xf32> -> vector<4x160xf32>
    %150 = vector.broadcast %16 : vector<1x160xf32> to vector<4x160xf32>
    %151 = arith.addf %149, %150 : vector<4x160xf32>
    %152 = vector.extract_strided_slice %151 {offsets = [0, 0], sizes = [4, 128], strides = [1, 1]} : vector<4x160xf32> to vector<4x128xf32>
    %153 = arith.index_cast %c1_i32 : i32 to index
    %c0_57 = arith.constant 0 : index
    %c0_58 = arith.constant 0 : index
    %154 = vector.load %arg16[%153, %c0_57, %c0_58] : memref<6x4x128xf32, #tpu.memory_space<vmem>>, vector<1x4x128xf32>
    %155 = vector.shape_cast %154 : vector<1x4x128xf32> to vector<4x128xf32>
    %156 = vector.shape_cast %152 : vector<4x128xf32> to vector<1x4x128xf32>
    tpu.vector_store %arg16[%153, %c0_57, %c0_58], %156 {strides = array<i32>} : memref<6x4x128xf32, #tpu.memory_space<vmem>>, vector<1x4x128xf32>,
    %157 = vector.extract_strided_slice %151 {offsets = [0, 128], sizes = [4, 32], strides = [1, 1]} : vector<4x160xf32> to vector<4x32xf32>
    %c2_i32 = arith.constant 2 : i32
    %158 = vector.shape_cast %157 : vector<4x32xf32> to vector<4x1x32xf32>
    %159 = vector.broadcast %158 : vector<4x1x32xf32> to vector<4x8x32xf32>
    %160 = arith.addf %8, %159 : vector<4x8x32xf32>
    %161 = math.tanh %160 : vector<4x8x32xf32>
    %162 = vector.shape_cast %9 : vector<1x32xf32> to vector<1x1x32xf32>
    %163 = vector.broadcast %162 : vector<1x1x32xf32> to vector<4x8x32xf32>
    %164 = arith.mulf %161, %163 : vector<4x8x32xf32>
    %cst_59 = arith.constant dense<0.000000e+00> : vector<4x8xf32>
    %165 = vector.multi_reduction <add>, %164, %cst_59 [2] : vector<4x8x32xf32> to vector<4x8xf32>
    %166 = vector.broadcast %10 : vector<1x1xf32> to vector<4x8xf32>
    %167 = arith.addf %165, %166 : vector<4x8xf32>
    %cst_60 = arith.constant dense<0xFF800000> : vector<4xf32>
    %168 = vector.multi_reduction <maximumf>, %167, %cst_60 [1] : vector<4x8xf32> to vector<4xf32>
    %169 = vector.shape_cast %168 : vector<4xf32> to vector<4x1xf32>
    %170 = vector.broadcast %169 : vector<4x1xf32> to vector<4x8xf32>
    %171 = arith.subf %167, %170 : vector<4x8xf32>
    %172 = math.exp %171 : vector<4x8xf32>
    %cst_61 = arith.constant dense<0.000000e+00> : vector<4xf32>
    %173 = vector.multi_reduction <add>, %172, %cst_61 [1] : vector<4x8xf32> to vector<4xf32>
    %174 = vector.shape_cast %173 : vector<4xf32> to vector<4x1xf32>
    %175 = vector.broadcast %174 : vector<4x1xf32> to vector<4x8xf32>
    %176 = arith.divf %172, %175 : vector<4x8xf32>
    %177 = vector.shape_cast %176 : vector<4x8xf32> to vector<4x8x1xf32>
    %178 = vector.broadcast %177 : vector<4x8x1xf32> to vector<4x8x32xf32>
    %179 = arith.mulf %178, %0 : vector<4x8x32xf32>
    %cst_62 = arith.constant dense<0.000000e+00> : vector<4x32xf32>
    %180 = vector.multi_reduction <add>, %179, %cst_62 [1] : vector<4x8x32xf32> to vector<4x32xf32>
    %181 = arith.index_cast %c2_i32 : i32 to index
    %c0_63 = arith.constant 0 : index
    %c0_64 = arith.constant 0 : index
    %182 = vector.load %arg1[%181, %c0_63, %c0_64] : memref<6x4x16xf32, #tpu.memory_space<vmem>>, vector<1x4x16xf32>
    %183 = vector.shape_cast %182 : vector<1x4x16xf32> to vector<4x16xf32>
    %cst_65 = arith.constant dense<0.000000e+00> : vector<4x96xf32>
    %184 = tpu.matmul %180, %12, %cst_65 {dimension_numbers = #tpu.dot_dimension_numbers<[1], [0], [0], [1], [0, 0, 1, 1], [], []>} : vector<4x32xf32>, vector<32x96xf32>, vector<4x96xf32> -> vector<4x96xf32>
    %cst_66 = arith.constant dense<0.000000e+00> : vector<4x96xf32>
    %185 = tpu.matmul %183, %13, %cst_66 {dimension_numbers = #tpu.dot_dimension_numbers<[1], [0], [0], [1], [0, 0, 1, 1], [], []>} : vector<4x16xf32>, vector<16x96xf32>, vector<4x96xf32> -> vector<4x96xf32>
    %186 = arith.addf %184, %185 : vector<4x96xf32>
    %187 = vector.broadcast %14 : vector<1x96xf32> to vector<4x96xf32>
    %188 = arith.addf %186, %187 : vector<4x96xf32>
    %189 = vector.extract_strided_slice %188 {offsets = [0, 0], sizes = [4, 32], strides = [1, 1]} : vector<4x96xf32> to vector<4x32xf32>
    %190 = vector.extract_strided_slice %11 {offsets = [0, 0], sizes = [1, 32], strides = [1, 1]} : vector<1x96xf32> to vector<1x32xf32>
    %191 = vector.broadcast %190 : vector<1x32xf32> to vector<4x32xf32>
    %192 = arith.addf %189, %191 : vector<4x32xf32>
    %193 = arith.negf %192 : vector<4x32xf32>
    %194 = math.exp %193 : vector<4x32xf32>
    %cst_67 = arith.constant 1.000000e+00 : f32
    %195 = vector.broadcast %cst_67 : f32 to vector<4x32xf32>
    %196 = arith.addf %195, %194 : vector<4x32xf32>
    %197 = arith.divf %195, %196 : vector<4x32xf32>
    %198 = vector.extract_strided_slice %188 {offsets = [0, 32], sizes = [4, 32], strides = [1, 1]} : vector<4x96xf32> to vector<4x32xf32>
    %199 = vector.extract_strided_slice %11 {offsets = [0, 32], sizes = [1, 32], strides = [1, 1]} : vector<1x96xf32> to vector<1x32xf32>
    %200 = vector.broadcast %199 : vector<1x32xf32> to vector<4x32xf32>
    %201 = arith.addf %198, %200 : vector<4x32xf32>
    %202 = arith.negf %201 : vector<4x32xf32>
    %203 = math.exp %202 : vector<4x32xf32>
    %cst_68 = arith.constant 1.000000e+00 : f32
    %204 = vector.broadcast %cst_68 : f32 to vector<4x32xf32>
    %205 = arith.addf %204, %203 : vector<4x32xf32>
    %206 = arith.divf %204, %205 : vector<4x32xf32>
    %207 = vector.extract_strided_slice %188 {offsets = [0, 64], sizes = [4, 32], strides = [1, 1]} : vector<4x96xf32> to vector<4x32xf32>
    %208 = vector.extract_strided_slice %11 {offsets = [0, 64], sizes = [1, 32], strides = [1, 1]} : vector<1x96xf32> to vector<1x32xf32>
    %209 = vector.broadcast %208 : vector<1x32xf32> to vector<4x32xf32>
    %210 = arith.mulf %197, %209 : vector<4x32xf32>
    %211 = arith.addf %207, %210 : vector<4x32xf32>
    %212 = math.tanh %211 : vector<4x32xf32>
    %cst_69 = arith.constant 1.000000e+00 : f32
    %213 = vector.broadcast %cst_69 : f32 to vector<4x32xf32>
    %214 = arith.subf %213, %206 : vector<4x32xf32>
    %215 = arith.mulf %214, %212 : vector<4x32xf32>
    %cst_70 = arith.constant dense<0.000000e+00> : vector<4x160xf32>
    %216 = tpu.matmul %215, %15, %cst_70 {dimension_numbers = #tpu.dot_dimension_numbers<[1], [0], [0], [1], [0, 0, 1, 1], [], []>} : vector<4x32xf32>, vector<32x160xf32>, vector<4x160xf32> -> vector<4x160xf32>
    %217 = vector.broadcast %16 : vector<1x160xf32> to vector<4x160xf32>
    %218 = arith.addf %216, %217 : vector<4x160xf32>
    %219 = vector.extract_strided_slice %218 {offsets = [0, 0], sizes = [4, 128], strides = [1, 1]} : vector<4x160xf32> to vector<4x128xf32>
    %220 = arith.index_cast %c2_i32 : i32 to index
    %c0_71 = arith.constant 0 : index
    %c0_72 = arith.constant 0 : index
    %221 = vector.load %arg16[%220, %c0_71, %c0_72] : memref<6x4x128xf32, #tpu.memory_space<vmem>>, vector<1x4x128xf32>
    %222 = vector.shape_cast %221 : vector<1x4x128xf32> to vector<4x128xf32>
    %223 = vector.shape_cast %219 : vector<4x128xf32> to vector<1x4x128xf32>
    tpu.vector_store %arg16[%220, %c0_71, %c0_72], %223 {strides = array<i32>} : memref<6x4x128xf32, #tpu.memory_space<vmem>>, vector<1x4x128xf32>,
    %224 = vector.extract_strided_slice %218 {offsets = [0, 128], sizes = [4, 32], strides = [1, 1]} : vector<4x160xf32> to vector<4x32xf32>
    %c3_i32 = arith.constant 3 : i32
    %225 = vector.shape_cast %224 : vector<4x32xf32> to vector<4x1x32xf32>
    %226 = vector.broadcast %225 : vector<4x1x32xf32> to vector<4x8x32xf32>
    %227 = arith.addf %8, %226 : vector<4x8x32xf32>
    %228 = math.tanh %227 : vector<4x8x32xf32>
    %229 = vector.shape_cast %9 : vector<1x32xf32> to vector<1x1x32xf32>
    %230 = vector.broadcast %229 : vector<1x1x32xf32> to vector<4x8x32xf32>
    %231 = arith.mulf %228, %230 : vector<4x8x32xf32>
    %cst_73 = arith.constant dense<0.000000e+00> : vector<4x8xf32>
    %232 = vector.multi_reduction <add>, %231, %cst_73 [2] : vector<4x8x32xf32> to vector<4x8xf32>
    %233 = vector.broadcast %10 : vector<1x1xf32> to vector<4x8xf32>
    %234 = arith.addf %232, %233 : vector<4x8xf32>
    %cst_74 = arith.constant dense<0xFF800000> : vector<4xf32>
    %235 = vector.multi_reduction <maximumf>, %234, %cst_74 [1] : vector<4x8xf32> to vector<4xf32>
    %236 = vector.shape_cast %235 : vector<4xf32> to vector<4x1xf32>
    %237 = vector.broadcast %236 : vector<4x1xf32> to vector<4x8xf32>
    %238 = arith.subf %234, %237 : vector<4x8xf32>
    %239 = math.exp %238 : vector<4x8xf32>
    %cst_75 = arith.constant dense<0.000000e+00> : vector<4xf32>
    %240 = vector.multi_reduction <add>, %239, %cst_75 [1] : vector<4x8xf32> to vector<4xf32>
    %241 = vector.shape_cast %240 : vector<4xf32> to vector<4x1xf32>
    %242 = vector.broadcast %241 : vector<4x1xf32> to vector<4x8xf32>
    %243 = arith.divf %239, %242 : vector<4x8xf32>
    %244 = vector.shape_cast %243 : vector<4x8xf32> to vector<4x8x1xf32>
    %245 = vector.broadcast %244 : vector<4x8x1xf32> to vector<4x8x32xf32>
    %246 = arith.mulf %245, %0 : vector<4x8x32xf32>
    %cst_76 = arith.constant dense<0.000000e+00> : vector<4x32xf32>
    %247 = vector.multi_reduction <add>, %246, %cst_76 [1] : vector<4x8x32xf32> to vector<4x32xf32>
    %248 = arith.index_cast %c3_i32 : i32 to index
    %c0_77 = arith.constant 0 : index
    %c0_78 = arith.constant 0 : index
    %249 = vector.load %arg1[%248, %c0_77, %c0_78] : memref<6x4x16xf32, #tpu.memory_space<vmem>>, vector<1x4x16xf32>
    %250 = vector.shape_cast %249 : vector<1x4x16xf32> to vector<4x16xf32>
    %cst_79 = arith.constant dense<0.000000e+00> : vector<4x96xf32>
    %251 = tpu.matmul %247, %12, %cst_79 {dimension_numbers = #tpu.dot_dimension_numbers<[1], [0], [0], [1], [0, 0, 1, 1], [], []>} : vector<4x32xf32>, vector<32x96xf32>, vector<4x96xf32> -> vector<4x96xf32>
    %cst_80 = arith.constant dense<0.000000e+00> : vector<4x96xf32>
    %252 = tpu.matmul %250, %13, %cst_80 {dimension_numbers = #tpu.dot_dimension_numbers<[1], [0], [0], [1], [0, 0, 1, 1], [], []>} : vector<4x16xf32>, vector<16x96xf32>, vector<4x96xf32> -> vector<4x96xf32>
    %253 = arith.addf %251, %252 : vector<4x96xf32>
    %254 = vector.broadcast %14 : vector<1x96xf32> to vector<4x96xf32>
    %255 = arith.addf %253, %254 : vector<4x96xf32>
    %256 = vector.extract_strided_slice %255 {offsets = [0, 0], sizes = [4, 32], strides = [1, 1]} : vector<4x96xf32> to vector<4x32xf32>
    %257 = vector.extract_strided_slice %11 {offsets = [0, 0], sizes = [1, 32], strides = [1, 1]} : vector<1x96xf32> to vector<1x32xf32>
    %258 = vector.broadcast %257 : vector<1x32xf32> to vector<4x32xf32>
    %259 = arith.addf %256, %258 : vector<4x32xf32>
    %260 = arith.negf %259 : vector<4x32xf32>
    %261 = math.exp %260 : vector<4x32xf32>
    %cst_81 = arith.constant 1.000000e+00 : f32
    %262 = vector.broadcast %cst_81 : f32 to vector<4x32xf32>
    %263 = arith.addf %262, %261 : vector<4x32xf32>
    %264 = arith.divf %262, %263 : vector<4x32xf32>
    %265 = vector.extract_strided_slice %255 {offsets = [0, 32], sizes = [4, 32], strides = [1, 1]} : vector<4x96xf32> to vector<4x32xf32>
    %266 = vector.extract_strided_slice %11 {offsets = [0, 32], sizes = [1, 32], strides = [1, 1]} : vector<1x96xf32> to vector<1x32xf32>
    %267 = vector.broadcast %266 : vector<1x32xf32> to vector<4x32xf32>
    %268 = arith.addf %265, %267 : vector<4x32xf32>
    %269 = arith.negf %268 : vector<4x32xf32>
    %270 = math.exp %269 : vector<4x32xf32>
    %cst_82 = arith.constant 1.000000e+00 : f32
    %271 = vector.broadcast %cst_82 : f32 to vector<4x32xf32>
    %272 = arith.addf %271, %270 : vector<4x32xf32>
    %273 = arith.divf %271, %272 : vector<4x32xf32>
    %274 = vector.extract_strided_slice %255 {offsets = [0, 64], sizes = [4, 32], strides = [1, 1]} : vector<4x96xf32> to vector<4x32xf32>
    %275 = vector.extract_strided_slice %11 {offsets = [0, 64], sizes = [1, 32], strides = [1, 1]} : vector<1x96xf32> to vector<1x32xf32>
    %276 = vector.broadcast %275 : vector<1x32xf32> to vector<4x32xf32>
    %277 = arith.mulf %264, %276 : vector<4x32xf32>
    %278 = arith.addf %274, %277 : vector<4x32xf32>
    %279 = math.tanh %278 : vector<4x32xf32>
    %cst_83 = arith.constant 1.000000e+00 : f32
    %280 = vector.broadcast %cst_83 : f32 to vector<4x32xf32>
    %281 = arith.subf %280, %273 : vector<4x32xf32>
    %282 = arith.mulf %281, %279 : vector<4x32xf32>
    %cst_84 = arith.constant dense<0.000000e+00> : vector<4x160xf32>
    %283 = tpu.matmul %282, %15, %cst_84 {dimension_numbers = #tpu.dot_dimension_numbers<[1], [0], [0], [1], [0, 0, 1, 1], [], []>} : vector<4x32xf32>, vector<32x160xf32>, vector<4x160xf32> -> vector<4x160xf32>
    %284 = vector.broadcast %16 : vector<1x160xf32> to vector<4x160xf32>
    %285 = arith.addf %283, %284 : vector<4x160xf32>
    %286 = vector.extract_strided_slice %285 {offsets = [0, 0], sizes = [4, 128], strides = [1, 1]} : vector<4x160xf32> to vector<4x128xf32>
    %287 = arith.index_cast %c3_i32 : i32 to index
    %c0_85 = arith.constant 0 : index
    %c0_86 = arith.constant 0 : index
    %288 = vector.load %arg16[%287, %c0_85, %c0_86] : memref<6x4x128xf32, #tpu.memory_space<vmem>>, vector<1x4x128xf32>
    %289 = vector.shape_cast %288 : vector<1x4x128xf32> to vector<4x128xf32>
    %290 = vector.shape_cast %286 : vector<4x128xf32> to vector<1x4x128xf32>
    tpu.vector_store %arg16[%287, %c0_85, %c0_86], %290 {strides = array<i32>} : memref<6x4x128xf32, #tpu.memory_space<vmem>>, vector<1x4x128xf32>,
    %291 = vector.extract_strided_slice %285 {offsets = [0, 128], sizes = [4, 32], strides = [1, 1]} : vector<4x160xf32> to vector<4x32xf32>
    %c4_i32 = arith.constant 4 : i32
    %292 = vector.shape_cast %291 : vector<4x32xf32> to vector<4x1x32xf32>
    %293 = vector.broadcast %292 : vector<4x1x32xf32> to vector<4x8x32xf32>
    %294 = arith.addf %8, %293 : vector<4x8x32xf32>
    %295 = math.tanh %294 : vector<4x8x32xf32>
    %296 = vector.shape_cast %9 : vector<1x32xf32> to vector<1x1x32xf32>
    %297 = vector.broadcast %296 : vector<1x1x32xf32> to vector<4x8x32xf32>
    %298 = arith.mulf %295, %297 : vector<4x8x32xf32>
    %cst_87 = arith.constant dense<0.000000e+00> : vector<4x8xf32>
    %299 = vector.multi_reduction <add>, %298, %cst_87 [2] : vector<4x8x32xf32> to vector<4x8xf32>
    %300 = vector.broadcast %10 : vector<1x1xf32> to vector<4x8xf32>
    %301 = arith.addf %299, %300 : vector<4x8xf32>
    %cst_88 = arith.constant dense<0xFF800000> : vector<4xf32>
    %302 = vector.multi_reduction <maximumf>, %301, %cst_88 [1] : vector<4x8xf32> to vector<4xf32>
    %303 = vector.shape_cast %302 : vector<4xf32> to vector<4x1xf32>
    %304 = vector.broadcast %303 : vector<4x1xf32> to vector<4x8xf32>
    %305 = arith.subf %301, %304 : vector<4x8xf32>
    %306 = math.exp %305 : vector<4x8xf32>
    %cst_89 = arith.constant dense<0.000000e+00> : vector<4xf32>
    %307 = vector.multi_reduction <add>, %306, %cst_89 [1] : vector<4x8xf32> to vector<4xf32>
    %308 = vector.shape_cast %307 : vector<4xf32> to vector<4x1xf32>
    %309 = vector.broadcast %308 : vector<4x1xf32> to vector<4x8xf32>
    %310 = arith.divf %306, %309 : vector<4x8xf32>
    %311 = vector.shape_cast %310 : vector<4x8xf32> to vector<4x8x1xf32>
    %312 = vector.broadcast %311 : vector<4x8x1xf32> to vector<4x8x32xf32>
    %313 = arith.mulf %312, %0 : vector<4x8x32xf32>
    %cst_90 = arith.constant dense<0.000000e+00> : vector<4x32xf32>
    %314 = vector.multi_reduction <add>, %313, %cst_90 [1] : vector<4x8x32xf32> to vector<4x32xf32>
    %315 = arith.index_cast %c4_i32 : i32 to index
    %c0_91 = arith.constant 0 : index
    %c0_92 = arith.constant 0 : index
    %316 = vector.load %arg1[%315, %c0_91, %c0_92] : memref<6x4x16xf32, #tpu.memory_space<vmem>>, vector<1x4x16xf32>
    %317 = vector.shape_cast %316 : vector<1x4x16xf32> to vector<4x16xf32>
    %cst_93 = arith.constant dense<0.000000e+00> : vector<4x96xf32>
    %318 = tpu.matmul %314, %12, %cst_93 {dimension_numbers = #tpu.dot_dimension_numbers<[1], [0], [0], [1], [0, 0, 1, 1], [], []>} : vector<4x32xf32>, vector<32x96xf32>, vector<4x96xf32> -> vector<4x96xf32>
    %cst_94 = arith.constant dense<0.000000e+00> : vector<4x96xf32>
    %319 = tpu.matmul %317, %13, %cst_94 {dimension_numbers = #tpu.dot_dimension_numbers<[1], [0], [0], [1], [0, 0, 1, 1], [], []>} : vector<4x16xf32>, vector<16x96xf32>, vector<4x96xf32> -> vector<4x96xf32>
    %320 = arith.addf %318, %319 : vector<4x96xf32>
    %321 = vector.broadcast %14 : vector<1x96xf32> to vector<4x96xf32>
    %322 = arith.addf %320, %321 : vector<4x96xf32>
    %323 = vector.extract_strided_slice %322 {offsets = [0, 0], sizes = [4, 32], strides = [1, 1]} : vector<4x96xf32> to vector<4x32xf32>
    %324 = vector.extract_strided_slice %11 {offsets = [0, 0], sizes = [1, 32], strides = [1, 1]} : vector<1x96xf32> to vector<1x32xf32>
    %325 = vector.broadcast %324 : vector<1x32xf32> to vector<4x32xf32>
    %326 = arith.addf %323, %325 : vector<4x32xf32>
    %327 = arith.negf %326 : vector<4x32xf32>
    %328 = math.exp %327 : vector<4x32xf32>
    %cst_95 = arith.constant 1.000000e+00 : f32
    %329 = vector.broadcast %cst_95 : f32 to vector<4x32xf32>
    %330 = arith.addf %329, %328 : vector<4x32xf32>
    %331 = arith.divf %329, %330 : vector<4x32xf32>
    %332 = vector.extract_strided_slice %322 {offsets = [0, 32], sizes = [4, 32], strides = [1, 1]} : vector<4x96xf32> to vector<4x32xf32>
    %333 = vector.extract_strided_slice %11 {offsets = [0, 32], sizes = [1, 32], strides = [1, 1]} : vector<1x96xf32> to vector<1x32xf32>
    %334 = vector.broadcast %333 : vector<1x32xf32> to vector<4x32xf32>
    %335 = arith.addf %332, %334 : vector<4x32xf32>
    %336 = arith.negf %335 : vector<4x32xf32>
    %337 = math.exp %336 : vector<4x32xf32>
    %cst_96 = arith.constant 1.000000e+00 : f32
    %338 = vector.broadcast %cst_96 : f32 to vector<4x32xf32>
    %339 = arith.addf %338, %337 : vector<4x32xf32>
    %340 = arith.divf %338, %339 : vector<4x32xf32>
    %341 = vector.extract_strided_slice %322 {offsets = [0, 64], sizes = [4, 32], strides = [1, 1]} : vector<4x96xf32> to vector<4x32xf32>
    %342 = vector.extract_strided_slice %11 {offsets = [0, 64], sizes = [1, 32], strides = [1, 1]} : vector<1x96xf32> to vector<1x32xf32>
    %343 = vector.broadcast %342 : vector<1x32xf32> to vector<4x32xf32>
    %344 = arith.mulf %331, %343 : vector<4x32xf32>
    %345 = arith.addf %341, %344 : vector<4x32xf32>
    %346 = math.tanh %345 : vector<4x32xf32>
    %cst_97 = arith.constant 1.000000e+00 : f32
    %347 = vector.broadcast %cst_97 : f32 to vector<4x32xf32>
    %348 = arith.subf %347, %340 : vector<4x32xf32>
    %349 = arith.mulf %348, %346 : vector<4x32xf32>
    %cst_98 = arith.constant dense<0.000000e+00> : vector<4x160xf32>
    %350 = tpu.matmul %349, %15, %cst_98 {dimension_numbers = #tpu.dot_dimension_numbers<[1], [0], [0], [1], [0, 0, 1, 1], [], []>} : vector<4x32xf32>, vector<32x160xf32>, vector<4x160xf32> -> vector<4x160xf32>
    %351 = vector.broadcast %16 : vector<1x160xf32> to vector<4x160xf32>
    %352 = arith.addf %350, %351 : vector<4x160xf32>
    %353 = vector.extract_strided_slice %352 {offsets = [0, 0], sizes = [4, 128], strides = [1, 1]} : vector<4x160xf32> to vector<4x128xf32>
    %354 = arith.index_cast %c4_i32 : i32 to index
    %c0_99 = arith.constant 0 : index
    %c0_100 = arith.constant 0 : index
    %355 = vector.load %arg16[%354, %c0_99, %c0_100] : memref<6x4x128xf32, #tpu.memory_space<vmem>>, vector<1x4x128xf32>
    %356 = vector.shape_cast %355 : vector<1x4x128xf32> to vector<4x128xf32>
    %357 = vector.shape_cast %353 : vector<4x128xf32> to vector<1x4x128xf32>
    tpu.vector_store %arg16[%354, %c0_99, %c0_100], %357 {strides = array<i32>} : memref<6x4x128xf32, #tpu.memory_space<vmem>>, vector<1x4x128xf32>,
    %358 = vector.extract_strided_slice %352 {offsets = [0, 128], sizes = [4, 32], strides = [1, 1]} : vector<4x160xf32> to vector<4x32xf32>
    %c5_i32 = arith.constant 5 : i32
    %359 = vector.shape_cast %358 : vector<4x32xf32> to vector<4x1x32xf32>
    %360 = vector.broadcast %359 : vector<4x1x32xf32> to vector<4x8x32xf32>
    %361 = arith.addf %8, %360 : vector<4x8x32xf32>
    %362 = math.tanh %361 : vector<4x8x32xf32>
    %363 = vector.shape_cast %9 : vector<1x32xf32> to vector<1x1x32xf32>
    %364 = vector.broadcast %363 : vector<1x1x32xf32> to vector<4x8x32xf32>
    %365 = arith.mulf %362, %364 : vector<4x8x32xf32>
    %cst_101 = arith.constant dense<0.000000e+00> : vector<4x8xf32>
    %366 = vector.multi_reduction <add>, %365, %cst_101 [2] : vector<4x8x32xf32> to vector<4x8xf32>
    %367 = vector.broadcast %10 : vector<1x1xf32> to vector<4x8xf32>
    %368 = arith.addf %366, %367 : vector<4x8xf32>
    %cst_102 = arith.constant dense<0xFF800000> : vector<4xf32>
    %369 = vector.multi_reduction <maximumf>, %368, %cst_102 [1] : vector<4x8xf32> to vector<4xf32>
    %370 = vector.shape_cast %369 : vector<4xf32> to vector<4x1xf32>
    %371 = vector.broadcast %370 : vector<4x1xf32> to vector<4x8xf32>
    %372 = arith.subf %368, %371 : vector<4x8xf32>
    %373 = math.exp %372 : vector<4x8xf32>
    %cst_103 = arith.constant dense<0.000000e+00> : vector<4xf32>
    %374 = vector.multi_reduction <add>, %373, %cst_103 [1] : vector<4x8xf32> to vector<4xf32>
    %375 = vector.shape_cast %374 : vector<4xf32> to vector<4x1xf32>
    %376 = vector.broadcast %375 : vector<4x1xf32> to vector<4x8xf32>
    %377 = arith.divf %373, %376 : vector<4x8xf32>
    %378 = vector.shape_cast %377 : vector<4x8xf32> to vector<4x8x1xf32>
    %379 = vector.broadcast %378 : vector<4x8x1xf32> to vector<4x8x32xf32>
    %380 = arith.mulf %379, %0 : vector<4x8x32xf32>
    %cst_104 = arith.constant dense<0.000000e+00> : vector<4x32xf32>
    %381 = vector.multi_reduction <add>, %380, %cst_104 [1] : vector<4x8x32xf32> to vector<4x32xf32>
    %382 = arith.index_cast %c5_i32 : i32 to index
    %c0_105 = arith.constant 0 : index
    %c0_106 = arith.constant 0 : index
    %383 = vector.load %arg1[%382, %c0_105, %c0_106] : memref<6x4x16xf32, #tpu.memory_space<vmem>>, vector<1x4x16xf32>
    %384 = vector.shape_cast %383 : vector<1x4x16xf32> to vector<4x16xf32>
    %cst_107 = arith.constant dense<0.000000e+00> : vector<4x96xf32>
    %385 = tpu.matmul %381, %12, %cst_107 {dimension_numbers = #tpu.dot_dimension_numbers<[1], [0], [0], [1], [0, 0, 1, 1], [], []>} : vector<4x32xf32>, vector<32x96xf32>, vector<4x96xf32> -> vector<4x96xf32>
    %cst_108 = arith.constant dense<0.000000e+00> : vector<4x96xf32>
    %386 = tpu.matmul %384, %13, %cst_108 {dimension_numbers = #tpu.dot_dimension_numbers<[1], [0], [0], [1], [0, 0, 1, 1], [], []>} : vector<4x16xf32>, vector<16x96xf32>, vector<4x96xf32> -> vector<4x96xf32>
    %387 = arith.addf %385, %386 : vector<4x96xf32>
    %388 = vector.broadcast %14 : vector<1x96xf32> to vector<4x96xf32>
    %389 = arith.addf %387, %388 : vector<4x96xf32>
    %390 = vector.extract_strided_slice %389 {offsets = [0, 0], sizes = [4, 32], strides = [1, 1]} : vector<4x96xf32> to vector<4x32xf32>
    %391 = vector.extract_strided_slice %11 {offsets = [0, 0], sizes = [1, 32], strides = [1, 1]} : vector<1x96xf32> to vector<1x32xf32>
    %392 = vector.broadcast %391 : vector<1x32xf32> to vector<4x32xf32>
    %393 = arith.addf %390, %392 : vector<4x32xf32>
    %394 = arith.negf %393 : vector<4x32xf32>
    %395 = math.exp %394 : vector<4x32xf32>
    %cst_109 = arith.constant 1.000000e+00 : f32
    %396 = vector.broadcast %cst_109 : f32 to vector<4x32xf32>
    %397 = arith.addf %396, %395 : vector<4x32xf32>
    %398 = arith.divf %396, %397 : vector<4x32xf32>
    %399 = vector.extract_strided_slice %389 {offsets = [0, 32], sizes = [4, 32], strides = [1, 1]} : vector<4x96xf32> to vector<4x32xf32>
    %400 = vector.extract_strided_slice %11 {offsets = [0, 32], sizes = [1, 32], strides = [1, 1]} : vector<1x96xf32> to vector<1x32xf32>
    %401 = vector.broadcast %400 : vector<1x32xf32> to vector<4x32xf32>
    %402 = arith.addf %399, %401 : vector<4x32xf32>
    %403 = arith.negf %402 : vector<4x32xf32>
    %404 = math.exp %403 : vector<4x32xf32>
    %cst_110 = arith.constant 1.000000e+00 : f32
    %405 = vector.broadcast %cst_110 : f32 to vector<4x32xf32>
    %406 = arith.addf %405, %404 : vector<4x32xf32>
    %407 = arith.divf %405, %406 : vector<4x32xf32>
    %408 = vector.extract_strided_slice %389 {offsets = [0, 64], sizes = [4, 32], strides = [1, 1]} : vector<4x96xf32> to vector<4x32xf32>
    %409 = vector.extract_strided_slice %11 {offsets = [0, 64], sizes = [1, 32], strides = [1, 1]} : vector<1x96xf32> to vector<1x32xf32>
    %410 = vector.broadcast %409 : vector<1x32xf32> to vector<4x32xf32>
    %411 = arith.mulf %398, %410 : vector<4x32xf32>
    %412 = arith.addf %408, %411 : vector<4x32xf32>
    %413 = math.tanh %412 : vector<4x32xf32>
    %cst_111 = arith.constant 1.000000e+00 : f32
    %414 = vector.broadcast %cst_111 : f32 to vector<4x32xf32>
    %415 = arith.subf %414, %407 : vector<4x32xf32>
    %416 = arith.mulf %415, %413 : vector<4x32xf32>
    %cst_112 = arith.constant dense<0.000000e+00> : vector<4x160xf32>
    %417 = tpu.matmul %416, %15, %cst_112 {dimension_numbers = #tpu.dot_dimension_numbers<[1], [0], [0], [1], [0, 0, 1, 1], [], []>} : vector<4x32xf32>, vector<32x160xf32>, vector<4x160xf32> -> vector<4x160xf32>
    %418 = vector.broadcast %16 : vector<1x160xf32> to vector<4x160xf32>
    %419 = arith.addf %417, %418 : vector<4x160xf32>
    %420 = vector.extract_strided_slice %419 {offsets = [0, 0], sizes = [4, 128], strides = [1, 1]} : vector<4x160xf32> to vector<4x128xf32>
    %421 = arith.index_cast %c5_i32 : i32 to index
    %c0_113 = arith.constant 0 : index
    %c0_114 = arith.constant 0 : index
    %422 = vector.load %arg16[%421, %c0_113, %c0_114] : memref<6x4x128xf32, #tpu.memory_space<vmem>>, vector<1x4x128xf32>
    %423 = vector.shape_cast %422 : vector<1x4x128xf32> to vector<4x128xf32>
    %424 = vector.shape_cast %420 : vector<4x128xf32> to vector<1x4x128xf32>
    tpu.vector_store %arg16[%421, %c0_113, %c0_114], %424 {strides = array<i32>} : memref<6x4x128xf32, #tpu.memory_space<vmem>>, vector<1x4x128xf32>,
    %425 = vector.extract_strided_slice %419 {offsets = [0, 128], sizes = [4, 32], strides = [1, 1]} : vector<4x160xf32> to vector<4x32xf32>
    %c6_i32 = arith.constant 6 : i32
    %c0_115 = arith.constant 0 : index
    %c0_116 = arith.constant 0 : index
    %426 = vector.load %arg17[%c0_115, %c0_116] : memref<4x32xf32, #tpu.memory_space<vmem>>, vector<4x32xf32>
    tpu.vector_store %arg17[%c0_115, %c0_116], %416 {strides = array<i32>} : memref<4x32xf32, #tpu.memory_space<vmem>>, vector<4x32xf32>,
    return
  }
  func.func @transform_0(%arg0: i32) -> (i32, i32, i32) {
    %c0_i32 = arith.constant 0 : i32
    %c0_i32_0 = arith.constant 0 : i32
    %c0_i32_1 = arith.constant 0 : i32
    %c0_i32_2 = arith.constant 0 : i32
    return %c0_i32, %c0_i32_0, %c0_i32_1 : i32, i32, i32
  }
  func.func @transform_1(%arg0: i32) -> (i32, i32) {
    %c0_i32 = arith.constant 0 : i32
    %c0_i32_0 = arith.constant 0 : i32
    %c0_i32_1 = arith.constant 0 : i32
    return %c0_i32, %c0_i32_0 : i32, i32
  }
  func.func @transform_2(%arg0: i32) -> (i32, i32, i32) {
    %c0_i32 = arith.constant 0 : i32
    %c0_i32_0 = arith.constant 0 : i32
    %c0_i32_1 = arith.constant 0 : i32
    %c0_i32_2 = arith.constant 0 : i32
    return %c0_i32, %c0_i32_0, %c0_i32_1 : i32, i32, i32
  }
  func.func @transform_3(%arg0: i32) -> (i32, i32) {
    %c0_i32 = arith.constant 0 : i32
    %c0_i32_0 = arith.constant 0 : i32
    %c0_i32_1 = arith.constant 0 : i32
    return %c0_i32, %c0_i32_0 : i32, i32
  }
  func.func @transform_4(%arg0: i32) -> (i32, i32) {
    %c0_i32 = arith.constant 0 : i32
    %c0_i32_0 = arith.constant 0 : i32
    %c0_i32_1 = arith.constant 0 : i32
    return %c0_i32, %c0_i32_0 : i32, i32
  }
  func.func @transform_5(%arg0: i32) -> (i32, i32) {
    %c0_i32 = arith.constant 0 : i32
    %c0_i32_0 = arith.constant 0 : i32
    %c0_i32_1 = arith.constant 0 : i32
    return %c0_i32, %c0_i32_0 : i32, i32
  }
  func.func @transform_6(%arg0: i32) -> (i32, i32) {
    %c0_i32 = arith.constant 0 : i32
    %c0_i32_0 = arith.constant 0 : i32
    %c0_i32_1 = arith.constant 0 : i32
    return %c0_i32, %c0_i32_0 : i32, i32
  }
  func.func @transform_7(%arg0: i32) -> (i32, i32) {
    %c0_i32 = arith.constant 0 : i32
    %c0_i32_0 = arith.constant 0 : i32
    %c0_i32_1 = arith.constant 0 : i32
    return %c0_i32, %c0_i32_0 : i32, i32
  }
  func.func @transform_8(%arg0: i32) -> (i32, i32) {
    %c0_i32 = arith.constant 0 : i32
    %c0_i32_0 = arith.constant 0 : i32
    %c0_i32_1 = arith.constant 0 : i32
    return %c0_i32, %c0_i32_0 : i32, i32
  }
  func.func @transform_9(%arg0: i32) -> (i32, i32) {
    %c0_i32 = arith.constant 0 : i32
    %c0_i32_0 = arith.constant 0 : i32
    %c0_i32_1 = arith.constant 0 : i32
    return %c0_i32, %c0_i32_0 : i32, i32
  }
  func.func @transform_10(%arg0: i32) -> (i32, i32) {
    %c0_i32 = arith.constant 0 : i32
    %c0_i32_0 = arith.constant 0 : i32
    %c0_i32_1 = arith.constant 0 : i32
    return %c0_i32, %c0_i32_0 : i32, i32
  }
  func.func @transform_11(%arg0: i32) -> (i32, i32) {
    %c0_i32 = arith.constant 0 : i32
    %c0_i32_0 = arith.constant 0 : i32
    %c0_i32_1 = arith.constant 0 : i32
    return %c0_i32, %c0_i32_0 : i32, i32
  }
  func.func @transform_12(%arg0: i32) -> (i32, i32) {
    %c0_i32 = arith.constant 0 : i32
    %c0_i32_0 = arith.constant 0 : i32
    %c0_i32_1 = arith.constant 0 : i32
    return %c0_i32, %c0_i32_0 : i32, i32
  }
  func.func @transform_13(%arg0: i32) -> (i32, i32) {
    %c0_i32 = arith.constant 0 : i32
    %c0_i32_0 = arith.constant 0 : i32
    %c0_i32_1 = arith.constant 0 : i32
    return %c0_i32, %c0_i32_0 : i32, i32
  }
  func.func @transform_14(%arg0: i32) -> (i32, i32) {
    %c0_i32 = arith.constant 0 : i32
    %c0_i32_0 = arith.constant 0 : i32
    %c0_i32_1 = arith.constant 0 : i32
    return %c0_i32, %c0_i32_0 : i32, i32
  }
  func.func @transform_15(%arg0: i32) -> (i32, i32, i32) {
    %c0_i32 = arith.constant 0 : i32
    %c0_i32_0 = arith.constant 0 : i32
    %c0_i32_1 = arith.constant 0 : i32
    %c0_i32_2 = arith.constant 0 : i32
    return %c0_i32, %c0_i32_0, %c0_i32_1 : i32, i32, i32
  }
  func.func @transform_16(%arg0: i32) -> (i32, i32) {
    %c0_i32 = arith.constant 0 : i32
    %c0_i32_0 = arith.constant 0 : i32
    %c0_i32_1 = arith.constant 0 : i32
    return %c0_i32, %c0_i32_0 : i32, i32
  }
}

</mosaic_0001>

<bundles_post_ra>
// kernel: tpu_custom_call.1
= control target key start
LH: loop header
LB: loop body
LE: loop exit
PB: predicated region body
PF: predicated region fallthrough
CT: control target
= control target key end

     0   :  { %s3854_s0 = inlined_call_operand.hbm [shape: f32[6,4,16], index: 0, kind: input, shape index: {}]   ;;  %s3855_s1 = inlined_call_operand.hbm [shape: f32[4,32], index: 1, kind: input, shape index: {}]   ;;  %s3856_s2 = inlined_call_operand.hbm [shape: f32[4,8,32], index: 2, kind: input, shape index: {}]   ;;  %s3857_s3 = inlined_call_operand.hbm [shape: f32[32,32], index: 3, kind: input, shape index: {}]   ;;  %s3858_s4 = inlined_call_operand.vmem [shape: f32[1,32], index: 4, kind: input, shape index: {}]   ;;  %s3859_s5 = inlined_call_operand.hbm [shape: f32[32,32], index: 5, kind: input, shape index: {}]   ;;  %s3860_s6 = inlined_call_operand.vmem [shape: f32[1,32], index: 6, kind: input, shape index: {}]   ;;  %s3861_s7 = inlined_call_operand.vmem [shape: f32[1,32], index: 7, kind: input, shape index: {}]   ;;  %s3862_s8 = inlined_call_operand.<no memory space> [shape: f32[1,1], index: 8, kind: input, shape index: {}]   ;;  %s3863_s9 = inlined_call_operand.hbm [shape: f32[32,96], index: 9, kind: input, shape index: {}]   ;;  %s3864_s10 = inlined_call_operand.hbm [shape: f32[16,96], index: 10, kind: input, shape index: {}]   ;;  %s3865_s11 = inlined_call_operand.vmem [shape: f32[1,96], index: 11, kind: input, shape index: {}]   ;;  %s3866_s12 = inlined_call_operand.vmem [shape: f32[1,96], index: 12, kind: input, shape index: {}]   ;;  %s3867_s13 = inlined_call_operand.hbm [shape: f32[32,160], index: 13, kind: input, shape index: {}]   ;;  %s3868_s14 = inlined_call_operand.vmem [shape: f32[1,160], index: 14, kind: input, shape index: {}]   ;;  %s3869_s15 = inlined_call_operand.hbm [shape: f32[6,4,128], index: 15, kind: output, shape index: {0}]   ;;  %s3870_s16 = inlined_call_operand.hbm [shape: f32[4,32], index: 16, kind: output, shape index: {1}]  }
   0x1   :  { %3872 = sst [smem:[#allocation27_spill]] %s3854_s0  ;;  %v22_v0 = vstv %s3862_s8 }
   0x2   :  { %23 = vst [vmem:[#allocation2] sm:$0x1] %v22_v0 }
   0x3   :  { %24 = vsyncpa [#allocation4], 0 }
   0x4   :  { %25 = vsyncpa [#allocation7], 0 }
   0x5   :  { %26 = vsyncpa [#allocation10], 0 }
   0x6   :  { %27 = vsyncpa [#allocation13], 0 }
   0x7   :  { %28 = vsyncpa [#allocation16], 0 }
   0x8   :  { %29 = vsyncpa [#allocation5], 0  ;;  %s49_s25 = sshll.u32 %s3855_s1, 4  ;;  %s50_s25 = int_to_ptr.hbm [resolvable:$true] %s49_s25 }
   0x9   :  { %30 = vsyncpa [#allocation19], 0  ;;  %s3015_s26 = smov [#allocation6]   ;;  %s72_s8 = sshll.u32 %s3857_s3, 4  ;;  %s73_s8 = int_to_ptr.hbm [resolvable:$true] %s72_s8 }
   0xa   :  { %s51_s27 = sshll.u32 %s3015_s26, 4  ;;  %s3016_s30 = smov [#allocation9]   ;;  %s52_s27 = int_to_ptr.vmem [resolvable:$true] %s51_s27 }
   0xb   :  { %54 = dma.hbm_to_vmem [thread:$0]  %s50_s25, 64, %s52_s27, [#allocation7]  }
   0xc   :  { %s74_s0 = sshll.u32 %s3016_s30, 4  ;;  %s106_s19 = sshll.u32 %s3863_s9, 4  ;;  %s75_s0 = int_to_ptr.vmem [resolvable:$true] %s74_s0  ;;  %s107_s19 = int_to_ptr.hbm [resolvable:$true] %s106_s19 }
   0xd   :  { %s3017_s1 = smov 128   ;;  %s3018_s20 = smov 8  }
   0xe   :  { %80 = dma.hbm_to_vmem [thread:$0]  %s73_s8, 512, %s75_s0, [#allocation10], %s3017_s1, %s3017_s1, %s3018_s20  }
   0xf   :  { %s3873_s23 = sld [smem:[#allocation27_spill]]  ;;  %s3019_s3 = smov [#allocation12]  }
  0x10   :  { %s108_s25 = sshll.u32 %s3019_s3, 4  ;;  %s3020_s9 = smov [#allocation3]   ;;  %s109_s25 = int_to_ptr.vmem [resolvable:$true] %s108_s25 }
  0x11   :  { %114 = dma.hbm_to_vmem [thread:$0]  %s107_s19, 512, %s109_s25, [#allocation13], %s3017_s1, %s3017_s1, %s3018_s20  }
  0x12   :  { %s37_s26 = sshll.u32 %s3020_s9, 4  ;;  %s3021_s27 = smov 64   ;;  %s38_s26 = int_to_ptr.vmem [resolvable:$true] %s37_s26 }
  0x13   :  { %s3022_s28 = smov 4   ;;  %s59_s30 = sshll.u32 %s3856_s2, 4  ;;  %s60_s30 = int_to_ptr.hbm [resolvable:$true] %s59_s30 }
  0x14   :  { %s3023_s0 = smov [#allocation8]   ;;  %s87_s19 = sshll.u32 %s3859_s5, 4  ;;  %s88_s19 = int_to_ptr.hbm [resolvable:$true] %s87_s19 }
  0x15   :  { %s35_s24 = sshll.u32 %s3873_s23, 4  ;;  %s61_s17 = sshll.u32 %s3023_s0, 4  ;;  %s36_s24 = int_to_ptr.hbm [resolvable:$true] %s35_s24  ;;  %s62_s17 = int_to_ptr.vmem [resolvable:$true] %s61_s17 }
  0x16   :  { %43 = dma.hbm_to_vmem [thread:$0]  %s36_s24, 384, %s38_s26, [#allocation4], %s3021_s27, %s3021_s27, %s3022_s28  }
  0x17   :  { %67 = dma.hbm_to_vmem [thread:$0]  %s60_s30, 512, %s62_s17, [#allocation7], %s3017_s1, %s3017_s1, %s3018_s20  }
  0x18   :  { %s3024_s22 = smov [#allocation11]   ;;  %s119_s25 = sshll.u32 %s3864_s10, 4  ;;  %s120_s25 = int_to_ptr.hbm [resolvable:$true] %s119_s25 }
  0x19   :  { %s89_s23 = sshll.u32 %s3024_s22, 4  ;;  %s136_s5 = sshll.u32 %s3867_s13, 4  ;;  %s90_s23 = int_to_ptr.vmem [resolvable:$true] %s89_s23  ;;  %s137_s5 = int_to_ptr.hbm [resolvable:$true] %s136_s5 }
  0x1a   :  { %95 = dma.hbm_to_vmem [thread:$0]  %s88_s19, 512, %s90_s23, [#allocation10], %s3017_s1, %s3017_s1, %s3018_s20  }
  0x1b   :  { %s3025_s26 = smov [#allocation14]   ;;  %s3026_s8 = smov [#allocation15]  }
  0x1c   :  { %s121_s29 = sshll.u32 %s3025_s26, 4  ;;  %s138_s10 = sshll.u32 %s3026_s8, 4  ;;  %s122_s29 = int_to_ptr.vmem [resolvable:$true] %s121_s29  ;;  %s139_s10 = int_to_ptr.vmem [resolvable:$true] %s138_s10 }
  0x1d   :  { %127 = dma.hbm_to_vmem [thread:$0]  %s120_s25, 256, %s122_s29, [#allocation13], %s3017_s1, %s3017_s1, %s3018_s20  }
  0x1e   :  { %s3027_s30 = smov 256   ;;  %s3028_s0 = smov 16  }
  0x1f   :  { %144 = dma.hbm_to_vmem [thread:$0]  %s137_s5, 1024, %s139_s10, [#allocation16], %s3027_s30, %s3027_s30, %s3028_s0  }
  0x20   :  { %3001 = dma.done.wait [#allocation4], 384  }
  0x21   :  { %3002 = vsyncadd [#allocation4], 4294966912 }
  0x22   :  { %3003 = dma.done.wait [#allocation7], 576  }
  0x23   :  { %3004 = vsyncadd [#allocation7], 4294966720 }
  0x24   :  { %3005 = dma.done.wait [#allocation10], 1024  }
  0x25   :  { %3006 = vsyncadd [#allocation10], 4294966272 }
  0x26   :  { %3007 = dma.done.wait [#allocation13], 768  }
  0x27   :  { %3008 = vsyncadd [#allocation13], 4294966528 }
  0x28   :  { %3009 = dma.done.wait [#allocation16], 1024  }
  0x29   :  { %3010 = vsyncadd [#allocation16], 4294966272  ;;  %v186_v1 = vld [vmem:[#allocation9 + $0x18] sm:$0xff]  ;;  %v185_v3 = vld [vmem:[#allocation9 + $0x10] sm:$0xff]  ;;  %vm187_vm0 = vcmask 261120   ;;  %v3029_v25 = vmov 0   ;;  %v341_v54 = vlaneseq }
  0x2a   :  { %v260_v2 = vld [vmem:[#allocation11 + $0x18] sm:$0xff]  ;;  %212 = vmatpush.msra.mxu0 %v186_v1  ;;  %v259_v4 = vld [vmem:[#allocation11 + $0x10] sm:$0xff]  ;;  %v184_v5 = vld [vmem:[#allocation9 + $0x8] sm:$0xff]  ;;  %2544 = vset.pattern.permute.xlu1 %v3029_v25  ;;  %vm347_vm1 = vcmask 1041409   ;;  %vm349_vm2 = vcmask 1042434   ;;  %vm351_vm3 = vcmask 1043459  }
  0x2b   :  { %280 = vmatpush.msra.mxu1 %v260_v2  ;;  %v258_v6 = vld [vmem:[#allocation11 + $0x8] sm:$0xff]  ;;  %v183_v7 = vld [vmem:[#allocation9] sm:$0xff]  ;;  %v256_v10 = vld [vmem:[#allocation6] sm:$0xf]  ;;  %2546 = vset.pattern.permute.xlu2 %v3029_v25  ;;  %v3211_v56 = vand.u32 127, %v341_v54  ;;  %vm3871_vm4 = vcmask 60416  }
  0x2c   :  { %213 = vmatpush.msra.mxu0 %v185_v3  ;;  %v257_v8 = vld [vmem:[#allocation11] sm:$0xff]  ;;  %v3168_v11 = vld [vmem:[#allocation8 + $0x8] sm:$0xff]  ;;  %v3172_v12 = vld [vmem:[#allocation8 + $0x10] sm:$0xff]  ;;  %2545 = vset.pattern.permute.xlu0 %v3029_v25  ;;  %s3030_s23 = smov 96   ;;  %s2473_s20 = sshll.u32 %s3870_s16, 4  ;;  %s2474_s20 = int_to_ptr.hbm [resolvable:$true] %s2473_s20 }
  0x2d   :  { %281 = vmatpush.msra.mxu1 %v259_v4  ;;  %v3163_v9 = vld [vmem:[#allocation8] sm:$0xff]  ;;  %v3176_v13 = vld [vmem:[#allocation8 + $0x18] sm:$0xff]  ;;  %s3032_s17 = smov [#allocation17]   ;;  %s2459_s21 = sshll.u32 %s3869_s15, 4  ;;  %s2460_s21 = int_to_ptr.hbm [resolvable:$true] %s2459_s21 }
  0x2e   :  { %214 = vmatpush.msra.mxu0 %v184_v5  ;;  %v2548_v14 = vld [vmem:[%s3860_s6] ss:$0 sm:$0xff]  ;;  %s2457_s6 = sshll.u32 %s3032_s17, 4  ;;  %s2458_s6 = int_to_ptr.vmem [resolvable:$true] %s2457_s6 }
  0x2f   :  { %282 = vmatpush.msra.mxu1 %v258_v6  ;;  %v2547_v15 = vld [vmem:[%s3858_s4] ss:$0 sm:$0xff] }
  0x30   :  { %215 = vmatpush.msra.mxu0 %v183_v7  ;;  %v3194_v27 = vld [vmem:[%s3861_s7] ss:$0 sm:$0xff] }
  0x31   :  { %283 = vmatpush.msra.mxu1 %v257_v8  ;;  %2492 = vmatmul.msk.f32.vlgmr.msra.gmra.mxu0 %vm187_vm0, %v3163_v9  ;;  %v2550_v51 = vld [vmem:[#allocation2] ss:$0 sm:$0xff] }
  0x32   :  { %2496 = vmatmul.msk.f32.vlgmr.msra.gmra.mxu1 %vm187_vm0, %v256_v10 }
  0x39   :  { %2493 = vmatmul.msk.f32.gmra.mxu0 %vm187_vm0, %v3168_v11 }
  0x41   :  { %2494 = vmatmul.msk.f32.gmra.mxu0 %vm187_vm0, %v3172_v12 }
  0x49   :  { %2495 = vmatmul.msk.f32.gmra.mxu0 %vm187_vm0, %v3176_v13 }
  0xae   :  { %v217_v16 = vpop.f32.mrf.mxu0 }
  0xaf   :  { %v285_v17 = vpop.f32.mrf.mxu1  ;;  %v3186_v19 = vadd.f32 %v2547_v15, %v217_v16 }
  0xb0   :  { %v286_v18 = vadd.f32 %v2548_v14, %v285_v17 }
  0xb2   :  { %v289_v20 = vrot.slane %v286_v18, 1  ;;  %v292_v21 = vperm.slane %v286_v18, 0  ;;  %v290_v28 = vrot.slane %v286_v18, 2  ;;  %v291_v39 = vrot.slane %v286_v18, 3 }
  0xb4   :  { %v300_v22 = vadd.f32 %v292_v21, %v3186_v19  ;;  %v293_v23 = vperm.slane %v289_v20, 0  ;;  %v294_v32 = vperm.slane %v290_v28, 0  ;;  %v295_v42 = vperm.slane %v291_v39, 0 }
  0xb6   :  { %2553 = vtanh.f32 %v300_v22  ;;  %v220_v24 = vpop.f32.mrf.mxu0 }
  0xb7   :  { %v3189_v26 = vadd.f32 %v2547_v15, %v220_v24 }
  0xb9   :  { %v301_v29 = vadd.f32 %v293_v23, %v3189_v26 }
  0xbb   :  { %2555 = vtanh.f32 %v301_v29 }
  0xbc   :  { %v2554_v30 = vpop.eup %2553 }
  0xbd   :  { %v311_v31 = vmul.f32 %v2554_v30, %v3194_v27 }
  0xbe   :  { %v223_v33 = vpop.f32.mrf.mxu0 }
  0xbf   :  { %v315_v34 = vsel %vm187_vm0, %v311_v31, 0.0  ;;  %v3199_v35 = vadd.f32 %v2547_v15, %v223_v33 }
  0xc0   :  { %316 = vadd.xlane.f32.xlu0 %v315_v34 }
  0xc1   :  { %v2556_v36 = vpop.eup %2555  ;;  %v302_v37 = vadd.f32 %v294_v32, %v3199_v35 }
  0xc2   :  { %v312_v38 = vmul.f32 %v2556_v36, %v3194_v27 }
  0xc3   :  { %2557 = vtanh.f32 %v302_v37 }
  0xc4   :  { %v318_v41 = vsel %vm187_vm0, %v312_v38, 0.0 }
  0xc6   :  { %v226_v40 = vpop.f32.mrf.mxu0 }
  0xc7   :  { %v3204_v43 = vadd.f32 %v2547_v15, %v226_v40 }
  0xc8   :  { %319 = vadd.xlane.f32.xlu0 %v318_v41 }
  0xc9   :  { %v2558_v44 = vpop.eup %2557  ;;  %v303_v45 = vadd.f32 %v295_v42, %v3204_v43 }
  0xca   :  { %v313_v46 = vmul.f32 %v2558_v44, %v3194_v27 }
  0xcb   :  { %2559 = vtanh.f32 %v303_v45 }
  0xcc   :  { %v321_v47 = vsel %vm187_vm0, %v313_v46, 0.0 }
  0xcd   :  { %322 = vadd.xlane.f32.xlu1 %v321_v47 }
  0xd1   :  { %v2560_v48 = vpop.eup %2559 }
  0xd2   :  { %v314_v49 = vmul.f32 %v2560_v48, %v3194_v27 }
  0xd4   :  { %v324_v50 = vsel %vm187_vm0, %v314_v49, 0.0 }
  0xd5   :  { %325 = vadd.xlane.f32.xlu2 %v324_v50 }
  0xe6   :  { %330 = vperm.xlu1 %2544, %v2550_v51  }
 0x133   :  { %v317_v52 = vpop.xlane.xlu0 %316 }
 0x13b   :  { %v320_v55 = vpop.xlane.xlu0 %319 }
 0x140   :  { %v323_v53 = vpop.xlane.xlu1 %322 }
 0x148   :  { %v326_v57 = vpop.xlane.xlu2 %325 }
 0x158   :  { %v3213_v58 = vpop.permute.xlu1 %330 }
 0x159   :  { %v333_v59 = vadd.f32 %v3213_v58, %v317_v52  ;;  %v334_v60 = vadd.f32 %v3213_v58, %v320_v55  ;;  %v335_v61 = vadd.f32 %v3213_v58, %v323_v53  ;;  %v336_v62 = vadd.f32 %v3213_v58, %v326_v57 }
 0x15b   :  { %v343_v63 = vperm.slane %v333_v59, %v3211_v56  ;;  %v344_v0 = vperm.slane %v334_v60, %v3211_v56  ;;  %v345_v1 = vperm.slane %v335_v61, %v3211_v56  ;;  %v346_v2 = vperm.slane %v336_v62, %v3211_v56 }
 0x15d   :  { %v348_v3 = vsel %vm347_vm1, %v344_v0, %v343_v63 }
 0x15e   :  { %v350_v4 = vsel %vm349_vm2, %v345_v1, %v348_v3 }
 0x15f   :  { %v352_v5 = vsel %vm351_vm3, %v346_v2, %v350_v4 }
 0x160   :  { %v355_v6 = vsel %vm3871_vm4, %v352_v5, -inf }
 0x161   :  { %356 = vmax.xlane.f32.xlu2 %v355_v6 }
 0x1d4   :  { %v357_v7 = vpop.xlane.xlu2 %356 }
 0x1d5   :  { %v359_v8 = vperm.slane %v357_v7, 0  ;;  %v360_v10 = vperm.slane %v357_v7, 1  ;;  %v361_v14 = vperm.slane %v357_v7, 2  ;;  %v362_v18 = vperm.slane %v357_v7, 3 }
 0x1d7   :  { %v367_v15 = vsub.f32 %v333_v59, %v359_v8  ;;  %v368_v16 = vsub.f32 %v334_v60, %v360_v10  ;;  %v369_v17 = vsub.f32 %v335_v61, %v361_v14  ;;  %v370_v23 = vsub.f32 %v336_v62, %v362_v18 }
 0x1d9   :  { %v371_v20 = vmul.f32 1.442695, %v367_v15  ;;  %v373_v21 = vmul.f32 1.442695, %v368_v16  ;;  %v375_v22 = vmul.f32 1.442695, %v369_v17 }
 0x1da   :  { %v377_v24 = vmul.f32 1.442695, %v370_v23 }
 0x1db   :  { %2561 = vpow2.f32 %v371_v20 }
 0x1dc   :  { %2563 = vpow2.f32 %v373_v21 }
 0x1dd   :  { %2565 = vpow2.f32 %v375_v22 }
 0x1de   :  { %2567 = vpow2.f32 %v377_v24 }
 0x1e1   :  { %v3227_v25 = vpop.eup %2561 }
 0x1e2   :  { %v3229_v28 = vpop.eup %2563  ;;  %384 = vperm.xlu0 %2545, %v3227_v25  }
 0x1e3   :  { %v3232_v29 = vpop.eup %2565  ;;  %387 = vperm.xlu2 %2546, %v3229_v28  }
 0x1e4   :  { %390 = vperm.xlu1 %2544, %v3232_v29   ;;  %v3236_v30 = vpop.eup %2567 }
 0x1eb   :  { %393 = vperm.xlu2 %2546, %v3236_v30  }
 0x23d   :  { %v388_v31 = vpop.permute.xlu2 %387 }
 0x23e   :  { %v396_v33 = vperm.slane %v388_v31, %v3211_v56 }
 0x245   :  { %v394_v34 = vpop.permute.xlu2 %393 }
 0x246   :  { %v398_v40 = vperm.slane %v394_v34, %v3211_v56 }
 0x254   :  { %v385_v32 = vpop.permute.xlu0 %384 }
 0x255   :  { %v395_v36 = vperm.slane %v385_v32, %v3211_v56 }
 0x256   :  { %v391_v37 = vpop.permute.xlu1 %390 }
 0x257   :  { %v397_v38 = vperm.slane %v391_v37, %v3211_v56  ;;  %v399_v39 = vsel %vm347_vm1, %v396_v33, %v395_v36 }
 0x259   :  { %v400_v41 = vsel %vm349_vm2, %v397_v38, %v399_v39 }
 0x25a   :  { %v401_v42 = vsel %vm351_vm3, %v398_v40, %v400_v41 }
 0x25b   :  { %v403_v44 = vsel %vm3871_vm4, %v401_v42, 0.0 }
 0x25c   :  { %404 = vadd.xlane.f32.xlu1 %v403_v44 }
 0x2cf   :  { %v405_v45 = vpop.xlane.xlu1 %404 }
 0x2d0   :  { %v407_v46 = vperm.slane %v405_v45, 0  ;;  %v408_v47 = vperm.slane %v405_v45, 1  ;;  %v409_v48 = vperm.slane %v405_v45, 2  ;;  %v410_v49 = vperm.slane %v405_v45, 3  ;;  %v3258_v45 = vld [vmem:[#allocation12 + $0x18] sm:$0xff] }
 0x2d1   :  { %573 = vmatpush.msra.mxu3 %v3258_v45 }
 0x2d2   :  { %2569 = vrcp.f32 %v407_v46  ;;  %v439_v55 = vand.u32 2147483647, %v408_v47  ;;  %v441_v59 = vand.u32 2147483648, %v408_v47  ;;  %v424_v61 = vand.u32 2147483647, %v407_v46 }
 0x2d3   :  { %2571 = vrcp.f32 %v408_v47  ;;  %vm435_vm5 = vweird.f32 %v408_v47  ;;  %v426_v0 = vand.u32 2147483648, %v407_v46  ;;  %vm420_vm6 = vweird.f32 %v407_v46 }
 0x2d4   :  { %2573 = vrcp.f32 %v409_v48  ;;  %vm3247_vm9 = vcmp.eq.f32.partialorder %v439_v55, 8.507059e+37  ;;  %v442_v7 = vor.u32 1.1754944e-38, %v441_v59  ;;  %vm425_vm10 = vcmp.eq.f32.partialorder %v424_v61, 8.507059e+37 }
 0x2d5   :  { %2575 = vrcp.f32 %v410_v49  ;;  %v427_v15 = vor.u32 1.1754944e-38, %v426_v0  ;;  %v471_v17 = vand.u32 2147483648, %v410_v49  ;;  %v456_v21 = vand.u32 2147483648, %v409_v48 }
 0x2d6   :  { %vm450_vm15 = vweird.f32 %v409_v48  ;;  %v454_v33 = vand.u32 2147483647, %v409_v48  ;;  %v469_v36 = vand.u32 2147483647, %v410_v49 }
 0x2d7   :  { %v457_v39 = vor.u32 1.1754944e-38, %v456_v21  ;;  %v472_v40 = vor.u32 1.1754944e-38, %v471_v17 }
 0x2d8   :  { %v2570_v50 = vpop.eup %2569 }
 0x2d9   :  { %v2572_v51 = vpop.eup %2571  ;;  %v416_v52 = vmul.f32 %v2570_v50, %v407_v46  ;;  %vm421_vm7 = vweird.f32 %v2570_v50  ;;  %v3260_v46 = vld [vmem:[#allocation12 + $0x10] sm:$0xff] }
 0x2da   :  { %v2574_v53 = vpop.eup %2573  ;;  %v431_v54 = vmul.f32 %v2572_v51, %v408_v47  ;;  %vm436_vm8 = vweird.f32 %v2572_v51  ;;  %vm422_vm11 = vmor %vm420_vm6, %vm421_vm7  ;;  %vm465_vm6 = vweird.f32 %v410_v49  ;;  %v3262_v47 = vld [vmem:[#allocation14 + $0x8] sm:$0xff]  ;;  %574 = vmatpush.msra.mxu3 %v3260_v46 }
 0x2db   :  { %v2576_v57 = vpop.eup %2575  ;;  %v417_v60 = vsub.f32 1.0, %v416_v52  ;;  %v446_v62 = vmul.f32 %v2574_v53, %v409_v48  ;;  %vm437_vm12 = vmor %vm435_vm5, %vm436_vm8  ;;  %vm451_vm13 = vweird.f32 %v2574_v53  ;;  %vm455_vm8 = vcmp.eq.f32.partialorder %v454_v33, 8.507059e+37  ;;  %546 = vmatpush.msra.mxu2 %v3262_v47  ;;  %v3266_v48 = vld [vmem:[#allocation14] sm:$0xff]  ;;  %1636 = vmatpush.msrb.mxu0 %v3262_v47 }
 0x2dc   :  { %v432_v63 = vsub.f32 1.0, %v431_v54  ;;  %v461_v1 = vmul.f32 %v2576_v57, %v410_v49  ;;  %vm466_vm14 = vweird.f32 %v2576_v57  ;;  %vm452_vm5 = vmor %vm450_vm15, %vm451_vm13  ;;  %v3268_v49 = vld [vmem:[#allocation12 + $0x8] sm:$0xff]  ;;  %v3282_v52 = vld [vmem:[%s3866_s12] ss:$0 sm:$0xff] }
 0x2dd   :  { %v418_v2 = vmul.f32 %v2570_v50, %v417_v60  ;;  %v447_v3 = vsub.f32 1.0, %v446_v62  ;;  %vm467_vm7 = vmor %vm465_vm6, %vm466_vm14  ;;  %547 = vmatpush.msra.mxu2 %v3266_v48  ;;  %1637 = vmatpush.msrb.mxu0 %v3266_v48 }
 0x2de   :  { %v433_v4 = vmul.f32 %v2572_v51, %v432_v63  ;;  %v462_v6 = vsub.f32 1.0, %v461_v1  ;;  %575 = vmatpush.msra.mxu3 %v3268_v49 }
 0x2df   :  { %v419_v8 = vadd.f32 %v2570_v50, %v418_v2  ;;  %v448_v10 = vmul.f32 %v2574_v53, %v447_v3  ;;  %1995 = vmatpush.msra.mxu0 %v3262_v47 }
 0x2e0   :  { %v434_v14 = vadd.f32 %v2572_v51, %v433_v4  ;;  %v463_v16 = vmul.f32 %v2576_v57, %v462_v6 }
 0x2e1   :  { %v423_v18 = vsel %vm422_vm11, %v2570_v50, %v419_v8  ;;  %v449_v20 = vadd.f32 %v2574_v53, %v448_v10  ;;  %1996 = vmatpush.msra.mxu0 %v3266_v48 }
 0x2e2   :  { %v438_v22 = vsel %vm437_vm12, %v2572_v51, %v434_v14  ;;  %v428_v23 = vsel %vm425_vm10, %v427_v15, %v423_v18  ;;  %v464_v24 = vadd.f32 %v2576_v57, %v463_v16  ;;  %vm470_vm10 = vcmp.eq.f32.partialorder %v469_v36, 8.507059e+37  ;;  %v3274_v51 = vld [vmem:[#allocation12] sm:$0xff] }
 0x2e3   :  { %v443_v31 = vsel %vm3247_vm9, %v442_v7, %v438_v22  ;;  %v429_v32 = vmul.f32 %v3227_v25, %v428_v23  ;;  %v453_v37 = vsel %vm452_vm5, %v2574_v53, %v449_v20  ;;  %vm528_vm9 = vcmask 130048   ;;  %576 = vmatpush.msra.mxu3 %v3274_v51 }
 0x2e4   :  { %v444_v34 = vmul.f32 %v3229_v28, %v443_v31  ;;  %v468_v38 = vsel %vm467_vm7, %v2576_v57, %v464_v24  ;;  %v458_v41 = vsel %vm455_vm8, %v457_v39, %v453_v37 }
 0x2e5   :  { %477 = vperm.xlu2 %2546, %v429_v32   ;;  %v473_v42 = vsel %vm470_vm10, %v472_v40, %v468_v38  ;;  %v459_v25 = vmul.f32 %v3232_v29, %v458_v41  ;;  %v527_v29 = vld [vmem:[#allocation3] sm:$0xf]  ;;  %918 = vmatpush.msrb.mxu3 %v3262_v47  ;;  %v3305_v38 = vld [vmem:[%s3865_s11] ss:$0 sm:$0xff] }
 0x2e6   :  { %482 = vperm.xlu0 %2545, %v444_v34   ;;  %v474_v44 = vmul.f32 %v3236_v30, %v473_v42  ;;  %2497 = vmatmul.msk.f32.vlgmr.msra.gmra.mxu2 %vm528_vm9, %v527_v29 }
 0x2e7   :  { %919 = vmatpush.msrb.mxu3 %v3266_v48 }
 0x2ed   :  { %487 = vperm.xlu2 %2546, %v459_v25  }
 0x2ee   :  { %492 = vperm.xlu0 %2545, %v474_v44  }
 0x2f5   :  { %608 = vrot.lane.b32.xlu2 %v3282_v52, %s3021_s27 }
 0x33f   :  { %v478_v28 = vpop.permute.xlu2 %477 }
 0x340   :  { %v495_v30 = vmul.f32 %v478_v28, %v3163_v9 }
 0x342   :  { %v499_v53 = vsel %vm187_vm0, %v495_v30, 0.0 }
 0x343   :  { %v500_v54 = vrot.slane %v499_v53, 4 }
 0x345   :  { %v501_v61 = vadd.f32 %v500_v54, %v499_v53 }
 0x347   :  { %v488_v50 = vpop.permute.xlu2 %487  ;;  %v502_v1 = vrot.slane %v501_v61, 2 }
 0x348   :  { %v497_v9 = vmul.f32 %v488_v50, %v3172_v12 }
 0x349   :  { %v503_v7 = vadd.f32 %v502_v1, %v501_v61 }
 0x34a   :  { %v513_v55 = vsel %vm187_vm0, %v497_v9, 0.0 }
 0x34b   :  { %v514_v59 = vrot.slane %v513_v55, 4  ;;  %v504_v17 = vrot.slane %v503_v7, 1 }
 0x34d   :  { %v515_v0 = vadd.f32 %v514_v59, %v513_v55  ;;  %v505_v23 = vadd.f32 %v504_v17, %v503_v7  ;;  %v3326_v7 = vld [vmem:[#allocation15 + $0x10] sm:$0xff] }
 0x34f   :  { %v516_v5 = vrot.slane %v515_v0, 2 }
 0x351   :  { %v517_v16 = vadd.f32 %v516_v5, %v515_v0  ;;  %v3322_v5 = vld [vmem:[#allocation15 + $0x20] sm:$0xff] }
 0x353   :  { %v518_v22 = vrot.slane %v517_v16, 1 }
 0x355   :  { %v519_v33 = vadd.f32 %v518_v22, %v517_v16 }
 0x358   :  { %v483_v57 = vpop.permute.xlu0 %482 }
 0x359   :  { %v496_v60 = vmul.f32 %v483_v57, %v3168_v11  ;;  %v3309_v57 = vpop.permute.xlu2 %608 }
 0x35b   :  { %v506_v62 = vsel %vm187_vm0, %v496_v60, 0.0 }
 0x35c   :  { %v507_v63 = vrot.slane %v506_v62, 4 }
 0x35e   :  { %v508_v2 = vadd.f32 %v507_v63, %v506_v62 }
 0x360   :  { %v509_v3 = vrot.slane %v508_v2, 2  ;;  %v493_v4 = vpop.permute.xlu0 %492 }
 0x361   :  { %v498_v6 = vmul.f32 %v493_v4, %v3176_v13  ;;  %v3318_v4 = vld [vmem:[#allocation15 + $0x28] sm:$0xff] }
 0x362   :  { %v510_v8 = vadd.f32 %v509_v3, %v508_v2  ;;  %v3314_v2 = vld [vmem:[#allocation15 + $0x38] sm:$0xff]  ;;  %v3316_v3 = vld [vmem:[#allocation15 + $0x30] sm:$0xff] }
 0x363   :  { %v520_v10 = vsel %vm187_vm0, %v498_v6, 0.0  ;;  %666 = vmatpush.msrb.mxu1 %v3314_v2  ;;  %646 = vmatpush.msrb.mxu2 %v3316_v3  ;;  %v3324_v6 = vld [vmem:[#allocation15 + $0x18] sm:$0xff] }
 0x364   :  { %v511_v14 = vrot.slane %v510_v8, 1  ;;  %v521_v15 = vrot.slane %v520_v10, 4 }
 0x365   :  { %667 = vmatpush.msrb.mxu1 %v3318_v4  ;;  %647 = vmatpush.msrb.mxu2 %v3322_v5 }
 0x366   :  { %v522_v18 = vadd.f32 %v521_v15, %v520_v10  ;;  %v512_v20 = vadd.f32 %v511_v14, %v510_v8  ;;  %v3331_v8 = vld [vmem:[#allocation15 + $0x8] sm:$0xff]  ;;  %v3333_v10 = vld [vmem:[#allocation15] sm:$0xff] }
 0x367   :  { %668 = vmatpush.msrb.mxu1 %v3324_v6  ;;  %648 = vmatpush.msrb.mxu2 %v3326_v7 }
 0x368   :  { %v523_v21 = vrot.slane %v522_v18, 2  ;;  %v556_v32 = vsel %vm347_vm1, %v512_v20, %v505_v23 }
 0x369   :  { %v557_v13 = vsel %vm349_vm2, %v519_v33, %v556_v32  ;;  %v549_v37 = vpop.f32.mrf.mxu2  ;;  %669 = vmatpush.msrb.mxu1 %v3331_v8  ;;  %649 = vmatpush.msrb.mxu2 %v3333_v10 }
 0x36a   :  { %v524_v24 = vadd.f32 %v523_v21, %v522_v18  ;;  %v255_v18 = vld [vmem:[%s3868_s14] sm:$0x3] }
 0x36b   :  { %945 = vmatpush.msra.mxu2 %v3258_v45  ;;  %1004 = vmatpush.msra.mxu1 %v3316_v3  ;;  %v3362_v20 = vperm.slane %v255_v18, 1 }
 0x36c   :  { %v525_v31 = vrot.slane %v524_v24, 1 }
 0x36d   :  { %946 = vmatpush.msra.mxu2 %v3260_v46  ;;  %1005 = vmatpush.msra.mxu1 %v3322_v5 }
 0x36e   :  { %v526_v34 = vadd.f32 %v525_v31, %v524_v24 }
 0x36f   :  { %947 = vmatpush.msra.mxu2 %v3268_v49  ;;  %1006 = vmatpush.msra.mxu1 %v3326_v7 }
 0x370   :  { %v558_v36 = vsel %vm351_vm3, %v526_v34, %v557_v13 }
 0x371   :  { %2498 = vmatmul.msk.f32.vlgmr.msra.gmra.mxu3 %vm187_vm0, %v558_v36  ;;  %948 = vmatpush.msra.mxu2 %v3274_v51 }
 0x372   :  { %1024 = vmatpush.msra.mxu3 %v3314_v2  ;;  %1007 = vmatpush.msra.mxu1 %v3333_v10 }
 0x374   :  { %1025 = vmatpush.msra.mxu3 %v3318_v4 }
 0x376   :  { %1026 = vmatpush.msra.mxu3 %v3324_v6 }
 0x378   :  { %1027 = vmatpush.msra.mxu3 %v3331_v8 }
 0x3f4   :  { %v578_v39 = vpop.f32.mrf.mxu3 }
 0x3f5   :  { %v579_v40 = vadd.f32 %v578_v39, %v549_v37 }
 0x3f7   :  { %v584_v41 = vadd.f32 %v3305_v38, %v579_v40 }
 0x3f9   :  { %v588_v42 = vadd.f32 %v3282_v52, %v584_v41 }
 0x3fb   :  { %v2499_v25 = vmul.f32 -1.442695, %v588_v42 }
 0x3fd   :  { %2577 = vpow2.f32 %v2499_v25 }
 0x403   :  { %v2578_v44 = vpop.eup %2577 }
 0x404   :  { %v592_v28 = vadd.f32 1.0, %v2578_v44 }
 0x406   :  { %2579 = vrcp.f32 %v592_v28  ;;  %v604_v9 = vand.u32 2147483648, %v592_v28  ;;  %v602_v54 = vand.u32 2147483647, %v592_v28  ;;  %vm598_vm12 = vweird.f32 %v592_v28 }
 0x408   :  { %v605_v59 = vor.u32 1.1754944e-38, %v604_v9  ;;  %vm603_vm14 = vcmp.eq.f32.partialorder %v602_v54, 8.507059e+37 }
 0x40c   :  { %v2580_v29 = vpop.eup %2579 }
 0x40d   :  { %v594_v30 = vmul.f32 %v2580_v29, %v592_v28  ;;  %vm599_vm11 = vweird.f32 %v2580_v29 }
 0x40e   :  { %vm600_vm13 = vmor %vm598_vm12, %vm599_vm11 }
 0x40f   :  { %v595_v50 = vsub.f32 1.0, %v594_v30 }
 0x411   :  { %v596_v53 = vmul.f32 %v2580_v29, %v595_v50 }
 0x413   :  { %v597_v55 = vadd.f32 %v2580_v29, %v596_v53 }
 0x415   :  { %v601_v60 = vsel %vm600_vm13, %v2580_v29, %v597_v55 }
 0x416   :  { %v606_v61 = vsel %vm603_vm14, %v605_v59, %v601_v60 }
 0x417   :  { %v611_v62 = vmul.f32 %v3309_v57, %v606_v61  ;;  %v618_v14 = vsub.f32 1.0, %v606_v61 }
 0x419   :  { %613 = vrot.lane.b32.xlu0 %v611_v62, %s3021_s27 }
 0x48b   :  { %v614_v63 = vpop.permute.xlu0 %613 }
 0x48c   :  { %v616_v0 = vadd.f32 %v614_v63, %v584_v41 }
 0x48e   :  { %2581 = vtanh.f32 %v616_v0 }
 0x494   :  { %v2582_v1 = vpop.eup %2581 }
 0x495   :  { %620 = vrot.lane.b32.xlu2 %v2582_v1, %s3030_s23 }
 0x4ef   :  { %v621_v15 = vpop.permute.xlu2 %620 }
 0x4f0   :  { %v623_v16 = vmul.f32 %v621_v15, %v618_v14 }
 0x4f2   :  { %630 = vrot.lane.b32.xlu0 %v623_v16, %s3030_s23 }
 0x564   :  { %v631_v17 = vpop.permute.xlu0 %630 }
 0x565   :  { %2500 = vmatmul.msk.f32.vlgmr.msrb.gmra.mxu2 %vm187_vm0, %v631_v17  ;;  %2501 = vmatmul.msk.f32.vlgmr.msrb.gmra.mxu1 %vm187_vm0, %v631_v17 }
 0x566   :  { %1277 = vmatpush.msrb.mxu2 %v3262_v47  ;;  %1304 = vmatpush.msrb.mxu1 %v3258_v45  ;;  %v3365_v47 = vperm.slane %v255_v18, 0 }
 0x568   :  { %1278 = vmatpush.msrb.mxu2 %v3266_v48  ;;  %1305 = vmatpush.msrb.mxu1 %v3260_v46 }
 0x56a   :  { %1306 = vmatpush.msrb.mxu1 %v3268_v49 }
 0x56c   :  { %1307 = vmatpush.msrb.mxu1 %v3274_v51 }
 0x5e2   :  { %v671_v21 = vpop.f32.mrf.mxu1 }
 0x5e3   :  { %v672_v22 = vadd.f32 %v671_v21, %v3362_v20 }
 0x5e5   :  { %v676_v23 = vrot.slane %v672_v22, 1  ;;  %v677_v24 = vrot.slane %v672_v22, 2  ;;  %v678_v48 = vrot.slane %v672_v22, 3  ;;  %v679_v31 = vperm.slane %v672_v22, 0 }
 0x5e7   :  { %v680_v32 = vperm.slane %v676_v23, 0  ;;  %v681_v33 = vperm.slane %v677_v24, 0  ;;  %v687_v34 = vadd.f32 %v679_v31, %v3186_v19  ;;  %v682_v13 = vperm.slane %v678_v48, 0 }
 0x5e8   :  { %v651_v36 = vpop.f32.mrf.mxu2 }
 0x5e9   :  { %v652_v37 = vadd.f32 %v651_v36, %v3365_v47  ;;  %2583 = vtanh.f32 %v687_v34  ;;  %v689_v39 = vadd.f32 %v681_v33, %v3199_v35  ;;  %v688_v40 = vadd.f32 %v680_v32, %v3189_v26 }
 0x5ea   :  { %v690_v41 = vadd.f32 %v682_v13, %v3204_v43 }
 0x5eb   :  { %674 = vst [vmem:[#allocation17] sm:$0xf] %v652_v37  ;;  %2585 = vtanh.f32 %v689_v39 }
 0x5ec   :  { %2587 = vtanh.f32 %v688_v40 }
 0x5ed   :  { %2589 = vtanh.f32 %v690_v41 }
 0x5ef   :  { %v2584_v42 = vpop.eup %2583 }
 0x5f0   :  { %v695_v25 = vmul.f32 %v2584_v42, %v3194_v27 }
 0x5f1   :  { %v2586_v44 = vpop.eup %2585 }
 0x5f2   :  { %v2588_v28 = vpop.eup %2587  ;;  %v699_v29 = vsel %vm187_vm0, %v695_v25, 0.0  ;;  %v697_v30 = vmul.f32 %v2586_v44, %v3194_v27 }
 0x5f3   :  { %700 = vadd.xlane.f32.xlu2 %v699_v29  ;;  %v696_v50 = vmul.f32 %v2588_v28, %v3194_v27  ;;  %v2590_v54 = vpop.eup %2589 }
 0x5f4   :  { %v705_v9 = vsel %vm187_vm0, %v697_v30, 0.0  ;;  %v698_v55 = vmul.f32 %v2590_v54, %v3194_v27 }
 0x5f5   :  { %706 = vadd.xlane.f32.xlu0 %v705_v9  ;;  %v702_v53 = vsel %vm187_vm0, %v696_v50, 0.0 }
 0x5f6   :  { %703 = vadd.xlane.f32.xlu1 %v702_v53  ;;  %v708_v59 = vsel %vm187_vm0, %v698_v55, 0.0 }
 0x5fe   :  { %709 = vadd.xlane.f32.xlu1 %v708_v59 }
 0x666   :  { %v701_v60 = vpop.xlane.xlu2 %700 }
 0x667   :  { %v711_v0 = vadd.f32 %v701_v60, %v3213_v58 }
 0x668   :  { %v707_v62 = vpop.xlane.xlu0 %706 }
 0x669   :  { %v704_v61 = vpop.xlane.xlu1 %703  ;;  %v713_v1 = vadd.f32 %v707_v62, %v3213_v58  ;;  %v719_v15 = vperm.slane %v711_v0, %v3211_v56 }
 0x66a   :  { %v712_v63 = vadd.f32 %v704_v61, %v3213_v58 }
 0x66b   :  { %v721_v16 = vperm.slane %v713_v1, %v3211_v56 }
 0x66c   :  { %v720_v14 = vperm.slane %v712_v63, %v3211_v56 }
 0x66e   :  { %v723_v18 = vsel %vm347_vm1, %v720_v14, %v719_v15 }
 0x66f   :  { %v724_v22 = vsel %vm349_vm2, %v721_v16, %v723_v18 }
 0x671   :  { %v710_v17 = vpop.xlane.xlu1 %709 }
 0x672   :  { %v714_v27 = vadd.f32 %v710_v17, %v3213_v58 }
 0x674   :  { %v722_v21 = vperm.slane %v714_v27, %v3211_v56 }
 0x676   :  { %v725_v23 = vsel %vm351_vm3, %v722_v21, %v724_v22 }
 0x677   :  { %v727_v24 = vsel %vm3871_vm4, %v725_v23, -inf }
 0x678   :  { %728 = vmax.xlane.f32.xlu1 %v727_v24 }
 0x6eb   :  { %v729_v48 = vpop.xlane.xlu1 %728 }
 0x6ec   :  { %v731_v31 = vperm.slane %v729_v48, 0  ;;  %v732_v32 = vperm.slane %v729_v48, 1  ;;  %v733_v33 = vperm.slane %v729_v48, 2  ;;  %v734_v34 = vperm.slane %v729_v48, 3 }
 0x6ee   :  { %v739_v13 = vsub.f32 %v711_v0, %v731_v31  ;;  %v740_v36 = vsub.f32 %v712_v63, %v732_v32  ;;  %v741_v37 = vsub.f32 %v713_v1, %v733_v33  ;;  %v742_v42 = vsub.f32 %v714_v27, %v734_v34 }
 0x6f0   :  { %v743_v39 = vmul.f32 1.442695, %v739_v13  ;;  %v745_v40 = vmul.f32 1.442695, %v740_v36  ;;  %v747_v41 = vmul.f32 1.442695, %v741_v37 }
 0x6f1   :  { %v749_v25 = vmul.f32 1.442695, %v742_v42 }
 0x6f2   :  { %2591 = vpow2.f32 %v743_v39 }
 0x6f3   :  { %2593 = vpow2.f32 %v745_v40 }
 0x6f4   :  { %2595 = vpow2.f32 %v747_v41 }
 0x6f5   :  { %2597 = vpow2.f32 %v749_v25 }
 0x6f8   :  { %v3392_v44 = vpop.eup %2591 }
 0x6f9   :  { %v3394_v28 = vpop.eup %2593  ;;  %756 = vperm.xlu1 %2544, %v3392_v44  }
 0x6fa   :  { %v3397_v29 = vpop.eup %2595  ;;  %759 = vperm.xlu2 %2546, %v3394_v28  }
 0x6fb   :  { %762 = vperm.xlu0 %2545, %v3397_v29   ;;  %v3401_v30 = vpop.eup %2597 }
 0x701   :  { %765 = vperm.xlu1 %2544, %v3401_v30  }
 0x754   :  { %v760_v9 = vpop.permute.xlu2 %759 }
 0x755   :  { %v768_v55 = vperm.slane %v760_v9, %v3211_v56 }
 0x76b   :  { %v757_v50 = vpop.permute.xlu1 %756 }
 0x76c   :  { %v767_v54 = vperm.slane %v757_v50, %v3211_v56 }
 0x76d   :  { %v763_v53 = vpop.permute.xlu0 %762 }
 0x76e   :  { %v769_v59 = vperm.slane %v763_v53, %v3211_v56  ;;  %v771_v60 = vsel %vm347_vm1, %v768_v55, %v767_v54 }
 0x770   :  { %v772_v63 = vsel %vm349_vm2, %v769_v59, %v771_v60 }
 0x773   :  { %v766_v61 = vpop.permute.xlu1 %765 }
 0x774   :  { %v770_v62 = vperm.slane %v766_v61, %v3211_v56 }
 0x776   :  { %v773_v0 = vsel %vm351_vm3, %v770_v62, %v772_v63 }
 0x777   :  { %v775_v1 = vsel %vm3871_vm4, %v773_v0, 0.0 }
 0x778   :  { %776 = vadd.xlane.f32.xlu1 %v775_v1 }
 0x7eb   :  { %v777_v14 = vpop.xlane.xlu1 %776 }
 0x7ec   :  { %v779_v15 = vperm.slane %v777_v14, 0  ;;  %v780_v16 = vperm.slane %v777_v14, 1  ;;  %v781_v17 = vperm.slane %v777_v14, 2  ;;  %v782_v27 = vperm.slane %v777_v14, 3 }
 0x7ee   :  { %2599 = vrcp.f32 %v779_v15  ;;  %v811_v48 = vand.u32 2147483647, %v780_v16  ;;  %v813_v32 = vand.u32 2147483648, %v780_v16  ;;  %v796_v34 = vand.u32 2147483647, %v779_v15 }
 0x7ef   :  { %2601 = vrcp.f32 %v780_v16  ;;  %vm807_vm15 = vweird.f32 %v780_v16  ;;  %v798_v37 = vand.u32 2147483648, %v779_v15  ;;  %vm792_vm6 = vweird.f32 %v779_v15 }
 0x7f0   :  { %2603 = vrcp.f32 %v781_v17  ;;  %vm3412_vm8 = vcmp.eq.f32.partialorder %v811_v48, 8.507059e+37  ;;  %v814_v9 = vor.u32 1.1754944e-38, %v813_v32  ;;  %vm797_vm10 = vcmp.eq.f32.partialorder %v796_v34, 8.507059e+37 }
 0x7f1   :  { %2605 = vrcp.f32 %v782_v27  ;;  %v799_v59 = vor.u32 1.1754944e-38, %v798_v37  ;;  %v843_v61 = vand.u32 2147483648, %v782_v27  ;;  %v828_v0 = vand.u32 2147483648, %v781_v17  ;;  %v3423_v37 = vld [vmem:[#allocation8] sm:$0xff] }
 0x7f2   :  { %vm822_vm4 = vweird.f32 %v781_v17  ;;  %v826_v48 = vand.u32 2147483647, %v781_v17 }
 0x7f3   :  { %v844_v34 = vor.u32 1.1754944e-38, %v843_v61 }
 0x7f4   :  { %v2600_v18 = vpop.eup %2599 }
 0x7f5   :  { %v2602_v21 = vpop.eup %2601  ;;  %v788_v22 = vmul.f32 %v2600_v18, %v779_v15  ;;  %vm793_vm5 = vweird.f32 %v2600_v18 }
 0x7f6   :  { %v2604_v23 = vpop.eup %2603  ;;  %v803_v24 = vmul.f32 %v2602_v21, %v780_v16  ;;  %vm808_vm7 = vweird.f32 %v2602_v21  ;;  %vm794_vm11 = vmor %vm792_vm6, %vm793_vm5  ;;  %vm837_vm6 = vweird.f32 %v782_v27  ;;  %v841_v16 = vand.u32 2147483647, %v782_v27 }
 0x7f7   :  { %v2606_v31 = vpop.eup %2605  ;;  %v789_v33 = vsub.f32 1.0, %v788_v22  ;;  %v818_v13 = vmul.f32 %v2604_v23, %v781_v17  ;;  %vm809_vm12 = vmor %vm807_vm15, %vm808_vm7  ;;  %vm823_vm13 = vweird.f32 %v2604_v23  ;;  %vm827_vm7 = vcmp.eq.f32.partialorder %v826_v48, 8.507059e+37 }
 0x7f8   :  { %v804_v36 = vsub.f32 1.0, %v803_v24  ;;  %v833_v39 = vmul.f32 %v2606_v31, %v782_v27  ;;  %vm838_vm14 = vweird.f32 %v2606_v31  ;;  %vm824_vm15 = vmor %vm822_vm4, %vm823_vm13  ;;  %v900_v27 = vld [vmem:[#allocation3 + $0x4] sm:$0xf]  ;;  %vm3878_vm13 = vcmask 60416  }
 0x7f9   :  { %v790_v40 = vmul.f32 %v2600_v18, %v789_v33  ;;  %v819_v41 = vsub.f32 1.0, %v818_v13  ;;  %vm839_vm5 = vmor %vm837_vm6, %vm838_vm14  ;;  %v829_v33 = vor.u32 1.1754944e-38, %v828_v0  ;;  %2502 = vmatmul.msk.f32.vlgmr.msrb.gmra.mxu3 %vm528_vm9, %v900_v27 }
 0x7fa   :  { %v805_v42 = vmul.f32 %v2602_v21, %v804_v36  ;;  %v834_v50 = vsub.f32 1.0, %v833_v39  ;;  %1363 = vmatpush.msrb.mxu3 %v3316_v3  ;;  %vm3879_vm14 = vmmov %vm3878_vm13 }
 0x7fb   :  { %v791_v53 = vadd.f32 %v2600_v18, %v790_v40  ;;  %v820_v54 = vmul.f32 %v2604_v23, %v819_v41 }
 0x7fc   :  { %v806_v55 = vadd.f32 %v2602_v21, %v805_v42  ;;  %v835_v60 = vmul.f32 %v2606_v31, %v834_v50  ;;  %1364 = vmatpush.msrb.mxu3 %v3322_v5 }
 0x7fd   :  { %v795_v62 = vsel %vm794_vm11, %v2600_v18, %v791_v53  ;;  %v821_v63 = vadd.f32 %v2604_v23, %v820_v54 }
 0x7fe   :  { %v810_v1 = vsel %vm809_vm12, %v2602_v21, %v806_v55  ;;  %v800_v14 = vsel %vm797_vm10, %v799_v59, %v795_v62  ;;  %v836_v15 = vadd.f32 %v2606_v31, %v835_v60  ;;  %vm842_vm10 = vcmp.eq.f32.partialorder %v841_v16, 8.507059e+37  ;;  %1365 = vmatpush.msrb.mxu3 %v3326_v7  ;;  %v3436_v62 = vld [vmem:[#allocation8 + $0x18] sm:$0xff] }
 0x7ff   :  { %v815_v22 = vsel %vm3412_vm8, %v814_v9, %v810_v1  ;;  %v801_v24 = vmul.f32 %v3392_v44, %v800_v14  ;;  %v825_v18 = vsel %vm824_vm15, %v2604_v23, %v821_v63 }
 0x800   :  { %v816_v32 = vmul.f32 %v3394_v28, %v815_v22  ;;  %v840_v21 = vsel %vm839_vm5, %v2606_v31, %v836_v15  ;;  %v830_v13 = vsel %vm827_vm7, %v829_v33, %v825_v18  ;;  %1366 = vmatpush.msrb.mxu3 %v3333_v10 }
 0x801   :  { %849 = vperm.xlu2 %2546, %v801_v24   ;;  %v845_v36 = vsel %vm842_vm10, %v844_v34, %v840_v21  ;;  %v831_v44 = vmul.f32 %v3397_v29, %v830_v13 }
 0x802   :  { %854 = vperm.xlu0 %2545, %v816_v32   ;;  %v846_v17 = vmul.f32 %v3401_v30, %v845_v36 }
 0x809   :  { %859 = vperm.xlu2 %2546, %v831_v44  }
 0x80a   :  { %864 = vperm.xlu0 %2545, %v846_v17  }
 0x85b   :  { %v850_v28 = vpop.permute.xlu2 %849 }
 0x85c   :  { %v867_v23 = vmul.f32 %v3423_v37, %v850_v28 }
 0x85e   :  { %v871_v29 = vsel %vm187_vm0, %v867_v23, 0.0 }
 0x85f   :  { %v872_v30 = vrot.slane %v871_v29, 4 }
 0x861   :  { %v873_v50 = vadd.f32 %v872_v30, %v871_v29 }
 0x863   :  { %v860_v39 = vpop.permute.xlu2 %859  ;;  %v874_v54 = vrot.slane %v873_v50, 2 }
 0x864   :  { %v869_v31 = vmul.f32 %v860_v39, %v3172_v12 }
 0x865   :  { %v875_v0 = vadd.f32 %v874_v54, %v873_v50 }
 0x866   :  { %v885_v40 = vsel %vm187_vm0, %v869_v31, 0.0 }
 0x867   :  { %v886_v42 = vrot.slane %v885_v40, 4  ;;  %v876_v24 = vrot.slane %v875_v0, 1 }
 0x869   :  { %v887_v12 = vadd.f32 %v886_v42, %v885_v40  ;;  %v877_v21 = vadd.f32 %v876_v24, %v875_v0 }
 0x86b   :  { %v888_v61 = vrot.slane %v887_v12, 2 }
 0x86d   :  { %v889_v22 = vadd.f32 %v888_v61, %v887_v12 }
 0x86f   :  { %v890_v18 = vrot.slane %v889_v22, 1 }
 0x871   :  { %v891_v36 = vadd.f32 %v890_v18, %v889_v22 }
 0x874   :  { %v855_v41 = vpop.permute.xlu0 %854 }
 0x875   :  { %v868_v25 = vmul.f32 %v855_v41, %v3168_v11 }
 0x877   :  { %v878_v9 = vsel %vm187_vm0, %v868_v25, 0.0 }
 0x878   :  { %v879_v53 = vrot.slane %v878_v9, 4 }
 0x87a   :  { %v880_v55 = vadd.f32 %v879_v53, %v878_v9 }
 0x87c   :  { %v881_v59 = vrot.slane %v880_v55, 2  ;;  %v865_v60 = vpop.permute.xlu0 %864  ;;  %v921_v27 = vpop.f32.mrf.mxu3 }
 0x87d   :  { %v870_v63 = vmul.f32 %v3436_v62, %v865_v60 }
 0x87e   :  { %v882_v1 = vadd.f32 %v881_v59, %v880_v55 }
 0x87f   :  { %v892_v14 = vsel %vm187_vm0, %v870_v63, 0.0 }
 0x880   :  { %v883_v15 = vrot.slane %v882_v1, 1  ;;  %v893_v11 = vrot.slane %v892_v14, 4 }
 0x882   :  { %v894_v48 = vadd.f32 %v893_v11, %v892_v14  ;;  %v884_v32 = vadd.f32 %v883_v15, %v882_v1 }
 0x884   :  { %v895_v16 = vrot.slane %v894_v48, 2  ;;  %v928_v13 = vsel %vm347_vm1, %v884_v32, %v877_v21 }
 0x885   :  { %v929_v17 = vsel %vm349_vm2, %v891_v36, %v928_v13 }
 0x886   :  { %v896_v33 = vadd.f32 %v895_v16, %v894_v48 }
 0x888   :  { %v897_v34 = vrot.slane %v896_v33, 1 }
 0x88a   :  { %v898_v44 = vadd.f32 %v897_v34, %v896_v33  ;;  %v3473_v33 = vld [vmem:[%s3861_s7] ss:$0 sm:$0xff] }
 0x88c   :  { %v930_v28 = vsel %vm351_vm3, %v898_v44, %v929_v17 }
 0x88d   :  { %2503 = vmatmul.msk.f32.vlgmr.msra.gmra.mxu2 %vm187_vm0, %v930_v28 }
 0x88e   :  { %1383 = vmatpush.msra.mxu2 %v3314_v2 }
 0x890   :  { %1384 = vmatpush.msra.mxu2 %v3318_v4 }
 0x892   :  { %1385 = vmatpush.msra.mxu2 %v3324_v6 }
 0x894   :  { %1386 = vmatpush.msra.mxu2 %v3331_v8 }
 0x910   :  { %v950_v23 = vpop.f32.mrf.mxu2 }
 0x911   :  { %v951_v39 = vadd.f32 %v950_v23, %v921_v27 }
 0x913   :  { %v953_v31 = vadd.f32 %v3305_v38, %v951_v39 }
 0x915   :  { %v954_v29 = vadd.f32 %v3282_v52, %v953_v31 }
 0x917   :  { %v2504_v30 = vmul.f32 -1.442695, %v954_v29 }
 0x919   :  { %2607 = vpow2.f32 %v2504_v30 }
 0x91f   :  { %v2608_v40 = vpop.eup %2607 }
 0x920   :  { %v958_v41 = vadd.f32 1.0, %v2608_v40 }
 0x922   :  { %2609 = vrcp.f32 %v958_v41  ;;  %v970_v9 = vand.u32 2147483648, %v958_v41  ;;  %v968_v12 = vand.u32 2147483647, %v958_v41  ;;  %vm964_vm8 = vweird.f32 %v958_v41 }
 0x924   :  { %v971_v55 = vor.u32 1.1754944e-38, %v970_v9  ;;  %vm969_vm12 = vcmp.eq.f32.partialorder %v968_v12, 8.507059e+37 }
 0x928   :  { %v2610_v42 = vpop.eup %2609 }
 0x929   :  { %v960_v25 = vmul.f32 %v2610_v42, %v958_v41  ;;  %vm965_vm4 = vweird.f32 %v2610_v42 }
 0x92a   :  { %vm966_vm11 = vmor %vm964_vm8, %vm965_vm4 }
 0x92b   :  { %v961_v50 = vsub.f32 1.0, %v960_v25 }
 0x92d   :  { %v962_v53 = vmul.f32 %v2610_v42, %v961_v50 }
 0x92f   :  { %v963_v54 = vadd.f32 %v2610_v42, %v962_v53 }
 0x931   :  { %v967_v59 = vsel %vm966_vm11, %v2610_v42, %v963_v54 }
 0x932   :  { %v972_v38 = vsel %vm969_vm12, %v971_v55, %v967_v59 }
 0x933   :  { %v974_v52 = vmul.f32 %v972_v38, %v3309_v57  ;;  %v981_v0 = vsub.f32 1.0, %v972_v38 }
 0x935   :  { %976 = vrot.lane.b32.xlu2 %v974_v52, %s3021_s27 }
 0x98f   :  { %v977_v60 = vpop.permute.xlu2 %976 }
 0x990   :  { %v979_v61 = vadd.f32 %v977_v60, %v953_v31 }
 0x992   :  { %2611 = vtanh.f32 %v979_v61 }
 0x998   :  { %v2612_v63 = vpop.eup %2611 }
 0x999   :  { %983 = vrot.lane.b32.xlu0 %v2612_v63, %s3030_s23 }
 0xa0b   :  { %v984_v1 = vpop.permute.xlu0 %983 }
 0xa0c   :  { %v986_v14 = vmul.f32 %v984_v1, %v981_v0 }
 0xa0e   :  { %988 = vrot.lane.b32.xlu2 %v986_v14, %s3030_s23 }
 0xa68   :  { %v989_v15 = vpop.permute.xlu2 %988 }
 0xa69   :  { %2505 = vmatmul.msk.f32.vlgmr.msra.gmra.mxu1 %vm187_vm0, %v989_v15  ;;  %2506 = vmatmul.msk.f32.vlgmr.msra.gmra.mxu3 %vm187_vm0, %v989_v15 }
 0xa6a   :  { %1663 = vmatpush.msra.mxu1 %v3258_v45  ;;  %1722 = vmatpush.msra.mxu3 %v3316_v3 }
 0xa6c   :  { %1664 = vmatpush.msra.mxu1 %v3260_v46  ;;  %1723 = vmatpush.msra.mxu3 %v3322_v5 }
 0xa6e   :  { %1665 = vmatpush.msra.mxu1 %v3268_v49  ;;  %1724 = vmatpush.msra.mxu3 %v3326_v7 }
 0xa70   :  { %1666 = vmatpush.msra.mxu1 %v3274_v51  ;;  %1725 = vmatpush.msra.mxu3 %v3333_v10 }
 0xae6   :  { %v1009_v11 = vpop.f32.mrf.mxu1 }
 0xae7   :  { %v1010_v22 = vadd.f32 %v1009_v11, %v3365_v47 }
 0xae9   :  { %1033 = vst [vmem:[#allocation17 + $0x4] sm:$0xf] %v1010_v22 }
 0xaec   :  { %v1029_v24 = vpop.f32.mrf.mxu3 }
 0xaed   :  { %v1030_v45 = vadd.f32 %v1029_v24, %v3362_v20 }
 0xaef   :  { %v1035_v3 = vrot.slane %v1030_v45, 1  ;;  %v1036_v48 = vrot.slane %v1030_v45, 2  ;;  %v1037_v46 = vrot.slane %v1030_v45, 3  ;;  %v1038_v32 = vperm.slane %v1030_v45, 0 }
 0xaf1   :  { %v1039_v5 = vperm.slane %v1035_v3, 0  ;;  %v1040_v16 = vperm.slane %v1036_v48, 0  ;;  %v1041_v49 = vperm.slane %v1037_v46, 0  ;;  %v1046_v7 = vadd.f32 %v1038_v32, %v3186_v19 }
 0xaf3   :  { %2613 = vtanh.f32 %v1046_v7  ;;  %v1048_v51 = vadd.f32 %v1040_v16, %v3199_v35  ;;  %v1047_v10 = vadd.f32 %v1039_v5, %v3189_v26  ;;  %v1049_v18 = vadd.f32 %v1041_v49, %v3204_v43 }
 0xaf5   :  { %2615 = vtanh.f32 %v1048_v51 }
 0xaf6   :  { %2617 = vtanh.f32 %v1047_v10 }
 0xaf7   :  { %2619 = vtanh.f32 %v1049_v18 }
 0xaf9   :  { %v2614_v21 = vpop.eup %2613 }
 0xafa   :  { %v1054_v34 = vmul.f32 %v3473_v33, %v2614_v21 }
 0xafb   :  { %v2616_v13 = vpop.eup %2615 }
 0xafc   :  { %v2618_v36 = vpop.eup %2617  ;;  %v1058_v44 = vsel %vm187_vm0, %v1054_v34, 0.0  ;;  %v1056_v17 = vmul.f32 %v3473_v33, %v2616_v13 }
 0xafd   :  { %1059 = vadd.xlane.f32.xlu0 %v1058_v44  ;;  %v1055_v28 = vmul.f32 %v3473_v33, %v2618_v36  ;;  %v2620_v23 = vpop.eup %2619 }
 0xafe   :  { %v1064_v27 = vsel %vm187_vm0, %v1056_v17, 0.0  ;;  %v1057_v31 = vmul.f32 %v3473_v33, %v2620_v23 }
 0xaff   :  { %1065 = vadd.xlane.f32.xlu1 %v1064_v27  ;;  %v1061_v39 = vsel %vm187_vm0, %v1055_v28, 0.0 }
 0xb00   :  { %1062 = vadd.xlane.f32.xlu2 %v1061_v39  ;;  %v1067_v29 = vsel %vm187_vm0, %v1057_v31, 0.0 }
 0xb07   :  { %1068 = vadd.xlane.f32.xlu1 %v1067_v29 }
 0xb70   :  { %v1060_v30 = vpop.xlane.xlu0 %1059 }
 0xb71   :  { %v1070_v25 = vadd.f32 %v1060_v30, %v3213_v58 }
 0xb72   :  { %v1066_v40 = vpop.xlane.xlu1 %1065 }
 0xb73   :  { %v1063_v41 = vpop.xlane.xlu2 %1062  ;;  %v1072_v50 = vadd.f32 %v1066_v40, %v3213_v58  ;;  %v1078_v53 = vperm.slane %v1070_v25, %v3211_v56 }
 0xb74   :  { %v1071_v42 = vadd.f32 %v1063_v41, %v3213_v58 }
 0xb75   :  { %v1080_v12 = vperm.slane %v1072_v50, %v3211_v56 }
 0xb76   :  { %v1079_v9 = vperm.slane %v1071_v42, %v3211_v56 }
 0xb78   :  { %v1082_v59 = vsel %vm347_vm1, %v1079_v9, %v1078_v53 }
 0xb79   :  { %v1083_v52 = vsel %vm349_vm2, %v1080_v12, %v1082_v59 }
 0xb7a   :  { %v1069_v54 = vpop.xlane.xlu1 %1068 }
 0xb7b   :  { %v1073_v55 = vadd.f32 %v1069_v54, %v3213_v58 }
 0xb7d   :  { %v1081_v38 = vperm.slane %v1073_v55, %v3211_v56 }
 0xb7f   :  { %v1084_v60 = vsel %vm351_vm3, %v1081_v38, %v1083_v52 }
 0xb80   :  { %v1086_v61 = vsel %vm3878_vm13, %v1084_v60, -inf }
 0xb81   :  { %1087 = vmax.xlane.f32.xlu1 %v1086_v61 }
 0xbf4   :  { %v1088_v63 = vpop.xlane.xlu1 %1087 }
 0xbf5   :  { %v1090_v0 = vperm.slane %v1088_v63, 0  ;;  %v1091_v1 = vperm.slane %v1088_v63, 1  ;;  %v1092_v14 = vperm.slane %v1088_v63, 2  ;;  %v1093_v15 = vperm.slane %v1088_v63, 3 }
 0xbf7   :  { %v1098_v11 = vsub.f32 %v1070_v25, %v1090_v0  ;;  %v1099_v22 = vsub.f32 %v1071_v42, %v1091_v1  ;;  %v1100_v24 = vsub.f32 %v1072_v50, %v1092_v14  ;;  %v1101_v46 = vsub.f32 %v1073_v55, %v1093_v15 }
 0xbf9   :  { %v1102_v45 = vmul.f32 1.442695, %v1098_v11  ;;  %v1104_v3 = vmul.f32 1.442695, %v1099_v22  ;;  %v1106_v48 = vmul.f32 1.442695, %v1100_v24 }
 0xbfa   :  { %v1108_v32 = vmul.f32 1.442695, %v1101_v46 }
 0xbfb   :  { %2621 = vpow2.f32 %v1102_v45 }
 0xbfc   :  { %2623 = vpow2.f32 %v1104_v3 }
 0xbfd   :  { %2625 = vpow2.f32 %v1106_v48 }
 0xbfe   :  { %2627 = vpow2.f32 %v1108_v32 }
 0xc01   :  { %v3495_v5 = vpop.eup %2621 }
 0xc02   :  { %v3497_v16 = vpop.eup %2623  ;;  %1115 = vperm.xlu1 %2544, %v3495_v5  }
 0xc03   :  { %v3500_v49 = vpop.eup %2625  ;;  %1118 = vperm.xlu0 %2545, %v3497_v16  }
 0xc04   :  { %1121 = vperm.xlu2 %2546, %v3500_v49   ;;  %v3504_v7 = vpop.eup %2627 }
 0xc0a   :  { %1124 = vperm.xlu1 %2544, %v3504_v7  }
 0xc5e   :  { %v1122_v34 = vpop.permute.xlu2 %1121 }
 0xc5f   :  { %v1128_v36 = vperm.slane %v1122_v34, %v3211_v56 }
 0xc74   :  { %v1116_v51 = vpop.permute.xlu1 %1115 }
 0xc75   :  { %v1119_v10 = vpop.permute.xlu0 %1118  ;;  %v1126_v21 = vperm.slane %v1116_v51, %v3211_v56 }
 0xc76   :  { %v1127_v18 = vperm.slane %v1119_v10, %v3211_v56 }
 0xc78   :  { %v1130_v13 = vsel %vm347_vm1, %v1127_v18, %v1126_v21 }
 0xc79   :  { %v1131_v28 = vsel %vm349_vm2, %v1128_v36, %v1130_v13 }
 0xc7c   :  { %v1125_v44 = vpop.permute.xlu1 %1124 }
 0xc7d   :  { %v1129_v17 = vperm.slane %v1125_v44, %v3211_v56 }
 0xc7f   :  { %v1132_v27 = vsel %vm351_vm3, %v1129_v17, %v1131_v28 }
 0xc80   :  { %v1134_v23 = vsel %vm3879_vm14, %v1132_v27, 0.0 }
 0xc81   :  { %1135 = vadd.xlane.f32.xlu0 %v1134_v23 }
 0xcf4   :  { %v1136_v39 = vpop.xlane.xlu0 %1135 }
 0xcf5   :  { %v1138_v31 = vperm.slane %v1136_v39, 0  ;;  %v1139_v29 = vperm.slane %v1136_v39, 1  ;;  %v1140_v30 = vperm.slane %v1136_v39, 2  ;;  %v1141_v40 = vperm.slane %v1136_v39, 3 }
 0xcf7   :  { %2629 = vrcp.f32 %v1138_v31  ;;  %v1170_v53 = vand.u32 2147483647, %v1139_v29  ;;  %v1172_v54 = vand.u32 2147483648, %v1139_v29  ;;  %v1155_v59 = vand.u32 2147483647, %v1138_v31 }
 0xcf8   :  { %2631 = vrcp.f32 %v1139_v29  ;;  %vm1166_vm6 = vweird.f32 %v1139_v29  ;;  %v1157_v60 = vand.u32 2147483648, %v1138_v31  ;;  %vm1151_vm15 = vweird.f32 %v1138_v31 }
 0xcf9   :  { %2633 = vrcp.f32 %v1140_v30  ;;  %vm3515_vm10 = vcmp.eq.f32.partialorder %v1170_v53, 8.507059e+37  ;;  %v1173_v11 = vor.u32 1.1754944e-38, %v1172_v54  ;;  %vm1156_vm4 = vcmp.eq.f32.partialorder %v1155_v59, 8.507059e+37 }
 0xcfa   :  { %2635 = vrcp.f32 %v1141_v40  ;;  %v1158_v3 = vor.u32 1.1754944e-38, %v1157_v60  ;;  %v1202_v46 = vand.u32 2147483648, %v1141_v40  ;;  %v1187_v10 = vand.u32 2147483648, %v1140_v30 }
 0xcfb   :  { %vm1181_vm14 = vweird.f32 %v1140_v30  ;;  %v1185_v44 = vand.u32 2147483647, %v1140_v30  ;;  %v1200_v28 = vand.u32 2147483647, %v1141_v40 }
 0xcfc   :  { %v1188_v39 = vor.u32 1.1754944e-38, %v1187_v10 }
 0xcfd   :  { %v2630_v41 = vpop.eup %2629 }
 0xcfe   :  { %v2632_v42 = vpop.eup %2631  ;;  %v1147_v25 = vmul.f32 %v2630_v41, %v1138_v31  ;;  %vm1152_vm5 = vweird.f32 %v2630_v41  ;;  %v1203_v31 = vor.u32 1.1754944e-38, %v1202_v46 }
 0xcff   :  { %v2634_v50 = vpop.eup %2633  ;;  %v1162_v9 = vmul.f32 %v2632_v42, %v1139_v29  ;;  %vm1167_vm7 = vweird.f32 %v2632_v42  ;;  %vm1153_vm8 = vmor %vm1151_vm15, %vm1152_vm5  ;;  %vm1196_vm15 = vweird.f32 %v1141_v40 }
 0xd00   :  { %v2636_v12 = vpop.eup %2635  ;;  %v1148_v55 = vsub.f32 1.0, %v1147_v25  ;;  %v1177_v38 = vmul.f32 %v2634_v50, %v1140_v30  ;;  %vm1168_vm11 = vmor %vm1166_vm6, %vm1167_vm7  ;;  %vm1182_vm12 = vweird.f32 %v2634_v50  ;;  %vm1186_vm7 = vcmp.eq.f32.partialorder %v1185_v44, 8.507059e+37  ;;  %v3528_v25 = vld [vmem:[#allocation8 + $0x8] sm:$0xff]  ;;  %v3550_v44 = vld [vmem:[#allocation12 + $0x10] sm:$0xff] }
 0xd01   :  { %v1163_v52 = vsub.f32 1.0, %v1162_v9  ;;  %v1192_v61 = vmul.f32 %v2636_v12, %v1141_v40  ;;  %vm1197_vm13 = vweird.f32 %v2636_v12  ;;  %vm1183_vm6 = vmor %vm1181_vm14, %vm1182_vm12  ;;  %v1259_v40 = vld [vmem:[#allocation3 + $0x8] sm:$0xf] }
 0xd02   :  { %v1149_v63 = vmul.f32 %v2630_v41, %v1148_v55  ;;  %v1178_v0 = vsub.f32 1.0, %v1177_v38  ;;  %vm1198_vm5 = vmor %vm1196_vm15, %vm1197_vm13  ;;  %2507 = vmatmul.msk.f32.vlgmr.msrb.gmra.mxu2 %vm528_vm9, %v1259_v40  ;;  %vm3882_vm13 = vcmask 60416  }
 0xd03   :  { %v1164_v1 = vmul.f32 %v2632_v42, %v1163_v52  ;;  %v1193_v15 = vsub.f32 1.0, %v1192_v61  ;;  %1742 = vmatpush.msrb.mxu2 %v3314_v2  ;;  %v3539_v61 = vld [vmem:[#allocation8 + $0x10] sm:$0xff]  ;;  %vm3883_vm14 = vmmov %vm3882_vm13 }
 0xd04   :  { %v1150_v22 = vadd.f32 %v2630_v41, %v1149_v63  ;;  %v1179_v24 = vmul.f32 %v2634_v50, %v1178_v0 }
 0xd05   :  { %v1165_v45 = vadd.f32 %v2632_v42, %v1164_v1  ;;  %v1194_v48 = vmul.f32 %v2636_v12, %v1193_v15  ;;  %1743 = vmatpush.msrb.mxu2 %v3318_v4 }
 0xd06   :  { %v1154_v32 = vsel %vm1153_vm8, %v2630_v41, %v1150_v22  ;;  %v1180_v51 = vadd.f32 %v2634_v50, %v1179_v24 }
 0xd07   :  { %v1169_v18 = vsel %vm1168_vm11, %v2632_v42, %v1165_v45  ;;  %v1159_v21 = vsel %vm1156_vm4, %v1158_v3, %v1154_v32  ;;  %v1195_v34 = vadd.f32 %v2636_v12, %v1194_v48  ;;  %vm1201_vm4 = vcmp.eq.f32.partialorder %v1200_v28, 8.507059e+37  ;;  %1744 = vmatpush.msrb.mxu2 %v3324_v6  ;;  %v3556_v28 = vld [vmem:[#allocation12] sm:$0xff] }
 0xd08   :  { %v1174_v13 = vsel %vm3515_vm10, %v1173_v11, %v1169_v18  ;;  %v1160_v36 = vmul.f32 %v3495_v5, %v1159_v21  ;;  %v1184_v27 = vsel %vm1183_vm6, %v2634_v50, %v1180_v51 }
 0xd09   :  { %v1175_v17 = vmul.f32 %v3497_v16, %v1174_v13  ;;  %v1199_v23 = vsel %vm1198_vm5, %v2636_v12, %v1195_v34  ;;  %v1189_v29 = vsel %vm1186_vm7, %v1188_v39, %v1184_v27  ;;  %1745 = vmatpush.msrb.mxu2 %v3331_v8 }
 0xd0a   :  { %1208 = vperm.xlu1 %2544, %v1160_v36   ;;  %v1204_v41 = vsel %vm1201_vm4, %v1203_v31, %v1199_v23  ;;  %v1190_v5 = vmul.f32 %v3500_v49, %v1189_v29  ;;  %v3547_v36 = vld [vmem:[#allocation12 + $0x18] sm:$0xff]  ;;  %v3562_v31 = vld [vmem:[%s3865_s11] ss:$0 sm:$0xff] }
 0xd0b   :  { %1213 = vperm.xlu2 %2546, %v1175_v17   ;;  %v1205_v30 = vmul.f32 %v3504_v7, %v1204_v41  ;;  %v3553_v17 = vld [vmem:[#allocation12 + $0x8] sm:$0xff]  ;;  %v3568_v41 = vld [vmem:[%s3866_s12] ss:$0 sm:$0xff] }
 0xd12   :  { %1218 = vperm.xlu1 %2544, %v1190_v5  }
 0xd13   :  { %1223 = vperm.xlu2 %2546, %v1205_v30  }
 0xd65   :  { %v1214_v16 = vpop.permute.xlu2 %1213 }
 0xd66   :  { %v1227_v50 = vmul.f32 %v3528_v25, %v1214_v16 }
 0xd68   :  { %v1237_v49 = vsel %vm187_vm0, %v1227_v50, 0.0 }
 0xd69   :  { %v1238_v12 = vrot.slane %v1237_v49, 4 }
 0xd6b   :  { %v1239_v38 = vadd.f32 %v1238_v12, %v1237_v49 }
 0xd6d   :  { %v1224_v42 = vpop.permute.xlu2 %1223  ;;  %v1240_v6 = vrot.slane %v1239_v38, 2 }
 0xd6e   :  { %v1229_v9 = vmul.f32 %v3436_v62, %v1224_v42 }
 0xd70   :  { %v1251_v7 = vsel %vm187_vm0, %v1229_v9, 0.0 }
 0xd71   :  { %v1252_v54 = vrot.slane %v1251_v7, 4 }
 0xd73   :  { %v1253_v52 = vadd.f32 %v1252_v54, %v1251_v7 }
 0xd75   :  { %v1254_v63 = vrot.slane %v1253_v52, 2 }
 0xd77   :  { %v1255_v11 = vadd.f32 %v1254_v63, %v1253_v52  ;;  %v2744_v63 = vld [vmem:[#allocation15 + $0x38] sm:$0xff] }
 0xd79   :  { %v1256_v48 = vrot.slane %v1255_v11, 1 }
 0xd7b   :  { %v1257_v18 = vadd.f32 %v1256_v48, %v1255_v11  ;;  %v2750_v11 = vld [vmem:[#allocation15 + $0x8] sm:$0xff] }
 0xd7c   :  { %v1209_v53 = vpop.permute.xlu1 %1208 }
 0xd7d   :  { %v1226_v2 = vmul.f32 %v3423_v37, %v1209_v53  ;;  %v1241_v37 = vadd.f32 %v1240_v6, %v1239_v38 }
 0xd7f   :  { %v1230_v55 = vsel %vm187_vm0, %v1226_v2, 0.0  ;;  %v1242_v45 = vrot.slane %v1241_v37, 1 }
 0xd80   :  { %v1231_v59 = vrot.slane %v1230_v55, 4 }
 0xd81   :  { %v1243_v51 = vadd.f32 %v1242_v45, %v1241_v37  ;;  %v2748_v37 = vld [vmem:[#allocation15 + $0x18] sm:$0xff] }
 0xd82   :  { %v1232_v4 = vadd.f32 %v1231_v59, %v1230_v55 }
 0xd84   :  { %v1233_v62 = vrot.slane %v1232_v4, 2  ;;  %v1219_v60 = vpop.permute.xlu1 %1218 }
 0xd85   :  { %v1228_v8 = vmul.f32 %v3539_v61, %v1219_v60  ;;  %v1280_v27 = vpop.f32.mrf.mxu2 }
 0xd86   :  { %v1234_v0 = vadd.f32 %v1233_v62, %v1232_v4 }
 0xd87   :  { %v1244_v1 = vsel %vm187_vm0, %v1228_v8, 0.0 }
 0xd88   :  { %v1245_v14 = vrot.slane %v1244_v1, 4  ;;  %v1235_v22 = vrot.slane %v1234_v0, 1 }
 0xd8a   :  { %v1246_v15 = vadd.f32 %v1245_v14, %v1244_v1  ;;  %v1236_v46 = vadd.f32 %v1235_v22, %v1234_v0  ;;  %v3577_v0 = vld [vmem:[#allocation15 + $0x30] sm:$0xff]  ;;  %v2746_v1 = vld [vmem:[#allocation15 + $0x28] sm:$0xff]  ;;  %v3580_v14 = vld [vmem:[#allocation15 + $0x20] sm:$0xff] }
 0xd8b   :  { %v3586_v22 = vld [vmem:[#allocation15] sm:$0xff] }
 0xd8c   :  { %v1247_v24 = vrot.slane %v1246_v15, 2  ;;  %v1287_v21 = vsel %vm347_vm1, %v1243_v51, %v1236_v46 }
 0xd8e   :  { %v1248_v3 = vadd.f32 %v1247_v24, %v1246_v15  ;;  %v3583_v15 = vld [vmem:[#allocation15 + $0x10] sm:$0xff] }
 0xd90   :  { %v1249_v32 = vrot.slane %v1248_v3, 1 }
 0xd92   :  { %v1250_v10 = vadd.f32 %v1249_v32, %v1248_v3 }
 0xd94   :  { %v1288_v34 = vsel %vm349_vm2, %v1250_v10, %v1287_v21 }
 0xd95   :  { %v1289_v13 = vsel %vm351_vm3, %v1257_v18, %v1288_v34 }
 0xd96   :  { %2508 = vmatmul.msk.f32.vlgmr.msrb.gmra.mxu1 %vm187_vm0, %v1289_v13 }
 0xd97   :  { %2022 = vmatpush.msrb.mxu1 %v3547_v36 }
 0xd99   :  { %2023 = vmatpush.msrb.mxu1 %v3550_v44 }
 0xd9b   :  { %2024 = vmatpush.msrb.mxu1 %v3553_v17 }
 0xd9d   :  { %2025 = vmatpush.msrb.mxu1 %v3556_v28 }
 0xe13   :  { %v1309_v23 = vpop.f32.mrf.mxu1 }
 0xe14   :  { %v1310_v39 = vadd.f32 %v1309_v23, %v1280_v27 }
 0xe16   :  { %v1312_v29 = vadd.f32 %v3562_v31, %v1310_v39 }
 0xe18   :  { %v1313_v5 = vadd.f32 %v3568_v41, %v1312_v29 }
 0xe1a   :  { %v2509_v30 = vmul.f32 -1.442695, %v1313_v5 }
 0xe1c   :  { %2637 = vpow2.f32 %v2509_v30 }
 0xe22   :  { %v2638_v16 = vpop.eup %2637 }
 0xe23   :  { %v1317_v40 = vadd.f32 1.0, %v2638_v16 }
 0xe25   :  { %2639 = vrcp.f32 %v1317_v40  ;;  %v1329_v49 = vand.u32 2147483648, %v1317_v40  ;;  %v1327_v53 = vand.u32 2147483647, %v1317_v40  ;;  %vm1323_vm8 = vweird.f32 %v1317_v40 }
 0xe27   :  { %v1330_v2 = vor.u32 1.1754944e-38, %v1329_v49  ;;  %vm1328_vm12 = vcmp.eq.f32.partialorder %v1327_v53, 8.507059e+37 }
 0xe2b   :  { %v2640_v42 = vpop.eup %2639 }
 0xe2c   :  { %v1319_v50 = vmul.f32 %v2640_v42, %v1317_v40  ;;  %vm1324_vm10 = vweird.f32 %v2640_v42 }
 0xe2d   :  { %vm1325_vm11 = vmor %vm1323_vm8, %vm1324_vm10 }
 0xe2e   :  { %v1320_v9 = vsub.f32 1.0, %v1319_v50 }
 0xe30   :  { %v1321_v7 = vmul.f32 %v2640_v42, %v1320_v9 }
 0xe32   :  { %v1322_v12 = vadd.f32 %v2640_v42, %v1321_v7 }
 0xe34   :  { %v1326_v54 = vsel %vm1325_vm11, %v2640_v42, %v1322_v12 }
 0xe35   :  { %v1331_v55 = vsel %vm1328_vm12, %v1330_v2, %v1326_v54 }
 0xe36   :  { %v1333_v59 = vmul.f32 %v1331_v55, %v3309_v57  ;;  %v1340_v62 = vsub.f32 1.0, %v1331_v55 }
 0xe38   :  { %1335 = vrot.lane.b32.xlu1 %v1333_v59, %s3021_s27 }
 0xeaa   :  { %v1336_v38 = vpop.permute.xlu1 %1335 }
 0xeab   :  { %v1338_v4 = vadd.f32 %v1336_v38, %v1312_v29 }
 0xead   :  { %2641 = vtanh.f32 %v1338_v4 }
 0xeb3   :  { %v2642_v52 = vpop.eup %2641 }
 0xeb4   :  { %1342 = vrot.lane.b32.xlu2 %v2642_v52, %s3030_s23 }
 0xf0e   :  { %v1343_v60 = vpop.permute.xlu2 %1342 }
 0xf0f   :  { %v1345_v6 = vmul.f32 %v1343_v60, %v1340_v62 }
 0xf11   :  { %1347 = vrot.lane.b32.xlu1 %v1345_v6, %s3030_s23 }
 0xf83   :  { %v1348_v8 = vpop.permute.xlu1 %1347 }
 0xf84   :  { %2510 = vmatmul.msk.f32.vlgmr.msrb.gmra.mxu3 %vm187_vm0, %v1348_v8  ;;  %2511 = vmatmul.msk.f32.vlgmr.msra.gmra.mxu2 %vm187_vm0, %v1348_v8 }
 0xf85   :  { %2101 = vmatpush.msra.mxu2 %v2744_v63  ;;  %2081 = vmatpush.msrb.mxu3 %v3577_v0 }
 0xf87   :  { %2102 = vmatpush.msra.mxu2 %v2746_v1  ;;  %2082 = vmatpush.msrb.mxu3 %v3580_v14 }
 0xf89   :  { %2103 = vmatpush.msra.mxu2 %v2748_v37  ;;  %2083 = vmatpush.msrb.mxu3 %v3583_v15 }
 0xf8b   :  { %2104 = vmatpush.msra.mxu2 %v2750_v11  ;;  %2084 = vmatpush.msrb.mxu3 %v3586_v22 }
0x1007   :  { %v1368_v24 = vpop.f32.mrf.mxu3  ;;  %v1388_v45 = vpop.f32.mrf.mxu2 }
0x1008   :  { %v1369_v3 = vadd.f32 %v1368_v24, %v3365_v47  ;;  %v1389_v48 = vadd.f32 %v1388_v45, %v3362_v20 }
0x100a   :  { %1392 = vst [vmem:[#allocation17 + $0x8] sm:$0xf] %v1369_v3  ;;  %v1394_v46 = vrot.slane %v1389_v48, 1  ;;  %v1395_v32 = vrot.slane %v1389_v48, 2  ;;  %v1396_v51 = vrot.slane %v1389_v48, 3  ;;  %v1397_v10 = vperm.slane %v1389_v48, 0 }
0x100c   :  { %v1398_v18 = vperm.slane %v1394_v46, 0  ;;  %v1399_v21 = vperm.slane %v1395_v32, 0  ;;  %v1400_v34 = vperm.slane %v1396_v51, 0  ;;  %v1405_v13 = vadd.f32 %v1397_v10, %v3186_v19 }
0x100e   :  { %2643 = vtanh.f32 %v1405_v13  ;;  %v1407_v27 = vadd.f32 %v1399_v21, %v3199_v35  ;;  %v1406_v23 = vadd.f32 %v1398_v18, %v3189_v26  ;;  %v1408_v39 = vadd.f32 %v1400_v34, %v3204_v43 }
0x1010   :  { %2645 = vtanh.f32 %v1407_v27 }
0x1011   :  { %2647 = vtanh.f32 %v1406_v23 }
0x1012   :  { %2649 = vtanh.f32 %v1408_v39 }
0x1014   :  { %v2644_v29 = vpop.eup %2643 }
0x1015   :  { %v1413_v5 = vmul.f32 %v3473_v33, %v2644_v29 }
0x1016   :  { %v2646_v30 = vpop.eup %2645 }
0x1017   :  { %v2648_v16 = vpop.eup %2647  ;;  %v1417_v40 = vsel %vm187_vm0, %v1413_v5, 0.0  ;;  %v1415_v42 = vmul.f32 %v3473_v33, %v2646_v30 }
0x1018   :  { %1418 = vadd.xlane.f32.xlu2 %v1417_v40  ;;  %v1414_v50 = vmul.f32 %v3473_v33, %v2648_v16  ;;  %v2650_v49 = vpop.eup %2649 }
0x1019   :  { %v1423_v9 = vsel %vm187_vm0, %v1415_v42, 0.0  ;;  %v1416_v53 = vmul.f32 %v3473_v33, %v2650_v49 }
0x101a   :  { %1424 = vadd.xlane.f32.xlu0 %v1423_v9  ;;  %v1420_v7 = vsel %vm187_vm0, %v1414_v50, 0.0 }
0x101b   :  { %1421 = vadd.xlane.f32.xlu1 %v1420_v7  ;;  %v1426_v12 = vsel %vm187_vm0, %v1416_v53, 0.0 }
0x1022   :  { %1427 = vadd.xlane.f32.xlu0 %v1426_v12 }
0x108b   :  { %v1419_v2 = vpop.xlane.xlu2 %1418 }
0x108c   :  { %v1429_v38 = vadd.f32 %v1419_v2, %v3213_v58 }
0x108d   :  { %v1425_v54 = vpop.xlane.xlu0 %1424 }
0x108e   :  { %v1422_v55 = vpop.xlane.xlu1 %1421  ;;  %v1431_v4 = vadd.f32 %v1425_v54, %v3213_v58  ;;  %v1437_v62 = vperm.slane %v1429_v38, %v3211_v56 }
0x108f   :  { %v1430_v59 = vadd.f32 %v1422_v55, %v3213_v58 }
0x1090   :  { %v1439_v60 = vperm.slane %v1431_v4, %v3211_v56 }
0x1091   :  { %v1438_v52 = vperm.slane %v1430_v59, %v3211_v56 }
0x1093   :  { %v1441_v8 = vsel %vm347_vm1, %v1438_v52, %v1437_v62 }
0x1094   :  { %v1442_v1 = vsel %vm349_vm2, %v1439_v60, %v1441_v8 }
0x1095   :  { %v1428_v6 = vpop.xlane.xlu0 %1427 }
0x1096   :  { %v1432_v33 = vadd.f32 %v1428_v6, %v3213_v58 }
0x1098   :  { %v1440_v63 = vperm.slane %v1432_v33, %v3211_v56 }
0x109a   :  { %v1443_v37 = vsel %vm351_vm3, %v1440_v63, %v1442_v1 }
0x109b   :  { %v1445_v11 = vsel %vm3882_vm13, %v1443_v37, -inf }
0x109c   :  { %1446 = vmax.xlane.f32.xlu0 %v1445_v11 }
0x110f   :  { %v1447_v24 = vpop.xlane.xlu0 %1446 }
0x1110   :  { %v1449_v45 = vperm.slane %v1447_v24, 0  ;;  %v1450_v3 = vperm.slane %v1447_v24, 1  ;;  %v1451_v48 = vperm.slane %v1447_v24, 2  ;;  %v1452_v46 = vperm.slane %v1447_v24, 3 }
0x1112   :  { %v1457_v32 = vsub.f32 %v1429_v38, %v1449_v45  ;;  %v1458_v51 = vsub.f32 %v1430_v59, %v1450_v3  ;;  %v1459_v10 = vsub.f32 %v1431_v4, %v1451_v48  ;;  %v1460_v13 = vsub.f32 %v1432_v33, %v1452_v46 }
0x1114   :  { %v1461_v18 = vmul.f32 1.442695, %v1457_v32  ;;  %v1463_v21 = vmul.f32 1.442695, %v1458_v51  ;;  %v1465_v34 = vmul.f32 1.442695, %v1459_v10 }
0x1115   :  { %v1467_v27 = vmul.f32 1.442695, %v1460_v13 }
0x1116   :  { %2651 = vpow2.f32 %v1461_v18 }
0x1117   :  { %2653 = vpow2.f32 %v1463_v21 }
0x1118   :  { %2655 = vpow2.f32 %v1465_v34 }
0x1119   :  { %2657 = vpow2.f32 %v1467_v27 }
0x111c   :  { %v3615_v23 = vpop.eup %2651 }
0x111d   :  { %v3617_v39 = vpop.eup %2653  ;;  %1474 = vperm.xlu0 %2545, %v3615_v23  }
0x111e   :  { %v3620_v29 = vpop.eup %2655  ;;  %1477 = vperm.xlu2 %2546, %v3617_v39  }
0x111f   :  { %1480 = vperm.xlu1 %2544, %v3620_v29   ;;  %v3624_v5 = vpop.eup %2657 }
0x1125   :  { %1483 = vperm.xlu0 %2545, %v3624_v5  }
0x1178   :  { %v1478_v16 = vpop.permute.xlu2 %1477 }
0x1179   :  { %v1486_v50 = vperm.slane %v1478_v16, %v3211_v56 }
0x118f   :  { %v1475_v30 = vpop.permute.xlu0 %1474 }
0x1190   :  { %v1485_v42 = vperm.slane %v1475_v30, %v3211_v56 }
0x1191   :  { %v1481_v40 = vpop.permute.xlu1 %1480 }
0x1192   :  { %v1487_v9 = vperm.slane %v1481_v40, %v3211_v56  ;;  %v1489_v49 = vsel %vm347_vm1, %v1486_v50, %v1485_v42 }
0x1194   :  { %v1490_v12 = vsel %vm349_vm2, %v1487_v9, %v1489_v49 }
0x1197   :  { %v1484_v7 = vpop.permute.xlu0 %1483 }
0x1198   :  { %v1488_v53 = vperm.slane %v1484_v7, %v3211_v56 }
0x119a   :  { %v1491_v2 = vsel %vm351_vm3, %v1488_v53, %v1490_v12 }
0x119b   :  { %v1493_v54 = vsel %vm3883_vm14, %v1491_v2, 0.0 }
0x119c   :  { %1494 = vadd.xlane.f32.xlu0 %v1493_v54 }
0x120f   :  { %v1495_v55 = vpop.xlane.xlu0 %1494 }
0x1210   :  { %v1497_v59 = vperm.slane %v1495_v55, 0  ;;  %v1498_v38 = vperm.slane %v1495_v55, 1  ;;  %v1499_v4 = vperm.slane %v1495_v55, 2  ;;  %v1500_v52 = vperm.slane %v1495_v55, 3 }
0x1212   :  { %2659 = vrcp.f32 %v1497_v59  ;;  %v1529_v63 = vand.u32 2147483647, %v1498_v38  ;;  %v1531_v37 = vand.u32 2147483648, %v1498_v38  ;;  %v1514_v24 = vand.u32 2147483647, %v1497_v59 }
0x1213   :  { %2661 = vrcp.f32 %v1498_v38  ;;  %vm1525_vm15 = vweird.f32 %v1498_v38  ;;  %v1516_v48 = vand.u32 2147483648, %v1497_v59  ;;  %vm1510_vm6 = vweird.f32 %v1497_v59 }
0x1214   :  { %2663 = vrcp.f32 %v1499_v4  ;;  %vm3635_vm4 = vcmp.eq.f32.partialorder %v1529_v63, 8.507059e+37  ;;  %v1532_v34 = vor.u32 1.1754944e-38, %v1531_v37  ;;  %vm1515_vm10 = vcmp.eq.f32.partialorder %v1514_v24, 8.507059e+37 }
0x1215   :  { %2665 = vrcp.f32 %v1500_v52  ;;  %v1517_v16 = vor.u32 1.1754944e-38, %v1516_v48  ;;  %v1561_v42 = vand.u32 2147483648, %v1500_v52  ;;  %v1546_v49 = vand.u32 2147483648, %v1499_v4 }
0x1216   :  { %vm1540_vm14 = vweird.f32 %v1499_v4  ;;  %v1544_v55 = vand.u32 2147483647, %v1499_v4 }
0x1218   :  { %v2660_v62 = vpop.eup %2659 }
0x1219   :  { %v2662_v60 = vpop.eup %2661  ;;  %v1506_v6 = vmul.f32 %v2660_v62, %v1497_v59  ;;  %vm1511_vm5 = vweird.f32 %v2660_v62 }
0x121a   :  { %v2664_v33 = vpop.eup %2663  ;;  %v1521_v8 = vmul.f32 %v2662_v60, %v1498_v38  ;;  %vm1526_vm7 = vweird.f32 %v2662_v60  ;;  %vm1512_vm8 = vmor %vm1510_vm6, %vm1511_vm5  ;;  %vm1555_vm6 = vweird.f32 %v1500_v52  ;;  %v1559_v38 = vand.u32 2147483647, %v1500_v52 }
0x121b   :  { %v2666_v1 = vpop.eup %2665  ;;  %v1507_v11 = vsub.f32 1.0, %v1506_v6  ;;  %v1536_v45 = vmul.f32 %v2664_v33, %v1499_v4  ;;  %vm1527_vm11 = vmor %vm1525_vm15, %vm1526_vm7  ;;  %vm1541_vm12 = vweird.f32 %v2664_v33  ;;  %v1547_v6 = vor.u32 1.1754944e-38, %v1546_v49 }
0x121c   :  { %v1522_v3 = vsub.f32 1.0, %v1521_v8  ;;  %v1551_v46 = vmul.f32 %v2666_v1, %v1500_v52  ;;  %vm1556_vm13 = vweird.f32 %v2666_v1  ;;  %vm1542_vm15 = vmor %vm1540_vm14, %vm1541_vm12  ;;  %v1562_v8 = vor.u32 1.1754944e-38, %v1561_v42  ;;  %v1618_v52 = vld [vmem:[#allocation3 + $0xc] sm:$0xf]  ;;  %v3655_v42 = vld [vmem:[#allocation8 + $0x18] sm:$0xff] }
0x121d   :  { %v1508_v32 = vmul.f32 %v2660_v62, %v1507_v11  ;;  %v1537_v51 = vsub.f32 1.0, %v1536_v45  ;;  %vm1557_vm5 = vmor %vm1555_vm6, %vm1556_vm13  ;;  %vm1545_vm7 = vcmp.eq.f32.partialorder %v1544_v55, 8.507059e+37  ;;  %v3646_v11 = vld [vmem:[#allocation8] sm:$0xff]  ;;  %2512 = vmatmul.msk.f32.vlgmr.msrb.gmra.mxu0 %vm528_vm9, %v1618_v52  ;;  %vm3886_vm13 = vcmask 60416  }
0x121e   :  { %v1523_v10 = vmul.f32 %v2662_v60, %v1522_v3  ;;  %v1552_v21 = vsub.f32 1.0, %v1551_v46  ;;  %v2754_v3 = vld [vmem:[#allocation14] sm:$0xff]  ;;  %vm3887_vm14 = vmmov %vm3886_vm13 }
0x121f   :  { %v1509_v13 = vadd.f32 %v2660_v62, %v1508_v32  ;;  %v1538_v27 = vmul.f32 %v2664_v33, %v1537_v51 }
0x1220   :  { %v1524_v30 = vadd.f32 %v2662_v60, %v1523_v10  ;;  %v1553_v40 = vmul.f32 %v2666_v1, %v1552_v21 }
0x1221   :  { %v1513_v50 = vsel %vm1512_vm8, %v2660_v62, %v1509_v13  ;;  %v1539_v9 = vadd.f32 %v2664_v33, %v1538_v27 }
0x1222   :  { %v1528_v7 = vsel %vm1527_vm11, %v2662_v60, %v1524_v30  ;;  %v1518_v53 = vsel %vm1515_vm10, %v1517_v16, %v1513_v50  ;;  %v1554_v12 = vadd.f32 %v2666_v1, %v1553_v40  ;;  %vm1560_vm10 = vcmp.eq.f32.partialorder %v1559_v38, 8.507059e+37 }
0x1223   :  { %v1533_v2 = vsel %vm3635_vm4, %v1532_v34, %v1528_v7  ;;  %v1519_v54 = vmul.f32 %v3615_v23, %v1518_v53  ;;  %v1543_v62 = vsel %vm1542_vm15, %v2664_v33, %v1539_v9 }
0x1224   :  { %v1534_v59 = vmul.f32 %v3617_v39, %v1533_v2  ;;  %v1558_v60 = vsel %vm1557_vm5, %v2666_v1, %v1554_v12  ;;  %v1548_v63 = vsel %vm1545_vm7, %v1547_v6, %v1543_v62  ;;  %v2753_v1 = vld [vmem:[#allocation14 + $0x8] sm:$0xff] }
0x1225   :  { %1567 = vperm.xlu2 %2546, %v1519_v54   ;;  %v1563_v37 = vsel %vm1560_vm10, %v1562_v8, %v1558_v60  ;;  %v1549_v23 = vmul.f32 %v3620_v29, %v1548_v63  ;;  %2354 = vmatpush.msrb.mxu0 %v2753_v1 }
0x1226   :  { %1572 = vperm.xlu1 %2544, %v1534_v59   ;;  %v1564_v4 = vmul.f32 %v3624_v5, %v1563_v37 }
0x1227   :  { %2355 = vmatpush.msrb.mxu0 %v2754_v3 }
0x122d   :  { %1577 = vperm.xlu2 %2546, %v1549_v23  }
0x122e   :  { %1582 = vperm.xlu1 %2544, %v1564_v4  }
0x127f   :  { %v1568_v39 = vpop.permute.xlu2 %1567 }
0x1280   :  { %v1585_v33 = vmul.f32 %v3646_v11, %v1568_v39 }
0x1282   :  { %v1589_v29 = vsel %vm187_vm0, %v1585_v33, 0.0 }
0x1283   :  { %v1590_v5 = vrot.slane %v1589_v29, 4 }
0x1285   :  { %v1591_v10 = vadd.f32 %v1590_v5, %v1589_v29 }
0x1287   :  { %v1578_v24 = vpop.permute.xlu2 %1577  ;;  %v1592_v13 = vrot.slane %v1591_v10, 2 }
0x1288   :  { %v1587_v45 = vmul.f32 %v3539_v61, %v1578_v24 }
0x1289   :  { %v1593_v9 = vadd.f32 %v1592_v13, %v1591_v10 }
0x128a   :  { %v1603_v48 = vsel %vm187_vm0, %v1587_v45, 0.0 }
0x128b   :  { %v1604_v32 = vrot.slane %v1603_v48, 4  ;;  %v1594_v2 = vrot.slane %v1593_v9, 1 }
0x128d   :  { %v1605_v34 = vadd.f32 %v1604_v32, %v1603_v48  ;;  %v1595_v62 = vadd.f32 %v1594_v2, %v1593_v9 }
0x128f   :  { %v1606_v40 = vrot.slane %v1605_v34, 2 }
0x1291   :  { %v1607_v12 = vadd.f32 %v1606_v40, %v1605_v34 }
0x1293   :  { %v1608_v38 = vrot.slane %v1607_v12, 1 }
0x1295   :  { %v1609_v63 = vadd.f32 %v1608_v38, %v1607_v12 }
0x1298   :  { %v1573_v46 = vpop.permute.xlu1 %1572 }
0x1299   :  { %v1586_v51 = vmul.f32 %v3528_v25, %v1573_v46 }
0x129a   :  { %v1639_v39 = vpop.f32.mrf.mxu0 }
0x129b   :  { %v1596_v18 = vsel %vm187_vm0, %v1586_v51, 0.0 }
0x129c   :  { %v1597_v21 = vrot.slane %v1596_v18, 4 }
0x129e   :  { %v1598_v27 = vadd.f32 %v1597_v21, %v1596_v18 }
0x12a0   :  { %v1599_v30 = vrot.slane %v1598_v27, 2  ;;  %v1583_v16 = vpop.permute.xlu1 %1582 }
0x12a1   :  { %v1588_v50 = vmul.f32 %v3655_v42, %v1583_v16 }
0x12a2   :  { %v1600_v49 = vadd.f32 %v1599_v30, %v1598_v27 }
0x12a3   :  { %v1610_v7 = vsel %vm187_vm0, %v1588_v50, 0.0 }
0x12a4   :  { %v1601_v53 = vrot.slane %v1600_v49, 1  ;;  %v1611_v25 = vrot.slane %v1610_v7, 4 }
0x12a6   :  { %v1612_v54 = vadd.f32 %v1611_v25, %v1610_v7  ;;  %v1602_v55 = vadd.f32 %v1601_v53, %v1600_v49 }
0x12a8   :  { %v1613_v59 = vrot.slane %v1612_v54, 2  ;;  %v1646_v8 = vsel %vm347_vm1, %v1602_v55, %v1595_v62  ;;  %v3688_v62 = vld [vmem:[%s3861_s7] ss:$0 sm:$0xff] }
0x12a9   :  { %v1647_v23 = vsel %vm349_vm2, %v1609_v63, %v1646_v8 }
0x12aa   :  { %v1614_v60 = vadd.f32 %v1613_v59, %v1612_v54 }
0x12ac   :  { %v1615_v6 = vrot.slane %v1614_v60, 1 }
0x12ae   :  { %v1616_v37 = vadd.f32 %v1615_v6, %v1614_v60 }
0x12b0   :  { %v1648_v4 = vsel %vm351_vm3, %v1616_v37, %v1647_v23 }
0x12b1   :  { %2513 = vmatmul.msk.f32.vlgmr.msra.gmra.mxu1 %vm187_vm0, %v1648_v4 }
0x12b2   :  { %2381 = vmatpush.msra.mxu1 %v3547_v36 }
0x12b4   :  { %2382 = vmatpush.msra.mxu1 %v3550_v44 }
0x12b6   :  { %2383 = vmatpush.msra.mxu1 %v3553_v17 }
0x12b8   :  { %2384 = vmatpush.msra.mxu1 %v3556_v28 }
0x132e   :  { %v1668_v52 = vpop.f32.mrf.mxu1 }
0x132f   :  { %v1669_v33 = vadd.f32 %v1668_v52, %v1639_v39 }
0x1331   :  { %v1671_v24 = vadd.f32 %v3562_v31, %v1669_v33 }
0x1333   :  { %v1672_v1 = vadd.f32 %v3568_v41, %v1671_v24 }
0x1335   :  { %v2514_v45 = vmul.f32 -1.442695, %v1672_v1 }
0x1337   :  { %2667 = vpow2.f32 %v2514_v45 }
0x133d   :  { %v2668_v3 = vpop.eup %2667 }
0x133e   :  { %v1676_v29 = vadd.f32 1.0, %v2668_v3 }
0x1340   :  { %2669 = vrcp.f32 %v1676_v29  ;;  %v1688_v44 = vand.u32 2147483648, %v1676_v29  ;;  %v1686_v17 = vand.u32 2147483647, %v1676_v29  ;;  %vm1682_vm8 = vweird.f32 %v1676_v29 }
0x1342   :  { %v1689_v32 = vor.u32 1.1754944e-38, %v1688_v44  ;;  %vm1687_vm12 = vcmp.eq.f32.partialorder %v1686_v17, 8.507059e+37 }
0x1346   :  { %v2670_v5 = vpop.eup %2669 }
0x1347   :  { %v1678_v36 = vmul.f32 %v2670_v5, %v1676_v29  ;;  %vm1683_vm4 = vweird.f32 %v2670_v5 }
0x1348   :  { %vm1684_vm11 = vmor %vm1682_vm8, %vm1683_vm4 }
0x1349   :  { %v1679_v48 = vsub.f32 1.0, %v1678_v36 }
0x134b   :  { %v1680_v46 = vmul.f32 %v2670_v5, %v1679_v48 }
0x134d   :  { %v1681_v28 = vadd.f32 %v2670_v5, %v1680_v46 }
0x134f   :  { %v1685_v51 = vsel %vm1684_vm11, %v2670_v5, %v1681_v28 }
0x1350   :  { %v1690_v10 = vsel %vm1687_vm12, %v1689_v32, %v1685_v51 }
0x1351   :  { %v1692_v18 = vmul.f32 %v1690_v10, %v3309_v57  ;;  %v1699_v27 = vsub.f32 1.0, %v1690_v10 }
0x1353   :  { %1694 = vrot.lane.b32.xlu2 %v1692_v18, %s3021_s27 }
0x13ad   :  { %v1695_v21 = vpop.permute.xlu2 %1694 }
0x13ae   :  { %v1697_v34 = vadd.f32 %v1695_v21, %v1671_v24 }
0x13b0   :  { %2671 = vtanh.f32 %v1697_v34 }
0x13b6   :  { %v2672_v13 = vpop.eup %2671 }
0x13b7   :  { %1701 = vrot.lane.b32.xlu1 %v2672_v13, %s3030_s23 }
0x1429   :  { %v1702_v30 = vpop.permute.xlu1 %1701 }
0x142a   :  { %v1704_v16 = vmul.f32 %v1702_v30, %v1699_v27 }
0x142c   :  { %1706 = vrot.lane.b32.xlu2 %v1704_v16, %s3030_s23 }
0x1486   :  { %v1707_v40 = vpop.permute.xlu2 %1706 }
0x1487   :  { %2515 = vmatmul.msk.f32.vlgmr.msra.gmra.mxu3 %vm187_vm0, %v1707_v40  ;;  %2516 = vmatmul.msk.f32.vlgmr.msrb.gmra.mxu2 %vm187_vm0, %v1707_v40 }
0x1488   :  { %2440 = vmatpush.msra.mxu3 %v3577_v0 }
0x148a   :  { %2441 = vmatpush.msra.mxu3 %v3580_v14 }
0x148c   :  { %2442 = vmatpush.msra.mxu3 %v3583_v15 }
0x148e   :  { %2443 = vmatpush.msra.mxu3 %v3586_v22 }
0x150a   :  { %v1727_v50 = vpop.f32.mrf.mxu3  ;;  %v1747_v9 = vpop.f32.mrf.mxu2 }
0x150b   :  { %v1728_v49 = vadd.f32 %v1727_v50, %v3365_v47  ;;  %v1748_v7 = vadd.f32 %v1747_v9, %v3362_v20 }
0x150d   :  { %1751 = vst [vmem:[#allocation17 + $0xc] sm:$0xf] %v1728_v49  ;;  %v1753_v53 = vrot.slane %v1748_v7, 1  ;;  %v1754_v25 = vrot.slane %v1748_v7, 2  ;;  %v1755_v12 = vrot.slane %v1748_v7, 3  ;;  %v1756_v2 = vperm.slane %v1748_v7, 0 }
0x150f   :  { %v1757_v54 = vperm.slane %v1753_v53, 0  ;;  %v1758_v55 = vperm.slane %v1754_v25, 0  ;;  %v1759_v0 = vperm.slane %v1755_v12, 0  ;;  %v1764_v14 = vadd.f32 %v1756_v2, %v3186_v19 }
0x1511   :  { %2673 = vtanh.f32 %v1764_v14  ;;  %v1766_v15 = vadd.f32 %v1758_v55, %v3199_v35  ;;  %v1765_v22 = vadd.f32 %v1757_v54, %v3189_v26  ;;  %v1767_v59 = vadd.f32 %v1759_v0, %v3204_v43 }
0x1513   :  { %2675 = vtanh.f32 %v1766_v15 }
0x1514   :  { %2677 = vtanh.f32 %v1765_v22 }
0x1515   :  { %2679 = vtanh.f32 %v1767_v59 }
0x1517   :  { %v2674_v38 = vpop.eup %2673 }
0x1518   :  { %v1772_v60 = vmul.f32 %v3688_v62, %v2674_v38 }
0x1519   :  { %v2676_v6 = vpop.eup %2675 }
0x151a   :  { %v2678_v8 = vpop.eup %2677  ;;  %v1776_v63 = vsel %vm187_vm0, %v1772_v60, 0.0  ;;  %v1774_v37 = vmul.f32 %v3688_v62, %v2676_v6 }
0x151b   :  { %1777 = vadd.xlane.f32.xlu1 %v1776_v63  ;;  %v1773_v23 = vmul.f32 %v3688_v62, %v2678_v8  ;;  %v2680_v39 = vpop.eup %2679 }
0x151c   :  { %v1782_v4 = vsel %vm187_vm0, %v1774_v37, 0.0  ;;  %v1775_v33 = vmul.f32 %v3688_v62, %v2680_v39 }
0x151d   :  { %1783 = vadd.xlane.f32.xlu0 %v1782_v4  ;;  %v1779_v52 = vsel %vm187_vm0, %v1773_v23, 0.0 }
0x151e   :  { %1780 = vadd.xlane.f32.xlu2 %v1779_v52  ;;  %v1785_v24 = vsel %vm187_vm0, %v1775_v33, 0.0 }
0x1525   :  { %1786 = vadd.xlane.f32.xlu0 %v1785_v24 }
0x158e   :  { %v1778_v1 = vpop.xlane.xlu1 %1777 }
0x158f   :  { %v1788_v5 = vadd.f32 %v1778_v1, %v3213_v58 }
0x1590   :  { %v1784_v45 = vpop.xlane.xlu0 %1783 }
0x1591   :  { %v1781_v3 = vpop.xlane.xlu2 %1780  ;;  %v1790_v36 = vadd.f32 %v1784_v45, %v3213_v58  ;;  %v1796_v44 = vperm.slane %v1788_v5, %v3211_v56 }
0x1592   :  { %v1789_v29 = vadd.f32 %v1781_v3, %v3213_v58 }
0x1593   :  { %v1798_v46 = vperm.slane %v1790_v36, %v3211_v56 }
0x1594   :  { %v1797_v48 = vperm.slane %v1789_v29, %v3211_v56 }
0x1596   :  { %v1800_v32 = vsel %vm347_vm1, %v1797_v48, %v1796_v44 }
0x1597   :  { %v1801_v10 = vsel %vm349_vm2, %v1798_v46, %v1800_v32 }
0x1598   :  { %v1787_v17 = vpop.xlane.xlu0 %1786 }
0x1599   :  { %v1791_v28 = vadd.f32 %v1787_v17, %v3213_v58 }
0x159b   :  { %v1799_v51 = vperm.slane %v1791_v28, %v3211_v56 }
0x159d   :  { %v1802_v18 = vsel %vm351_vm3, %v1799_v51, %v1801_v10 }
0x159e   :  { %v1804_v21 = vsel %vm3886_vm13, %v1802_v18, -inf }
0x159f   :  { %1805 = vmax.xlane.f32.xlu0 %v1804_v21 }
0x1612   :  { %v1806_v34 = vpop.xlane.xlu0 %1805 }
0x1613   :  { %v1808_v13 = vperm.slane %v1806_v34, 0  ;;  %v1809_v27 = vperm.slane %v1806_v34, 1  ;;  %v1810_v30 = vperm.slane %v1806_v34, 2  ;;  %v1811_v16 = vperm.slane %v1806_v34, 3 }
0x1615   :  { %v1816_v40 = vsub.f32 %v1788_v5, %v1808_v13  ;;  %v1817_v50 = vsub.f32 %v1789_v29, %v1809_v27  ;;  %v1818_v9 = vsub.f32 %v1790_v36, %v1810_v30  ;;  %v1819_v25 = vsub.f32 %v1791_v28, %v1811_v16 }
0x1617   :  { %v1820_v49 = vmul.f32 1.442695, %v1816_v40  ;;  %v1822_v7 = vmul.f32 1.442695, %v1817_v50  ;;  %v1824_v53 = vmul.f32 1.442695, %v1818_v9 }
0x1618   :  { %v1826_v12 = vmul.f32 1.442695, %v1819_v25 }
0x1619   :  { %2681 = vpow2.f32 %v1820_v49 }
0x161a   :  { %2683 = vpow2.f32 %v1822_v7 }
0x161b   :  { %2685 = vpow2.f32 %v1824_v53 }
0x161c   :  { %2687 = vpow2.f32 %v1826_v12 }
0x161f   :  { %v3710_v2 = vpop.eup %2681 }
0x1620   :  { %v3712_v54 = vpop.eup %2683  ;;  %1833 = vperm.xlu0 %2545, %v3710_v2  }
0x1621   :  { %v3715_v55 = vpop.eup %2685  ;;  %1836 = vperm.xlu1 %2544, %v3712_v54  }
0x1622   :  { %1839 = vperm.xlu2 %2546, %v3715_v55   ;;  %v3719_v0 = vpop.eup %2687 }
0x1628   :  { %1842 = vperm.xlu0 %2545, %v3719_v0  }
0x167c   :  { %v1840_v38 = vpop.permute.xlu2 %1839 }
0x167d   :  { %v1846_v6 = vperm.slane %v1840_v38, %v3211_v56 }
0x1692   :  { %v1834_v14 = vpop.permute.xlu0 %1833 }
0x1693   :  { %v1837_v15 = vpop.permute.xlu1 %1836  ;;  %v1844_v59 = vperm.slane %v1834_v14, %v3211_v56 }
0x1694   :  { %v1845_v22 = vperm.slane %v1837_v15, %v3211_v56 }
0x1696   :  { %v1848_v60 = vsel %vm347_vm1, %v1845_v22, %v1844_v59 }
0x1697   :  { %v1849_v37 = vsel %vm349_vm2, %v1846_v6, %v1848_v60 }
0x169a   :  { %v1843_v8 = vpop.permute.xlu0 %1842 }
0x169b   :  { %v1847_v63 = vperm.slane %v1843_v8, %v3211_v56 }
0x169d   :  { %v1850_v23 = vsel %vm351_vm3, %v1847_v63, %v1849_v37 }
0x169e   :  { %v1852_v4 = vsel %vm3887_vm14, %v1850_v23, 0.0 }
0x169f   :  { %1853 = vadd.xlane.f32.xlu0 %v1852_v4 }
0x1712   :  { %v1854_v39 = vpop.xlane.xlu0 %1853 }
0x1713   :  { %v1856_v52 = vperm.slane %v1854_v39, 0  ;;  %v1857_v33 = vperm.slane %v1854_v39, 1  ;;  %v1858_v24 = vperm.slane %v1854_v39, 2  ;;  %v1859_v1 = vperm.slane %v1854_v39, 3 }
0x1715   :  { %2689 = vrcp.f32 %v1856_v52  ;;  %v1888_v48 = vand.u32 2147483647, %v1857_v33  ;;  %v1890_v46 = vand.u32 2147483648, %v1857_v33  ;;  %v1873_v28 = vand.u32 2147483647, %v1856_v52 }
0x1716   :  { %2691 = vrcp.f32 %v1857_v33  ;;  %vm1884_vm6 = vweird.f32 %v1857_v33  ;;  %v1875_v10 = vand.u32 2147483648, %v1856_v52  ;;  %vm1869_vm15 = vweird.f32 %v1856_v52 }
0x1717   :  { %2693 = vrcp.f32 %v1858_v24  ;;  %vm3730_vm10 = vcmp.eq.f32.partialorder %v1888_v48, 8.507059e+37  ;;  %v1891_v16 = vor.u32 1.1754944e-38, %v1890_v46  ;;  %vm1874_vm4 = vcmp.eq.f32.partialorder %v1873_v28, 8.507059e+37  ;;  %v3746_v46 = vld [vmem:[#allocation8 + $0x8] sm:$0xff] }
0x1718   :  { %2695 = vrcp.f32 %v1859_v1  ;;  %v1876_v49 = vor.u32 1.1754944e-38, %v1875_v10  ;;  %v1920_v53 = vand.u32 2147483648, %v1859_v1  ;;  %v1905_v14 = vand.u32 2147483648, %v1858_v24 }
0x1719   :  { %vm1899_vm14 = vweird.f32 %v1858_v24  ;;  %v1903_v6 = vand.u32 2147483647, %v1858_v24  ;;  %v1918_v63 = vand.u32 2147483647, %v1859_v1 }
0x171a   :  { %v1906_v4 = vor.u32 1.1754944e-38, %v1905_v14  ;;  %v1921_v39 = vor.u32 1.1754944e-38, %v1920_v53 }
0x171b   :  { %v2690_v45 = vpop.eup %2689 }
0x171c   :  { %v2692_v3 = vpop.eup %2691  ;;  %v1865_v29 = vmul.f32 %v2690_v45, %v1856_v52  ;;  %vm1870_vm5 = vweird.f32 %v2690_v45 }
0x171d   :  { %v2694_v5 = vpop.eup %2693  ;;  %v1880_v36 = vmul.f32 %v2692_v3, %v1857_v33  ;;  %vm1885_vm7 = vweird.f32 %v2692_v3  ;;  %vm1871_vm8 = vmor %vm1869_vm15, %vm1870_vm5  ;;  %vm1914_vm15 = vweird.f32 %v1859_v1 }
0x171e   :  { %v2696_v44 = vpop.eup %2695  ;;  %v1866_v17 = vsub.f32 1.0, %v1865_v29  ;;  %v1895_v32 = vmul.f32 %v2694_v5, %v1858_v24  ;;  %vm1886_vm11 = vmor %vm1884_vm6, %vm1885_vm7  ;;  %vm1900_vm12 = vweird.f32 %v2694_v5  ;;  %vm1904_vm7 = vcmp.eq.f32.partialorder %v1903_v6, 8.507059e+37 }
0x171f   :  { %v1881_v51 = vsub.f32 1.0, %v1880_v36  ;;  %v1910_v18 = vmul.f32 %v2696_v44, %v1859_v1  ;;  %vm1915_vm13 = vweird.f32 %v2696_v44  ;;  %vm1901_vm6 = vmor %vm1899_vm14, %vm1900_vm12  ;;  %v1977_v1 = vld [vmem:[#allocation3 + $0x10] sm:$0xf] }
0x1720   :  { %v1867_v21 = vmul.f32 %v2690_v45, %v1866_v17  ;;  %v1896_v34 = vsub.f32 1.0, %v1895_v32  ;;  %vm1916_vm5 = vmor %vm1914_vm15, %vm1915_vm13  ;;  %2517 = vmatmul.msk.f32.vlgmr.msra.gmra.mxu0 %vm528_vm9, %v1977_v1  ;;  %vm3890_vm13 = vcmask 60416  }
0x1721   :  { %v1882_v13 = vmul.f32 %v2692_v3, %v1881_v51  ;;  %v1911_v30 = vsub.f32 1.0, %v1910_v18  ;;  %vm3891_vm14 = vmmov %vm3890_vm13 }
0x1722   :  { %v1868_v40 = vadd.f32 %v2690_v45, %v1867_v21  ;;  %v1897_v50 = vmul.f32 %v2694_v5, %v1896_v34 }
0x1723   :  { %v1883_v9 = vadd.f32 %v2692_v3, %v1882_v13  ;;  %v1912_v7 = vmul.f32 %v2696_v44, %v1911_v30 }
0x1724   :  { %v1872_v25 = vsel %vm1871_vm8, %v2690_v45, %v1868_v40  ;;  %v1898_v12 = vadd.f32 %v2694_v5, %v1897_v50 }
0x1725   :  { %v1887_v15 = vsel %vm1886_vm11, %v2692_v3, %v1883_v9  ;;  %v1877_v22 = vsel %vm1874_vm4, %v1876_v49, %v1872_v25  ;;  %v1913_v59 = vadd.f32 %v2696_v44, %v1912_v7  ;;  %vm1919_vm4 = vcmp.eq.f32.partialorder %v1918_v63, 8.507059e+37 }
0x1726   :  { %v1892_v38 = vsel %vm3730_vm10, %v1891_v16, %v1887_v15  ;;  %v1878_v60 = vmul.f32 %v3710_v2, %v1877_v22  ;;  %v1902_v37 = vsel %vm1901_vm6, %v2694_v5, %v1898_v12 }
0x1727   :  { %v1893_v8 = vmul.f32 %v3712_v54, %v1892_v38  ;;  %v1917_v23 = vsel %vm1916_vm5, %v2696_v44, %v1913_v59  ;;  %v1907_v52 = vsel %vm1904_vm7, %v1906_v4, %v1902_v37 }
0x1728   :  { %1926 = vperm.xlu2 %2546, %v1878_v60   ;;  %v1922_v33 = vsel %vm1919_vm4, %v1921_v39, %v1917_v23  ;;  %v1908_v2 = vmul.f32 %v3715_v55, %v1907_v52 }
0x1729   :  { %1931 = vperm.xlu1 %2544, %v1893_v8   ;;  %v1923_v24 = vmul.f32 %v3719_v0, %v1922_v33 }
0x1730   :  { %1936 = vperm.xlu2 %2546, %v1908_v2  }
0x1731   :  { %1941 = vperm.xlu1 %2544, %v1923_v24  }
0x1782   :  { %v1927_v54 = vpop.permute.xlu2 %1926 }
0x1783   :  { %v1944_v45 = vmul.f32 %v3646_v11, %v1927_v54 }
0x1785   :  { %v1948_v5 = vsel %vm187_vm0, %v1944_v45, 0.0 }
0x1786   :  { %v1949_v36 = vrot.slane %v1948_v5, 4 }
0x1788   :  { %v1950_v17 = vadd.f32 %v1949_v36, %v1948_v5 }
0x178a   :  { %v1937_v3 = vpop.permute.xlu2 %1936  ;;  %v1951_v10 = vrot.slane %v1950_v17, 2 }
0x178b   :  { %v1946_v29 = vmul.f32 %v3539_v61, %v1937_v3 }
0x178c   :  { %v1952_v27 = vadd.f32 %v1951_v10, %v1950_v17 }
0x178d   :  { %v1962_v48 = vsel %vm187_vm0, %v1946_v29, 0.0 }
0x178e   :  { %v1963_v55 = vrot.slane %v1962_v48, 4  ;;  %v1953_v49 = vrot.slane %v1952_v27, 1 }
0x1790   :  { %v1964_v51 = vadd.f32 %v1963_v55, %v1962_v48  ;;  %v1954_v14 = vadd.f32 %v1953_v49, %v1952_v27 }
0x1792   :  { %v1965_v34 = vrot.slane %v1964_v51, 2 }
0x1794   :  { %v1966_v9 = vadd.f32 %v1965_v34, %v1964_v51 }
0x1796   :  { %v1967_v12 = vrot.slane %v1966_v9, 1 }
0x1798   :  { %v1968_v38 = vadd.f32 %v1967_v12, %v1966_v9 }
0x179b   :  { %v1932_v44 = vpop.permute.xlu1 %1931 }
0x179c   :  { %v1945_v0 = vmul.f32 %v3746_v46, %v1932_v44 }
0x179d   :  { %v1998_v63 = vpop.f32.mrf.mxu0 }
0x179e   :  { %v1955_v28 = vsel %vm187_vm0, %v1945_v0, 0.0 }
0x179f   :  { %v1956_v32 = vrot.slane %v1955_v28, 4 }
0x17a1   :  { %v1957_v18 = vadd.f32 %v1956_v32, %v1955_v28 }
0x17a3   :  { %v1958_v21 = vrot.slane %v1957_v18, 2  ;;  %v1942_v61 = vpop.permute.xlu1 %1941 }
0x17a4   :  { %v1947_v13 = vmul.f32 %v3655_v42, %v1942_v61 }
0x17a5   :  { %v1959_v30 = vadd.f32 %v1958_v21, %v1957_v18 }
0x17a6   :  { %v1969_v16 = vsel %vm187_vm0, %v1947_v13, 0.0 }
0x17a7   :  { %v1960_v40 = vrot.slane %v1959_v30, 1  ;;  %v1970_v50 = vrot.slane %v1969_v16, 4 }
0x17a9   :  { %v1971_v7 = vadd.f32 %v1970_v50, %v1969_v16  ;;  %v1961_v53 = vadd.f32 %v1960_v40, %v1959_v30 }
0x17ab   :  { %v1972_v25 = vrot.slane %v1971_v7, 2  ;;  %v2005_v59 = vsel %vm347_vm1, %v1961_v53, %v1954_v14 }
0x17ac   :  { %v2006_v6 = vsel %vm349_vm2, %v1968_v38, %v2005_v59 }
0x17ad   :  { %v1973_v15 = vadd.f32 %v1972_v25, %v1971_v7 }
0x17af   :  { %v1974_v22 = vrot.slane %v1973_v15, 1 }
0x17b1   :  { %v1975_v60 = vadd.f32 %v1974_v22, %v1973_v15 }
0x17b3   :  { %v2007_v8 = vsel %vm351_vm3, %v1975_v60, %v2006_v6 }
0x17b4   :  { %2518 = vmatmul.msk.f32.vlgmr.msrb.gmra.mxu1 %vm187_vm0, %v2007_v8 }
0x1831   :  { %v2027_v37 = vpop.f32.mrf.mxu1 }
0x1832   :  { %v2028_v23 = vadd.f32 %v2027_v37, %v1998_v63 }
0x1834   :  { %v2030_v4 = vadd.f32 %v3562_v31, %v2028_v23 }
0x1836   :  { %v2031_v39 = vadd.f32 %v3568_v41, %v2030_v4 }
0x1838   :  { %v2519_v52 = vmul.f32 -1.442695, %v2031_v39 }
0x183a   :  { %2697 = vpow2.f32 %v2519_v52 }
0x1840   :  { %v2698_v33 = vpop.eup %2697 }
0x1841   :  { %v2035_v2 = vadd.f32 1.0, %v2698_v33 }
0x1843   :  { %2699 = vrcp.f32 %v2035_v2  ;;  %v2047_v45 = vand.u32 2147483648, %v2035_v2  ;;  %v2045_v29 = vand.u32 2147483647, %v2035_v2  ;;  %vm2041_vm8 = vweird.f32 %v2035_v2 }
0x1845   :  { %v2048_v36 = vor.u32 1.1754944e-38, %v2047_v45  ;;  %vm2046_vm12 = vcmp.eq.f32.partialorder %v2045_v29, 8.507059e+37 }
0x1849   :  { %v2700_v24 = vpop.eup %2699 }
0x184a   :  { %v2037_v54 = vmul.f32 %v2700_v24, %v2035_v2  ;;  %vm2042_vm10 = vweird.f32 %v2700_v24 }
0x184b   :  { %vm2043_vm11 = vmor %vm2041_vm8, %vm2042_vm10 }
0x184c   :  { %v2038_v1 = vsub.f32 1.0, %v2037_v54 }
0x184e   :  { %v2039_v3 = vmul.f32 %v2700_v24, %v2038_v1 }
0x1850   :  { %v2040_v5 = vadd.f32 %v2700_v24, %v2039_v3 }
0x1852   :  { %v2044_v48 = vsel %vm2043_vm11, %v2700_v24, %v2040_v5 }
0x1853   :  { %v2049_v31 = vsel %vm2046_vm12, %v2048_v36, %v2044_v48 }
0x1854   :  { %v2051_v41 = vmul.f32 %v2049_v31, %v3309_v57  ;;  %v2058_v17 = vsub.f32 1.0, %v2049_v31 }
0x1856   :  { %2053 = vrot.lane.b32.xlu2 %v2051_v41, %s3021_s27 }
0x18b0   :  { %v2054_v44 = vpop.permute.xlu2 %2053 }
0x18b1   :  { %v2056_v55 = vadd.f32 %v2054_v44, %v2030_v4 }
0x18b3   :  { %2701 = vtanh.f32 %v2056_v55 }
0x18b9   :  { %v2702_v0 = vpop.eup %2701 }
0x18ba   :  { %2060 = vrot.lane.b32.xlu1 %v2702_v0, %s3030_s23 }
0x192c   :  { %v2061_v28 = vpop.permute.xlu1 %2060 }
0x192d   :  { %v2063_v32 = vmul.f32 %v2061_v28, %v2058_v17 }
0x192f   :  { %2065 = vrot.lane.b32.xlu2 %v2063_v32, %s3030_s23 }
0x1989   :  { %v2066_v51 = vpop.permute.xlu2 %2065 }
0x198a   :  { %2520 = vmatmul.msk.f32.vlgmr.msrb.gmra.mxu3 %vm187_vm0, %v2066_v51  ;;  %2521 = vmatmul.msk.f32.vlgmr.msra.gmra.mxu2 %vm187_vm0, %v2066_v51 }
0x1a0d   :  { %v2086_v10 = vpop.f32.mrf.mxu3  ;;  %v2106_v18 = vpop.f32.mrf.mxu2 }
0x1a0e   :  { %v2087_v21 = vadd.f32 %v2086_v10, %v3365_v47  ;;  %v2107_v61 = vadd.f32 %v2106_v18, %v3362_v20 }
0x1a10   :  { %2110 = vst [vmem:[#allocation17 + $0x10] sm:$0xf] %v2087_v21  ;;  %v2112_v34 = vrot.slane %v2107_v61, 1  ;;  %v2113_v13 = vrot.slane %v2107_v61, 2  ;;  %v2114_v27 = vrot.slane %v2107_v61, 3  ;;  %v2115_v30 = vperm.slane %v2107_v61, 0 }
0x1a12   :  { %v2116_v16 = vperm.slane %v2112_v34, 0  ;;  %v2117_v40 = vperm.slane %v2113_v13, 0  ;;  %v2118_v50 = vperm.slane %v2114_v27, 0  ;;  %v2123_v9 = vadd.f32 %v2115_v30, %v3186_v19 }
0x1a14   :  { %2703 = vtanh.f32 %v2123_v9  ;;  %v2125_v49 = vadd.f32 %v2117_v40, %v3199_v35  ;;  %v2124_v7 = vadd.f32 %v2116_v16, %v3189_v26  ;;  %v2126_v53 = vadd.f32 %v2118_v50, %v3204_v43 }
0x1a16   :  { %2705 = vtanh.f32 %v2125_v49 }
0x1a17   :  { %2707 = vtanh.f32 %v2124_v7 }
0x1a18   :  { %2709 = vtanh.f32 %v2126_v53 }
0x1a1a   :  { %v2704_v20 = vpop.eup %2703 }
0x1a1b   :  { %v2131_v25 = vmul.f32 %v3688_v62, %v2704_v20 }
0x1a1c   :  { %v2706_v12 = vpop.eup %2705 }
0x1a1d   :  { %v2708_v14 = vpop.eup %2707  ;;  %v2135_v15 = vsel %vm187_vm0, %v2131_v25, 0.0  ;;  %v2133_v22 = vmul.f32 %v3688_v62, %v2706_v12 }
0x1a1e   :  { %2136 = vadd.xlane.f32.xlu1 %v2135_v15  ;;  %v2132_v19 = vmul.f32 %v3688_v62, %v2708_v14  ;;  %v2710_v26 = vpop.eup %2709 }
0x1a1f   :  { %v2141_v35 = vsel %vm187_vm0, %v2133_v22, 0.0  ;;  %v2134_v59 = vmul.f32 %v3688_v62, %v2710_v26 }
0x1a20   :  { %2142 = vadd.xlane.f32.xlu0 %v2141_v35  ;;  %v2138_v43 = vsel %vm187_vm0, %v2132_v19, 0.0 }
0x1a21   :  { %2139 = vadd.xlane.f32.xlu2 %v2138_v43  ;;  %v2144_v38 = vsel %vm187_vm0, %v2134_v59, 0.0 }
0x1a28   :  { %2145 = vadd.xlane.f32.xlu0 %v2144_v38 }
0x1a91   :  { %v2137_v60 = vpop.xlane.xlu1 %2136 }
0x1a92   :  { %v2147_v37 = vadd.f32 %v2137_v60, %v3213_v58 }
0x1a93   :  { %v2143_v6 = vpop.xlane.xlu0 %2142 }
0x1a94   :  { %v2140_v8 = vpop.xlane.xlu2 %2139  ;;  %v2149_v23 = vadd.f32 %v2143_v6, %v3213_v58  ;;  %v2155_v39 = vperm.slane %v2147_v37, %v3211_v56 }
0x1a95   :  { %v2148_v63 = vadd.f32 %v2140_v8, %v3213_v58 }
0x1a96   :  { %v2157_v52 = vperm.slane %v2149_v23, %v3211_v56 }
0x1a97   :  { %v2156_v4 = vperm.slane %v2148_v63, %v3211_v56 }
0x1a99   :  { %v2159_v2 = vsel %vm347_vm1, %v2156_v4, %v2155_v39 }
0x1a9a   :  { %v2160_v54 = vsel %vm349_vm2, %v2157_v52, %v2159_v2 }
0x1a9b   :  { %v2146_v33 = vpop.xlane.xlu0 %2145 }
0x1a9c   :  { %v2150_v62 = vadd.f32 %v2146_v33, %v3213_v58 }
0x1a9e   :  { %v2158_v24 = vperm.slane %v2150_v62, %v3211_v56 }
0x1aa0   :  { %v2161_v1 = vsel %vm351_vm3, %v2158_v24, %v2160_v54 }
0x1aa1   :  { %v2163_v45 = vsel %vm3890_vm13, %v2161_v1, -inf }
0x1aa2   :  { %2164 = vmax.xlane.f32.xlu0 %v2163_v45 }
0x1b15   :  { %v2165_v3 = vpop.xlane.xlu0 %2164 }
0x1b16   :  { %v2167_v29 = vperm.slane %v2165_v3, 0  ;;  %v2168_v5 = vperm.slane %v2165_v3, 1  ;;  %v2169_v36 = vperm.slane %v2165_v3, 2  ;;  %v2170_v48 = vperm.slane %v2165_v3, 3 }
0x1b18   :  { %v2175_v31 = vsub.f32 %v2147_v37, %v2167_v29  ;;  %v2176_v41 = vsub.f32 %v2148_v63, %v2168_v5  ;;  %v2177_v44 = vsub.f32 %v2149_v23, %v2169_v36  ;;  %v2178_v17 = vsub.f32 %v2150_v62, %v2170_v48 }
0x1b1a   :  { %v2179_v58 = vmul.f32 1.442695, %v2175_v31  ;;  %v2181_v55 = vmul.f32 1.442695, %v2176_v41  ;;  %v2183_v0 = vmul.f32 1.442695, %v2177_v44 }
0x1b1b   :  { %v2185_v28 = vmul.f32 1.442695, %v2178_v17 }
0x1b1c   :  { %2711 = vpow2.f32 %v2179_v58 }
0x1b1d   :  { %2713 = vpow2.f32 %v2181_v55 }
0x1b1e   :  { %2715 = vpow2.f32 %v2183_v0 }
0x1b1f   :  { %2717 = vpow2.f32 %v2185_v28 }
0x1b22   :  { %v3790_v32 = vpop.eup %2711 }
0x1b23   :  { %v3792_v51 = vpop.eup %2713  ;;  %2192 = vperm.xlu0 %2545, %v3790_v32  }
0x1b24   :  { %v3795_v10 = vpop.eup %2715  ;;  %2195 = vperm.xlu1 %2544, %v3792_v51  }
0x1b25   :  { %2198 = vperm.xlu2 %2546, %v3795_v10   ;;  %v3799_v18 = vpop.eup %2717 }
0x1b2b   :  { %2201 = vperm.xlu0 %2545, %v3799_v18  }
0x1b7f   :  { %v2199_v27 = vpop.permute.xlu2 %2198 }
0x1b80   :  { %v2205_v16 = vperm.slane %v2199_v27, %v3211_v56 }
0x1b95   :  { %v2193_v21 = vpop.permute.xlu0 %2192 }
0x1b96   :  { %v2196_v61 = vpop.permute.xlu1 %2195  ;;  %v2203_v13 = vperm.slane %v2193_v21, %v3211_v56 }
0x1b97   :  { %v2204_v34 = vperm.slane %v2196_v61, %v3211_v56 }
0x1b99   :  { %v2207_v30 = vsel %vm347_vm1, %v2204_v34, %v2203_v13 }
0x1b9a   :  { %v2208_v9 = vsel %vm349_vm2, %v2205_v16, %v2207_v30  ;;  %v2336_v16 = vld [vmem:[#allocation3 + $0x14] sm:$0xf] }
0x1b9b   :  { %2522 = vmatmul.msk.f32.vlgmr.msrb.gmra.mxu0 %vm528_vm9, %v2336_v16 }
0x1b9d   :  { %v2202_v40 = vpop.permute.xlu0 %2201 }
0x1b9e   :  { %v2206_v50 = vperm.slane %v2202_v40, %v3211_v56 }
0x1ba0   :  { %v2209_v49 = vsel %vm351_vm3, %v2206_v50, %v2208_v9 }
0x1ba1   :  { %v2211_v7 = vsel %vm3891_vm14, %v2209_v49, 0.0 }
0x1ba2   :  { %2212 = vadd.xlane.f32.xlu0 %v2211_v7 }
0x1c15   :  { %v2213_v53 = vpop.xlane.xlu0 %2212 }
0x1c16   :  { %v2215_v20 = vperm.slane %v2213_v53, 0  ;;  %v2216_v25 = vperm.slane %v2213_v53, 1  ;;  %v2217_v12 = vperm.slane %v2213_v53, 2  ;;  %v2218_v14 = vperm.slane %v2213_v53, 3 }
0x1c18   :  { %2719 = vrcp.f32 %v2215_v20  ;;  %v2247_v26 = vand.u32 2147483647, %v2216_v25  ;;  %v2249_v38 = vand.u32 2147483648, %v2216_v25  ;;  %v2232_v6 = vand.u32 2147483647, %v2215_v20 }
0x1c19   :  { %2721 = vrcp.f32 %v2216_v25  ;;  %vm2243_vm15 = vweird.f32 %v2216_v25  ;;  %v2234_v37 = vand.u32 2147483648, %v2215_v20  ;;  %vm2228_vm6 = vweird.f32 %v2215_v20 }
0x1c1a   :  { %2723 = vrcp.f32 %v2217_v12  ;;  %vm3810_vm4 = vcmp.eq.f32.partialorder %v2247_v26, 8.507059e+37  ;;  %v2250_v62 = vor.u32 1.1754944e-38, %v2249_v38  ;;  %vm2233_vm10 = vcmp.eq.f32.partialorder %v2232_v6, 8.507059e+37 }
0x1c1b   :  { %2725 = vrcp.f32 %v2218_v14  ;;  %v2235_v1 = vor.u32 1.1754944e-38, %v2234_v37  ;;  %v2279_v3 = vand.u32 2147483648, %v2218_v14  ;;  %v2264_v36 = vand.u32 2147483648, %v2217_v12 }
0x1c1c   :  { %vm2258_vm14 = vweird.f32 %v2217_v12  ;;  %v2262_v55 = vand.u32 2147483647, %v2217_v12  ;;  %v2277_v17 = vand.u32 2147483647, %v2218_v14 }
0x1c1d   :  { %v2265_v61 = vor.u32 1.1754944e-38, %v2264_v36  ;;  %v2280_v34 = vor.u32 1.1754944e-38, %v2279_v3 }
0x1c1e   :  { %v2720_v15 = vpop.eup %2719 }
0x1c1f   :  { %v2722_v22 = vpop.eup %2721  ;;  %v2224_v19 = vmul.f32 %v2720_v15, %v2215_v20  ;;  %vm2229_vm5 = vweird.f32 %v2720_v15 }
0x1c20   :  { %v2724_v56 = vpop.eup %2723  ;;  %v2239_v35 = vmul.f32 %v2722_v22, %v2216_v25  ;;  %vm2244_vm7 = vweird.f32 %v2722_v22  ;;  %vm2230_vm8 = vmor %vm2228_vm6, %vm2229_vm5  ;;  %vm2273_vm6 = vweird.f32 %v2218_v14 }
0x1c21   :  { %v2726_v43 = vpop.eup %2725  ;;  %v2254_v59 = vmul.f32 %v2724_v56, %v2217_v12  ;;  %v2225_v60 = vsub.f32 1.0, %v2224_v19  ;;  %vm2245_vm11 = vmor %vm2243_vm15, %vm2244_vm7  ;;  %vm2259_vm12 = vweird.f32 %v2724_v56  ;;  %vm2263_vm7 = vcmp.eq.f32.partialorder %v2262_v55, 8.507059e+37 }
0x1c22   :  { %v2269_v8 = vmul.f32 %v2726_v43, %v2218_v14  ;;  %v2240_v63 = vsub.f32 1.0, %v2239_v35  ;;  %vm2274_vm13 = vweird.f32 %v2726_v43  ;;  %vm2260_vm15 = vmor %vm2258_vm14, %vm2259_vm12  ;;  %v2758_v35 = vld [vmem:[#allocation8 + $0x10] sm:$0xff] }
0x1c23   :  { %v2226_v23 = vmul.f32 %v2720_v15, %v2225_v60  ;;  %v2255_v4 = vsub.f32 1.0, %v2254_v59  ;;  %vm2275_vm5 = vmor %vm2273_vm6, %vm2274_vm13 }
0x1c24   :  { %v2241_v39 = vmul.f32 %v2722_v22, %v2240_v63  ;;  %v2270_v33 = vsub.f32 1.0, %v2269_v8 }
0x1c25   :  { %v2227_v2 = vadd.f32 %v2720_v15, %v2226_v23  ;;  %v2256_v24 = vmul.f32 %v2724_v56, %v2255_v4 }
0x1c26   :  { %v2242_v54 = vadd.f32 %v2722_v22, %v2241_v39  ;;  %v2271_v45 = vmul.f32 %v2726_v43, %v2270_v33 }
0x1c27   :  { %v2231_v29 = vsel %vm2230_vm8, %v2720_v15, %v2227_v2  ;;  %v2257_v5 = vadd.f32 %v2724_v56, %v2256_v24 }
0x1c28   :  { %v2246_v48 = vsel %vm2245_vm11, %v2722_v22, %v2242_v54  ;;  %v2236_v31 = vsel %vm2233_vm10, %v2235_v1, %v2231_v29  ;;  %v2272_v41 = vadd.f32 %v2726_v43, %v2271_v45  ;;  %vm2278_vm10 = vcmp.eq.f32.partialorder %v2277_v17, 8.507059e+37  ;;  %v2357_v45 = vpop.f32.mrf.mxu0 }
0x1c29   :  { %v2251_v44 = vsel %vm3810_vm4, %v2250_v62, %v2246_v48  ;;  %v2237_v58 = vmul.f32 %v3790_v32, %v2236_v31  ;;  %v2261_v28 = vsel %vm2260_vm15, %v2724_v56, %v2257_v5  ;;  %v2759_v5 = vld [vmem:[%s3865_s11] ss:$0 sm:$0xff]  ;;  %vm2451_vm4 = vcmask 257024   ;;  %s3031_s11 = smov [#allocation18]  }
0x1c2a   :  { %v2252_v0 = vmul.f32 %v3792_v51, %v2251_v44  ;;  %v2276_v21 = vsel %vm2275_vm5, %v2726_v43, %v2272_v41  ;;  %v2266_v13 = vsel %vm2263_vm7, %v2265_v61, %v2261_v28  ;;  %v2760_v48 = vld [vmem:[%s3866_s12] ss:$0 sm:$0xff]  ;;  %s2471_s12 = sshll.u32 %s3031_s11, 4  ;;  %s2472_s12 = int_to_ptr.vmem [resolvable:$true] %s2471_s12 }
0x1c2b   :  { %2285 = vperm.xlu1 %2544, %v2237_v58   ;;  %v2281_v27 = vsel %vm2278_vm10, %v2280_v34, %v2276_v21  ;;  %v2267_v32 = vmul.f32 %v3795_v10, %v2266_v13 }
0x1c2c   :  { %2290 = vperm.xlu2 %2546, %v2252_v0   ;;  %v2282_v30 = vmul.f32 %v3799_v18, %v2281_v27 }
0x1c33   :  { %2295 = vperm.xlu1 %2544, %v2267_v32  }
0x1c34   :  { %2300 = vperm.xlu2 %2546, %v2282_v30  }
0x1c86   :  { %v2291_v51 = vpop.permute.xlu2 %2290 }
0x1c87   :  { %v2304_v50 = vmul.f32 %v3746_v46, %v2291_v51 }
0x1c89   :  { %v2314_v49 = vsel %vm187_vm0, %v2304_v50, 0.0 }
0x1c8a   :  { %v2315_v20 = vrot.slane %v2314_v49, 4 }
0x1c8c   :  { %v2316_v14 = vadd.f32 %v2315_v20, %v2314_v49 }
0x1c8e   :  { %v2301_v40 = vpop.permute.xlu2 %2300  ;;  %v2317_v46 = vrot.slane %v2316_v14, 2 }
0x1c8f   :  { %v2306_v9 = vmul.f32 %v3655_v42, %v2301_v40 }
0x1c90   :  { %v2318_v60 = vadd.f32 %v2317_v46, %v2316_v14 }
0x1c91   :  { %v2328_v7 = vsel %vm187_vm0, %v2306_v9, 0.0 }
0x1c92   :  { %v2329_v18 = vrot.slane %v2328_v7, 4  ;;  %v2319_v37 = vrot.slane %v2318_v60, 1 }
0x1c94   :  { %v2330_v22 = vadd.f32 %v2329_v18, %v2328_v7  ;;  %v2320_v33 = vadd.f32 %v2319_v37, %v2318_v60 }
0x1c96   :  { %v2331_v26 = vrot.slane %v2330_v22, 2 }
0x1c9d   :  { %v2286_v53 = vpop.permute.xlu1 %2285 }
0x1c9e   :  { %v2303_v10 = vmul.f32 %v3646_v11, %v2286_v53  ;;  %v2332_v11 = vadd.f32 %v2331_v26, %v2330_v22 }
0x1ca0   :  { %v2307_v25 = vsel %vm187_vm0, %v2303_v10, 0.0  ;;  %v2333_v4 = vrot.slane %v2332_v11, 1 }
0x1ca1   :  { %v2308_v12 = vrot.slane %v2307_v25, 4 }
0x1ca2   :  { %v2334_v2 = vadd.f32 %v2333_v4, %v2332_v11 }
0x1ca3   :  { %v2309_v15 = vadd.f32 %v2308_v12, %v2307_v25 }
0x1ca5   :  { %v2310_v19 = vrot.slane %v2309_v15, 2  ;;  %v2296_v56 = vpop.permute.xlu1 %2295 }
0x1ca6   :  { %v2305_v42 = vmul.f32 %v2758_v35, %v2296_v56 }
0x1ca7   :  { %v2311_v43 = vadd.f32 %v2310_v19, %v2309_v15 }
0x1ca8   :  { %v2321_v59 = vsel %vm187_vm0, %v2305_v42, 0.0 }
0x1ca9   :  { %v2322_v38 = vrot.slane %v2321_v59, 4  ;;  %v2312_v8 = vrot.slane %v2311_v43, 1 }
0x1cab   :  { %v2323_v6 = vadd.f32 %v2322_v38, %v2321_v59  ;;  %v2313_v39 = vadd.f32 %v2312_v8, %v2311_v43 }
0x1cad   :  { %v2324_v63 = vrot.slane %v2323_v6, 2  ;;  %v2364_v24 = vsel %vm347_vm1, %v2320_v33, %v2313_v39 }
0x1caf   :  { %v2325_v23 = vadd.f32 %v2324_v63, %v2323_v6 }
0x1cb1   :  { %v2326_v52 = vrot.slane %v2325_v23, 1 }
0x1cb3   :  { %v2327_v62 = vadd.f32 %v2326_v52, %v2325_v23 }
0x1cb5   :  { %v2365_v54 = vsel %vm349_vm2, %v2327_v62, %v2364_v24 }
0x1cb6   :  { %v2366_v1 = vsel %vm351_vm3, %v2334_v2, %v2365_v54 }
0x1cb7   :  { %2523 = vmatmul.msk.f32.vlgmr.msra.gmra.mxu1 %vm187_vm0, %v2366_v1 }
0x1d34   :  { %v2386_v3 = vpop.f32.mrf.mxu1 }
0x1d35   :  { %v2387_v29 = vadd.f32 %v2386_v3, %v2357_v45 }
0x1d37   :  { %v2389_v36 = vadd.f32 %v2759_v5, %v2387_v29 }
0x1d39   :  { %v2390_v31 = vadd.f32 %v2760_v48, %v2389_v36 }
0x1d3b   :  { %v2524_v41 = vmul.f32 -1.442695, %v2390_v31 }
0x1d3d   :  { %2727 = vpow2.f32 %v2524_v41 }
0x1d43   :  { %v2728_v44 = vpop.eup %2727 }
0x1d44   :  { %v2394_v58 = vadd.f32 1.0, %v2728_v44 }
0x1d46   :  { %2729 = vrcp.f32 %v2394_v58  ;;  %v2406_v28 = vand.u32 2147483648, %v2394_v58  ;;  %v2404_v61 = vand.u32 2147483647, %v2394_v58  ;;  %vm2400_vm2 = vweird.f32 %v2394_v58 }
0x1d48   :  { %v2407_v13 = vor.u32 1.1754944e-38, %v2406_v28  ;;  %vm2405_vm9 = vcmp.eq.f32.partialorder %v2404_v61, 8.507059e+37 }
0x1d4c   :  { %v2730_v55 = vpop.eup %2729 }
0x1d4d   :  { %v2396_v0 = vmul.f32 %v2730_v55, %v2394_v58  ;;  %vm2401_vm1 = vweird.f32 %v2730_v55 }
0x1d4e   :  { %vm2402_vm3 = vmor %vm2400_vm2, %vm2401_vm1 }
0x1d4f   :  { %v2397_v17 = vsub.f32 1.0, %v2396_v0 }
0x1d51   :  { %v2398_v21 = vmul.f32 %v2730_v55, %v2397_v17 }
0x1d53   :  { %v2399_v34 = vadd.f32 %v2730_v55, %v2398_v21 }
0x1d55   :  { %v2403_v27 = vsel %vm2402_vm3, %v2730_v55, %v2399_v34 }
0x1d56   :  { %v2408_v32 = vsel %vm2405_vm9, %v2407_v13, %v2403_v27 }
0x1d57   :  { %v2410_v30 = vmul.f32 %v2408_v32, %v3309_v57  ;;  %v2417_v50 = vsub.f32 1.0, %v2408_v32 }
0x1d59   :  { %2412 = vrot.lane.b32.xlu1 %v2410_v30, %s3021_s27 }
0x1dcb   :  { %v2413_v51 = vpop.permute.xlu1 %2412 }
0x1dcc   :  { %v2415_v16 = vadd.f32 %v2413_v51, %v2389_v36 }
0x1dce   :  { %2731 = vtanh.f32 %v2415_v16 }
0x1dd4   :  { %v2732_v40 = vpop.eup %2731 }
0x1dd5   :  { %2419 = vrot.lane.b32.xlu2 %v2732_v40, %s3030_s23 }
0x1e2f   :  { %v2420_v9 = vpop.permute.xlu2 %2419 }
0x1e30   :  { %v2422_v49 = vmul.f32 %v2420_v9, %v2417_v50 }
0x1e32   :  { %2424 = vrot.lane.b32.xlu1 %v2422_v49, %s3030_s23 }
0x1ea4   :  { %v2425_v7 = vpop.permute.xlu1 %2424 }
0x1ea5   :  { %2452 = vst.msk [vmem:[#allocation18] sm:$0xf] %vm2451_vm4, %v2425_v7  ;;  %2525 = vmatmul.msk.f32.vlgmr.msra.gmra.mxu3 %vm187_vm0, %v2425_v7 }
0x1ea6   :  { %2476 = dma.vmem_to_hbm [thread:$0]  %s2472_s12, 64, %s2474_s20, [#allocation19]  }
0x1f28   :  { %v2445_v57 = vpop.f32.mrf.mxu3 }
0x1f29   :  { %v2446_v53 = vadd.f32 %v2445_v57, %v3365_v47 }
0x1f2b   :  { %2449 = vst [vmem:[#allocation17 + $0x14] sm:$0xf] %v2446_v53 }
0x1f2c   :  { %2465 = dma.vmem_to_hbm [thread:$0]  %s2458_s6, 384, %s2460_s21, [#allocation5], %s3021_s27, %s3021_s27, %s3022_s28  }
0x1f2d   :  { %3011 = dma.done.wait [#allocation5], 384  }
0x1f2e   :  { %3012 = vsyncadd [#allocation5], 4294966912 }
0x1f2f   :  { %3013 = dma.done.wait [#allocation19], 64  }
0x1f30   :  { %3014 = vsyncadd [#allocation19], 4294967232 }
0x1f31   :  { %2485 = vsyncpa [#allocation4], 1 }
0x1f32   :  { %2486 = vsyncpa [#allocation7], 1 }
0x1f33   :  { %2487 = vsyncpa [#allocation10], 1 }
0x1f34   :  { %2488 = vsyncpa [#allocation13], 1 }
0x1f35   :  { %2489 = vsyncpa [#allocation16], 1 }
0x1f36   :  { %2490 = vsyncpa [#allocation5], 1 }
0x1f37   :  { %2491 = vsyncpa [#allocation19], 1 }

</bundles_post_ra>
